<compile_context>
chip_gen: v7x
topology: tpu7x:2x2x1
jax: 0.10.0
libtpu: 0.0.40
codegen_flags: <defaults>
</compile_context>

<pallas_src>
import jax
import jax.numpy as jnp
import numpy as np
from jax.experimental import pallas as pl
from jax.experimental.pallas import tpu as pltpu

N_EMBD = 384          # matches the module's n_embd
HIDDEN = 4 * N_EMBD   # 1536
MAX_TILE_M = 512      # max rows of (B*T) processed per grid step


# ---------------------------------------------------------------------------
# Pallas kernel: one (tile_m, C) row tile of the MLP.
#   x_ref : (tile_m, C)   bf16 activations
#   w1_ref: (C, 4C)       bf16
#   b1_ref: (1, 4C)       f32
#   w2_ref: (4C, C)       bf16
#   b2_ref: (1, C)        f32
#   o_ref : (tile_m, C)   f32
# ---------------------------------------------------------------------------
def feedforward_kernel(x_ref, w1_ref, b1_ref, w2_ref, b2_ref, o_ref):
    # First linear: bf16 MXU operands, f32 accumulation.
    h = jnp.dot(x_ref[...], w1_ref[...],
                preferred_element_type=jnp.float32) + b1_ref[...]
    # Fused bias + ReLU + downcast: hidden lives in bf16 (halves spill traffic
    # into the second matmul).
    h = jnp.maximum(h, 0.0).astype(jnp.bfloat16)
    # Second linear back down to C; f32 accumulation, f32 bias add.
    y = jnp.dot(h, w2_ref[...],
                preferred_element_type=jnp.float32) + b2_ref[...]
    o_ref[...] = y  # lane-dense (C = 384 = 3*128) full-width store


# ---------------------------------------------------------------------------
# Row-tile selection: biggest tile up to MAX_TILE_M that (a) does not exceed
# M rounded up to 128 and (b) leaves at least 2 grid blocks when possible so
# both v7x TensorCores get work. Always a multiple of 128.
# ---------------------------------------------------------------------------
def _pick_tile_m(M, max_tile=MAX_TILE_M):
    m128 = pl.cdiv(M, 128) * 128
    tile = max_tile
    while tile > 128 and (m128 < tile or pl.cdiv(M, tile) < 2):
        tile //= 2
    return tile


# ---------------------------------------------------------------------------
# Wrapper: flatten leading dims, grid over ragged row tiles (no host pad),
# reshape back.
# ---------------------------------------------------------------------------
def feedforward(x, w1, b1, w2, b2, *, max_tile_m=MAX_TILE_M):
    orig_shape = x.shape
    C = orig_shape[-1]
    H = w1.shape[1]

    # bf16 activations: half the x HBM->VMEM bytes, no in-kernel cast.
    x2 = x.reshape(-1, C).astype(jnp.bfloat16)
    M = x2.shape[0]
    tile_m = _pick_tile_m(M, max_tile_m)
    grid_m = pl.cdiv(M, tile_m)  # ragged last block; Pallas masks OOB writes

    # Weights travel as bf16 (half the HBM->VMEM bytes); biases stay f32 and
    # are added after the f32 accumulation.
    w1b = w1.astype(jnp.bfloat16)
    w2b = w2.astype(jnp.bfloat16)
    b1f = b1.reshape(1, H).astype(jnp.float32)
    b2f = b2.reshape(1, C).astype(jnp.float32)

    out = pl.pallas_call(
        feedforward_kernel,
        out_shape=jax.ShapeDtypeStruct((M, C), jnp.float32),
        grid=(grid_m,),
        in_specs=[
            pl.BlockSpec((tile_m, C), lambda i: (i, 0)),   # x row tile (streamed)
            pl.BlockSpec((C, H), lambda i: (0, 0)),        # W1 (resident)
            pl.BlockSpec((1, H), lambda i: (0, 0)),        # b1 (resident)
            pl.BlockSpec((H, C), lambda i: (0, 0)),        # W2 (resident)
            pl.BlockSpec((1, C), lambda i: (0, 0)),        # b2 (resident)
        ],
        out_specs=pl.BlockSpec((tile_m, C), lambda i: (i, 0)),
        compiler_params=pltpu.CompilerParams(
            dimension_semantics=("parallel",),
            vmem_limit_bytes=32 * 1024 * 1024,
        ),
    )(x2, w1b, b1f, w2b, b2f)

    return out.reshape(orig_shape)


# ---------------------------------------------------------------------------
# Pure-JAX reference with the SAME mixed precision (bf16 operands / hidden,
# f32 accumulation) — verifies the kernel reproduces the intended math.
# ---------------------------------------------------------------------------
def feedforward_ref(x, w1, b1, w2, b2):
    xb = x.astype(jnp.bfloat16)
    h = jnp.dot(xb, w1.astype(jnp.bfloat16),
                preferred_element_type=jnp.float32) + b1.reshape(1, 1, -1)
    h = jnp.maximum(h, 0.0).astype(jnp.bfloat16)
    y = jnp.dot(h, w2.astype(jnp.bfloat16),
                preferred_element_type=jnp.float32) + b2.reshape(1, 1, -1)
    return y


if __name__ == "__main__":
    key = jax.random.PRNGKey(0)
    kw1, kw2, kb1, kb2, kx = jax.random.split(key, 5)

    C, H = N_EMBD, HIDDEN
    B, T = 2, 8  # small example batch / sequence (M = 16, exercises ragged block)

    # PyTorch nn.Linear-style init scale (exact distribution irrelevant here).
    w1 = (jax.random.uniform(kw1, (C, H), minval=-1.0, maxval=1.0)
          * (1.0 / np.sqrt(C))).astype(jnp.float32)
    b1 = (jax.random.uniform(kb1, (H,), minval=-1.0, maxval=1.0)
          * (1.0 / np.sqrt(C))).astype(jnp.float32)
    w2 = (jax.random.uniform(kw2, (H, C), minval=-1.0, maxval=1.0)
          * (1.0 / np.sqrt(H))).astype(jnp.float32)
    b2 = (jax.random.uniform(kb2, (C,), minval=-1.0, maxval=1.0)
          * (1.0 / np.sqrt(H))).astype(jnp.float32)

    x = jax.random.normal(kx, (B, T, C), dtype=jnp.float32)

    y = feedforward(x, w1, b1, w2, b2)
    y = jax.block_until_ready(y)
    assert y.shape == (B, T, C)
    assert y.dtype == jnp.float32

    ref = np.asarray(feedforward_ref(x, w1, b1, w2, b2))
    np.testing.assert_allclose(np.asarray(y), ref, atol=1e-2, rtol=1e-2)

    print("KERNEL_OK")
</pallas_src>

<mosaic_0001>
module attributes {stable_mosaic.version = 11 : i64} {
  func.func @feedforward_kernel(%arg0: i32, %arg1: memref<128x384xbf16, #tpu.memory_space<vmem>>, %arg2: memref<384x1536xbf16, #tpu.memory_space<vmem>>, %arg3: memref<1x1536xf32, #tpu.memory_space<vmem>>, %arg4: memref<1536x384xbf16, #tpu.memory_space<vmem>>, %arg5: memref<1x384xf32, #tpu.memory_space<vmem>>, %arg6: memref<128x384xf32, #tpu.memory_space<vmem>>) attributes {dimension_semantics = [#tpu.dimension_semantics<parallel>], iteration_bounds = array<i64: 1>, scalar_prefetch = 0 : i64, scratch_operands = 0 : i64, tpu.core_type = #tpu.core_type<tc>, window_params = [{transform_indices = @transform_0, window_bounds = array<i64: 128, 384>}, {pipeline_mode = #tpu.pipeline_mode<synchronous>, transform_indices = @transform_1, window_bounds = array<i64: 384, 1536>}, {pipeline_mode = #tpu.pipeline_mode<synchronous>, transform_indices = @transform_2, window_bounds = array<i64: 1, 1536>}, {pipeline_mode = #tpu.pipeline_mode<synchronous>, transform_indices = @transform_3, window_bounds = array<i64: 1536, 384>}, {pipeline_mode = #tpu.pipeline_mode<synchronous>, transform_indices = @transform_4, window_bounds = array<i64: 1, 384>}, {transform_indices = @transform_5, window_bounds = array<i64: 128, 384>}]} {
    %c0 = arith.constant 0 : index
    %c0_0 = arith.constant 0 : index
    %0 = vector.load %arg1[%c0, %c0_0] : memref<128x384xbf16, #tpu.memory_space<vmem>>, vector<128x384xbf16>
    %c0_1 = arith.constant 0 : index
    %c0_2 = arith.constant 0 : index
    %1 = vector.load %arg2[%c0_1, %c0_2] : memref<384x1536xbf16, #tpu.memory_space<vmem>>, vector<384x1536xbf16>
    %cst = arith.constant dense<0.000000e+00> : vector<128x1536xf32>
    %2 = tpu.matmul %0, %1, %cst {dimension_numbers = #tpu.dot_dimension_numbers<[1], [0], [0], [1], [0, 0, 1, 1], [], []>} : vector<128x384xbf16>, vector<384x1536xbf16>, vector<128x1536xf32> -> vector<128x1536xf32>
    %c0_3 = arith.constant 0 : index
    %c0_4 = arith.constant 0 : index
    %3 = vector.load %arg3[%c0_3, %c0_4] : memref<1x1536xf32, #tpu.memory_space<vmem>>, vector<1x1536xf32>
    %4 = vector.broadcast %3 : vector<1x1536xf32> to vector<128x1536xf32>
    %5 = arith.addf %2, %4 : vector<128x1536xf32>
    %cst_5 = arith.constant 0.000000e+00 : f32
    %6 = vector.broadcast %cst_5 : f32 to vector<128x1536xf32>
    %7 = arith.maximumf %5, %6 : vector<128x1536xf32>
    %8 = arith.truncf %7 : vector<128x1536xf32> to vector<128x1536xbf16>
    %c0_6 = arith.constant 0 : index
    %c0_7 = arith.constant 0 : index
    %9 = vector.load %arg4[%c0_6, %c0_7] : memref<1536x384xbf16, #tpu.memory_space<vmem>>, vector<1536x384xbf16>
    %cst_8 = arith.constant dense<0.000000e+00> : vector<128x384xf32>
    %10 = tpu.matmul %8, %9, %cst_8 {dimension_numbers = #tpu.dot_dimension_numbers<[1], [0], [0], [1], [0, 0, 1, 1], [], []>} : vector<128x1536xbf16>, vector<1536x384xbf16>, vector<128x384xf32> -> vector<128x384xf32>
    %c0_9 = arith.constant 0 : index
    %c0_10 = arith.constant 0 : index
    %11 = vector.load %arg5[%c0_9, %c0_10] : memref<1x384xf32, #tpu.memory_space<vmem>>, vector<1x384xf32>
    %12 = vector.broadcast %11 : vector<1x384xf32> to vector<128x384xf32>
    %13 = arith.addf %10, %12 : vector<128x384xf32>
    %c0_11 = arith.constant 0 : index
    %c0_12 = arith.constant 0 : index
    %14 = vector.load %arg6[%c0_11, %c0_12] : memref<128x384xf32, #tpu.memory_space<vmem>>, vector<128x384xf32>
    tpu.vector_store %arg6[%c0_11, %c0_12], %13 {strides = array<i32>} : memref<128x384xf32, #tpu.memory_space<vmem>>, vector<128x384xf32>,
    return
  }
  func.func @transform_0(%arg0: i32) -> (i32, i32) {
    %c0_i32 = arith.constant 0 : i32
    %c0_i32_0 = arith.constant 0 : i32
    return %arg0, %c0_i32 : i32, i32
  }
  func.func @transform_1(%arg0: i32) -> (i32, i32) {
    %c0_i32 = arith.constant 0 : i32
    %c0_i32_0 = arith.constant 0 : i32
    %c0_i32_1 = arith.constant 0 : i32
    return %c0_i32, %c0_i32_0 : i32, i32
  }
  func.func @transform_2(%arg0: i32) -> (i32, i32) {
    %c0_i32 = arith.constant 0 : i32
    %c0_i32_0 = arith.constant 0 : i32
    %c0_i32_1 = arith.constant 0 : i32
    return %c0_i32, %c0_i32_0 : i32, i32
  }
  func.func @transform_3(%arg0: i32) -> (i32, i32) {
    %c0_i32 = arith.constant 0 : i32
    %c0_i32_0 = arith.constant 0 : i32
    %c0_i32_1 = arith.constant 0 : i32
    return %c0_i32, %c0_i32_0 : i32, i32
  }
  func.func @transform_4(%arg0: i32) -> (i32, i32) {
    %c0_i32 = arith.constant 0 : i32
    %c0_i32_0 = arith.constant 0 : i32
    %c0_i32_1 = arith.constant 0 : i32
    return %c0_i32, %c0_i32_0 : i32, i32
  }
  func.func @transform_5(%arg0: i32) -> (i32, i32) {
    %c0_i32 = arith.constant 0 : i32
    %c0_i32_0 = arith.constant 0 : i32
    return %arg0, %c0_i32 : i32, i32
  }
}

</mosaic_0001>

<bundles_post_ra>
// kernel: tpu_custom_call.1
= control target key start
LH: loop header
LB: loop body
LE: loop exit
PB: predicated region body
PF: predicated region fallthrough
CT: control target
= control target key end

     0   :  { %10 = vsyncpa [#allocation3], 0  ;;  %s10677_s0 = inlined_call_operand.hbm [shape: bf16[16,384], index: 0, kind: input, shape index: {}]   ;;  %s10678_s1 = inlined_call_operand.hbm [shape: bf16[384,1536], index: 1, kind: input, shape index: {}]   ;;  %s10679_s2 = inlined_call_operand.hbm [shape: f32[1,1536], index: 2, kind: input, shape index: {}]   ;;  %s10680_s3 = inlined_call_operand.hbm [shape: bf16[1536,384], index: 3, kind: input, shape index: {}]   ;;  %s10681_s4 = inlined_call_operand.hbm [shape: f32[1,384], index: 4, kind: input, shape index: {}]   ;;  %s10682_s5 = inlined_call_operand.hbm [shape: f32[16,384], index: 5, kind: output, shape index: {}]  }
   0x1   :  { %11 = vsyncpa [#allocation6], 0 }
   0x2   :  { %12 = vsyncpa [#allocation9], 0 }
   0x3   :  { %13 = vsyncpa [#allocation4], 0 }
   0x4   :  { %18 = vsyncadd [#allocation3], 2688  ;;  %s9551_s18 = smov [#allocation5]   ;;  %s9411_s22 = scalar_lea.hbm %s10678_s1, 36864 }
   0x5   :  { %s31_s19 = sshll.u32 %s9551_s18, 4  ;;  %p9412_p0 = scmp.ne.s32.totalorder %s10678_s1, %s9411_s22  ;;  %s32_s19 = int_to_ptr.vmem [resolvable:$true] %s31_s19 }
   0x6   :  { %p9415_p1 = scmp.lt.u32.totalorder %s9411_s22, %s10678_s1 }
   0x8   :  { %p9417_p2 = pnand %p9415_p1, %p9412_p0 }
   0xa   :  { %9420 = shalt.err (!%p9417_p2)
}
   0xb   :  { %s9421_s27 = scalar_lea.vmem %s32_s19, 36864  ;;  %p9426_p4 = scmp.lt.s32.totalorder %s32_s19, %s32_s19 }
   0xc   :  { %p9422_p3 = scmp.ne.s32.totalorder %s32_s19, %s9421_s27  ;;  %p9427_p5 = scmp.lt.s32.totalorder %s9421_s27, %s9421_s27 }
   0xe   :  { %p9428_p6 = por %p9427_p5, %p9426_p4 }
  0x10   :  { %p9429_p7 = pnand %p9428_p6, %p9422_p3 }
  0x12   :  { %9432 = shalt.err (!%p9429_p7)
}
  0x13   :  { %s9552_s28 = smov 768   ;;  %s9553_s29 = smov 48  }
  0x14   :  { %37 = dma.hbm_to_vmem [thread:$0]  %s10678_s1, 36864, %s32_s19, [#allocation6], %s9552_s28, %s9552_s28, %s9553_s29  }
  0x15   :  { %s9554_s7 = smov [#allocation8]   ;;  %s9555_s9 = smov [#allocation2]  }
  0x16   :  { %s53_s8 = sshll.u32 %s9554_s7, 4  ;;  %s19_s10 = sshll.u32 %s9555_s9, 4  ;;  %s54_s8 = int_to_ptr.vmem [resolvable:$true] %s53_s8  ;;  %s20_s10 = int_to_ptr.vmem [resolvable:$true] %s19_s10 }
  0x17   :  { %s9433_s13 = scalar_lea.hbm %s10680_s3, 36864 }
  0x18   :  { %p9434_p8 = scmp.ne.s32.totalorder %s10680_s3, %s9433_s13  ;;  %p9437_p9 = scmp.lt.u32.totalorder %s9433_s13, %s10680_s3 }
  0x1a   :  { %p9439_p10 = pnand %p9437_p9, %p9434_p8 }
  0x1c   :  { %9442 = shalt.err (!%p9439_p10)
}
  0x1d   :  { %s9443_s1 = scalar_lea.vmem %s54_s8, 36864  ;;  %p9448_p12 = scmp.lt.s32.totalorder %s54_s8, %s54_s8 }
  0x1e   :  { %p9444_p11 = scmp.ne.s32.totalorder %s54_s8, %s9443_s1  ;;  %p9449_p13 = scmp.lt.s32.totalorder %s9443_s1, %s9443_s1 }
  0x20   :  { %p9450_p0 = por %p9449_p13, %p9448_p12 }
  0x22   :  { %p9451_p1 = pnand %p9450_p0, %p9444_p11 }
  0x24   :  { %9454 = shalt.err (!%p9451_p1)
}
  0x25   :  { %s9556_s18 = smov 192   ;;  %s9557_s19 = smov 12  }
  0x26   :  { %59 = dma.hbm_to_vmem [thread:$0]  %s10680_s3, 36864, %s54_s8, [#allocation9], %s9556_s18, %s9556_s18, %s9557_s19  }
  0x27   :  { %s9455_s24 = scalar_lea.hbm %s10677_s0, 384 }
  0x28   :  { %p9456_p2 = scmp.ne.s32.totalorder %s10677_s0, %s9455_s24  ;;  %p9459_p3 = scmp.lt.u32.totalorder %s9455_s24, %s10677_s0 }
  0x2a   :  { %p9461_p4 = pnand %p9459_p3, %p9456_p2 }
  0x2c   :  { %9464 = shalt.err (!%p9461_p4)
}
  0x2d   :  { %s9465_s29 = scalar_lea.vmem %s20_s10, 384  ;;  %s9469_s30 = scalar_lea.vmem %s20_s10, 3072 }
  0x2e   :  { %p9466_p5 = scmp.ne.s32.totalorder %s20_s10, %s9465_s29  ;;  %p9470_p6 = scmp.lt.s32.totalorder %s20_s10, %s20_s10 }
  0x2f   :  { %p9471_p7 = scmp.lt.s32.totalorder %s9469_s30, %s9465_s29 }
  0x31   :  { %p9472_p8 = por %p9471_p7, %p9470_p6 }
  0x33   :  { %p9473_p9 = pnand %p9472_p8, %p9466_p5 }
  0x35   :  { %9476 = shalt.err (!%p9473_p9)
}
  0x36   :  { %25 = dma.hbm_to_vmem [thread:$0]  %s10677_s0, 384, %s20_s10, [#allocation3], %s9556_s18, %s9556_s18, %s9557_s19  }
  0x37   :  { %s9558_s7 = smov [#allocation7]   ;;  %s9559_s9 = smov [#allocation10]  }
  0x38   :  { %s44_s8 = sshll.u32 %s9558_s7, 4  ;;  %s66_s11 = sshll.u32 %s9559_s9, 4  ;;  %s45_s8 = int_to_ptr.vmem [resolvable:$true] %s44_s8  ;;  %s67_s11 = int_to_ptr.vmem [resolvable:$true] %s66_s11 }
  0x39   :  { %s9477_s14 = scalar_lea.hbm %s10679_s2, 192 }
  0x3a   :  { %p9478_p10 = scmp.ne.s32.totalorder %s10679_s2, %s9477_s14  ;;  %p9481_p11 = scmp.lt.u32.totalorder %s9477_s14, %s10679_s2 }
  0x3c   :  { %p9483_p12 = pnand %p9481_p11, %p9478_p10 }
  0x3e   :  { %9486 = shalt.err (!%p9483_p12)
}
  0x3f   :  { %s9487_s0 = scalar_lea.vmem %s45_s8, 192  ;;  %p9492_p0 = scmp.lt.s32.totalorder %s45_s8, %s45_s8 }
  0x40   :  { %p9488_p13 = scmp.ne.s32.totalorder %s45_s8, %s9487_s0  ;;  %p9493_p1 = scmp.lt.s32.totalorder %s9487_s0, %s9487_s0 }
  0x42   :  { %p9494_p2 = por %p9493_p1, %p9492_p0 }
  0x44   :  { %p9495_p3 = pnand %p9494_p2, %p9488_p13 }
  0x46   :  { %9498 = shalt.err (!%p9495_p3)
}
  0x47   :  { %47 = dma.hbm_to_vmem [thread:$0]  %s10679_s2, 192, %s45_s8, [#allocation6]  }
  0x48   :  { %s9499_s21 = scalar_lea.hbm %s10681_s4, 48 }
  0x49   :  { %p9500_p4 = scmp.ne.s32.totalorder %s10681_s4, %s9499_s21  ;;  %p9503_p5 = scmp.lt.u32.totalorder %s9499_s21, %s10681_s4 }
  0x4b   :  { %p9505_p6 = pnand %p9503_p5, %p9500_p4 }
  0x4d   :  { %9508 = shalt.err (!%p9505_p6)
}
  0x4e   :  { %s9509_s26 = scalar_lea.vmem %s67_s11, 48  ;;  %s9513_s27 = scalar_lea.vmem %s67_s11, 64 }
  0x4f   :  { %p9510_p7 = scmp.ne.s32.totalorder %s67_s11, %s9509_s26  ;;  %p9514_p8 = scmp.lt.s32.totalorder %s67_s11, %s67_s11 }
  0x50   :  { %p9515_p9 = scmp.lt.s32.totalorder %s9513_s27, %s9509_s26 }
  0x52   :  { %p9516_p10 = por %p9515_p9, %p9514_p8 }
  0x54   :  { %p9517_p11 = pnand %p9516_p10, %p9510_p7 }
  0x56   :  { %9520 = shalt.err (!%p9517_p11)
}
  0x57   :  { %69 = dma.hbm_to_vmem [thread:$0]  %s10681_s4, 48, %s67_s11, [#allocation9]  }
  0x58   :  { %9543 = dma.done.wait [#allocation3], 3072  }
  0x59   :  { %9544 = vsyncadd [#allocation3], 4294964224 }
  0x5a   :  { %9545 = dma.done.wait [#allocation6], 37056  }
  0x5b   :  { %9546 = vsyncadd [#allocation6], 4294930240 }
  0x5c   :  { %9547 = dma.done.wait [#allocation9], 36912  }
  0x5d   :  { %9548 = vsyncadd [#allocation9], 4294930384  ;;  %v8519_v0 = vld [vmem:[#allocation5 + $0x4] ss:$48 sps:$4 sm:$0xff]   ;;  %v8521_v1 = vld [vmem:[#allocation5 + $0xc] ss:$48 sps:$4 sm:$0xff]  }
  0x5e   :  { %2038 = vmatprep.subr.bf16.mxu0 %v8519_v0  ;;  %v8523_v2 = vld [vmem:[#allocation5] ss:$48 sps:$4 sm:$0xff]   ;;  %v8524_v3 = vld [vmem:[#allocation5 + $0x8] ss:$48 sps:$4 sm:$0xff]   ;;  %2264 = vmatprep.subr.bf16.mxu1 %v8521_v1  ;;  %v8525_v4 = vld [vmem:[#allocation5 + $0x64] ss:$48 sps:$4 sm:$0xff]  }
  0x5f   :  { %2039 = vmatpush1.bf16.msra.mxu0 %v8523_v2  ;;  %2265 = vmatpush1.bf16.msra.mxu1 %v8524_v3  ;;  %v8527_v5 = vld [vmem:[#allocation5 + $0x6c] ss:$48 sps:$4 sm:$0xff]   ;;  %v8529_v6 = vld [vmem:[#allocation5 + $0x60] ss:$48 sps:$4 sm:$0xff]   ;;  %v8530_v7 = vld [vmem:[#allocation5 + $0x68] ss:$48 sps:$4 sm:$0xff]  }
  0x60   :  { %2040 = vmatprep.subr.bf16.mxu0 %v8525_v4  ;;  %2266 = vmatprep.subr.bf16.mxu1 %v8527_v5  ;;  %v8531_v8 = vld [vmem:[#allocation5 + $0xc4] ss:$48 sps:$4 sm:$0xff]   ;;  %v8533_v9 = vld [vmem:[#allocation5 + $0xcc] ss:$48 sps:$4 sm:$0xff]   ;;  %v8535_v10 = vld [vmem:[#allocation5 + $0xc0] ss:$48 sps:$4 sm:$0xff]  }
  0x61   :  { %v8536_v11 = vld [vmem:[#allocation5 + $0xc8] ss:$48 sps:$4 sm:$0xff]   ;;  %v8537_v12 = vld [vmem:[#allocation5 + $0x124] ss:$48 sps:$4 sm:$0xff]   ;;  %v8539_v13 = vld [vmem:[#allocation5 + $0x12c] ss:$48 sps:$4 sm:$0xff]  }
  0x62   :  { %v8541_v14 = vld [vmem:[#allocation5 + $0x120] ss:$48 sps:$4 sm:$0xff]   ;;  %v8542_v15 = vld [vmem:[#allocation5 + $0x128] ss:$48 sps:$4 sm:$0xff]   ;;  %v8543_v16 = vld [vmem:[#allocation5 + $0x184] ss:$48 sps:$4 sm:$0xff]  }
  0x63   :  { %2041 = vmatpush1.bf16.msra.mxu0 %v8529_v6  ;;  %2267 = vmatpush1.bf16.msra.mxu1 %v8530_v7  ;;  %v8545_v17 = vld [vmem:[#allocation5 + $0x18c] ss:$48 sps:$4 sm:$0xff]   ;;  %v8547_v18 = vld [vmem:[#allocation5 + $0x180] ss:$48 sps:$4 sm:$0xff]   ;;  %v8548_v19 = vld [vmem:[#allocation5 + $0x188] ss:$48 sps:$4 sm:$0xff]  }
  0x64   :  { %2042 = vmatprep.subr.bf16.mxu0 %v8531_v8  ;;  %2268 = vmatprep.subr.bf16.mxu1 %v8533_v9  ;;  %v8549_v20 = vld [vmem:[#allocation5 + $0x1e4] ss:$48 sps:$4 sm:$0xff]   ;;  %v8551_v21 = vld [vmem:[#allocation5 + $0x1ec] ss:$48 sps:$4 sm:$0xff]   ;;  %v8553_v22 = vld [vmem:[#allocation5 + $0x1e0] ss:$48 sps:$4 sm:$0xff]  }
  0x65   :  { %v8554_v23 = vld [vmem:[#allocation5 + $0x1e8] ss:$48 sps:$4 sm:$0xff]   ;;  %v8555_v24 = vld [vmem:[#allocation5 + $0x244] ss:$48 sps:$4 sm:$0xff]   ;;  %v8557_v25 = vld [vmem:[#allocation5 + $0x24c] ss:$48 sps:$4 sm:$0xff]  }
  0x66   :  { %v8559_v26 = vld [vmem:[#allocation5 + $0x240] ss:$48 sps:$4 sm:$0xff]   ;;  %v8560_v27 = vld [vmem:[#allocation5 + $0x248] ss:$48 sps:$4 sm:$0xff]   ;;  %v8561_v28 = vld [vmem:[#allocation5 + $0x2a4] ss:$48 sps:$4 sm:$0xff]  }
  0x67   :  { %2043 = vmatpush1.bf16.msra.mxu0 %v8535_v10  ;;  %2269 = vmatpush1.bf16.msra.mxu1 %v8536_v11  ;;  %v8563_v29 = vld [vmem:[#allocation5 + $0x2ac] ss:$48 sps:$4 sm:$0xff]   ;;  %v8565_v30 = vld [vmem:[#allocation5 + $0x2a0] ss:$48 sps:$4 sm:$0xff]   ;;  %v8566_v31 = vld [vmem:[#allocation5 + $0x2a8] ss:$48 sps:$4 sm:$0xff]  }
  0x68   :  { %2044 = vmatprep.subr.bf16.mxu0 %v8537_v12  ;;  %2270 = vmatprep.subr.bf16.mxu1 %v8539_v13  ;;  %v8567_v32 = vld [vmem:[#allocation5 + $0x304] ss:$48 sps:$4 sm:$0xff]   ;;  %v8569_v33 = vld [vmem:[#allocation5 + $0x30c] ss:$48 sps:$4 sm:$0xff]   ;;  %v8571_v34 = vld [vmem:[#allocation5 + $0x300] ss:$48 sps:$4 sm:$0xff]  }
  0x69   :  { %v8572_v35 = vld [vmem:[#allocation5 + $0x308] ss:$48 sps:$4 sm:$0xff]   ;;  %v8573_v36 = vld [vmem:[#allocation5 + $0x364] ss:$48 sps:$4 sm:$0xff]   ;;  %v8575_v37 = vld [vmem:[#allocation5 + $0x36c] ss:$48 sps:$4 sm:$0xff]  }
  0x6a   :  { %v8577_v38 = vld [vmem:[#allocation5 + $0x360] ss:$48 sps:$4 sm:$0xff]   ;;  %v8578_v39 = vld [vmem:[#allocation5 + $0x368] ss:$48 sps:$4 sm:$0xff]   ;;  %v8579_v40 = vld [vmem:[#allocation5 + $0x3c4] ss:$48 sps:$4 sm:$0xff]  }
  0x6b   :  { %2045 = vmatpush1.bf16.msra.mxu0 %v8541_v14  ;;  %2271 = vmatpush1.bf16.msra.mxu1 %v8542_v15  ;;  %v8581_v41 = vld [vmem:[#allocation5 + $0x3cc] ss:$48 sps:$4 sm:$0xff]   ;;  %v8583_v42 = vld [vmem:[#allocation5 + $0x3c0] ss:$48 sps:$4 sm:$0xff]   ;;  %v8584_v43 = vld [vmem:[#allocation5 + $0x3c8] ss:$48 sps:$4 sm:$0xff]  }
  0x6c   :  { %2046 = vmatprep.subr.bf16.mxu0 %v8543_v16  ;;  %2272 = vmatprep.subr.bf16.mxu1 %v8545_v17  ;;  %v8585_v44 = vld [vmem:[#allocation5 + $0x424] ss:$48 sps:$4 sm:$0xff]   ;;  %v8587_v45 = vld [vmem:[#allocation5 + $0x42c] ss:$48 sps:$4 sm:$0xff]   ;;  %v8589_v46 = vld [vmem:[#allocation5 + $0x420] ss:$48 sps:$4 sm:$0xff]  }
  0x6d   :  { %v8590_v47 = vld [vmem:[#allocation5 + $0x428] ss:$48 sps:$4 sm:$0xff]   ;;  %v8615_v48 = vld [vmem:[#allocation2 + $0x4] ss:$12 sps:$4 sm:$0xff]   ;;  %v8593_v50 = vld [vmem:[#allocation5 + $0x48c] ss:$48 sps:$4 sm:$0xff]  }
  0x6e   :  { %v8591_v49 = vld [vmem:[#allocation5 + $0x484] ss:$48 sps:$4 sm:$0xff]   ;;  %2070 = vmatprep.mubr.bf16.mxu0 %v8615_v48  ;;  %2296 = vmatprep.mubr.bf16.mxu1 %v8615_v48  ;;  %v8595_v51 = vld [vmem:[#allocation5 + $0x480] ss:$48 sps:$4 sm:$0xff]   ;;  %v8596_v52 = vld [vmem:[#allocation5 + $0x488] ss:$48 sps:$4 sm:$0xff]  }
  0x6f   :  { %2047 = vmatpush1.bf16.msra.mxu0 %v8547_v18  ;;  %2273 = vmatpush1.bf16.msra.mxu1 %v8548_v19  ;;  %v8597_v53 = vld [vmem:[#allocation5 + $0x4e4] ss:$48 sps:$4 sm:$0xff]   ;;  %v8599_v54 = vld [vmem:[#allocation5 + $0x4ec] ss:$48 sps:$4 sm:$0xff]   ;;  %v8601_v55 = vld [vmem:[#allocation5 + $0x4e0] ss:$48 sps:$4 sm:$0xff]  }
  0x70   :  { %2048 = vmatprep.subr.bf16.mxu0 %v8549_v20  ;;  %2274 = vmatprep.subr.bf16.mxu1 %v8551_v21  ;;  %v8602_v56 = vld [vmem:[#allocation5 + $0x4e8] ss:$48 sps:$4 sm:$0xff]   ;;  %v8603_v57 = vld [vmem:[#allocation5 + $0x544] ss:$48 sps:$4 sm:$0xff]   ;;  %v8605_v58 = vld [vmem:[#allocation5 + $0x54c] ss:$48 sps:$4 sm:$0xff]  }
  0x71   :  { %v8607_v59 = vld [vmem:[#allocation5 + $0x540] ss:$48 sps:$4 sm:$0xff]   ;;  %v8608_v60 = vld [vmem:[#allocation5 + $0x548] ss:$48 sps:$4 sm:$0xff]   ;;  %v8609_v61 = vld [vmem:[#allocation5 + $0x5a4] ss:$48 sps:$4 sm:$0xff]  }
  0x72   :  { %v8611_v62 = vld [vmem:[#allocation5 + $0x5ac] ss:$48 sps:$4 sm:$0xff]   ;;  %v8613_v63 = vld [vmem:[#allocation5 + $0x5a0] ss:$48 sps:$4 sm:$0xff]   ;;  %v8614_v0 = vld [vmem:[#allocation5 + $0x5a8] ss:$48 sps:$4 sm:$0xff]  }
  0x73   :  { %2049 = vmatpush1.bf16.msra.mxu0 %v8553_v22  ;;  %2275 = vmatpush1.bf16.msra.mxu1 %v8554_v23  ;;  %v8620_v1 = vld [vmem:[#allocation5 + $0x60c] ss:$48 sps:$4 sm:$0xff]   ;;  %v8623_v2 = vld [vmem:[#allocation5 + $0x604] ss:$48 sps:$4 sm:$0xff]   ;;  %v8618_v4 = vld [vmem:[#allocation5 + $0x608] ss:$48 sps:$4 sm:$0xff]  }
  0x74   :  { %2050 = vmatprep.subr.bf16.mxu0 %v8555_v24  ;;  %2276 = vmatprep.subr.bf16.mxu1 %v8557_v25  ;;  %v9654_v3 = vld [vmem:[#allocation2] ss:$12 sps:$4 sm:$0xff]   ;;  %v9656_v6 = vld [vmem:[#allocation2 + $0x1c] ss:$12 sps:$4 sm:$0xff]   ;;  %v8632_v8 = vld [vmem:[#allocation5 + $0x664] ss:$48 sps:$4 sm:$0xff]  }
  0x75   :  { %v8621_v5 = vld [vmem:[#allocation5 + $0x600] ss:$48 sps:$4 sm:$0xff]   ;;  %v8629_v7 = vld [vmem:[#allocation5 + $0x66c] ss:$48 sps:$4 sm:$0xff]   ;;  %v8627_v9 = vld [vmem:[#allocation5 + $0x668] ss:$48 sps:$4 sm:$0xff]  }
  0x76   :  { %v8630_v10 = vld [vmem:[#allocation5 + $0x660] ss:$48 sps:$4 sm:$0xff]   ;;  %v8638_v11 = vld [vmem:[#allocation5 + $0x6cc] ss:$48 sps:$4 sm:$0xff]   ;;  %v8641_v12 = vld [vmem:[#allocation5 + $0x6c4] ss:$48 sps:$4 sm:$0xff]  }
  0x77   :  { %2051 = vmatpush1.bf16.msra.mxu0 %v8559_v26  ;;  %2277 = vmatpush1.bf16.msra.mxu1 %v8560_v27  ;;  %v9662_v13 = vld [vmem:[#allocation2 + $0x18] ss:$12 sps:$4 sm:$0xff]   ;;  %v9664_v14 = vld [vmem:[#allocation2 + $0x34] ss:$12 sps:$4 sm:$0xff]   ;;  %v8647_v17 = vld [vmem:[#allocation5 + $0x72c] ss:$48 sps:$4 sm:$0xff]  }
  0x78   :  { %2052 = vmatprep.subr.bf16.mxu0 %v8561_v28  ;;  %2278 = vmatprep.subr.bf16.mxu1 %v8563_v29  ;;  %v8636_v15 = vld [vmem:[#allocation5 + $0x6c8] ss:$48 sps:$4 sm:$0xff]   ;;  %v8639_v16 = vld [vmem:[#allocation5 + $0x6c0] ss:$48 sps:$4 sm:$0xff]   ;;  %v8650_v18 = vld [vmem:[#allocation5 + $0x724] ss:$48 sps:$4 sm:$0xff]  }
  0x79   :  { %v8645_v19 = vld [vmem:[#allocation5 + $0x728] ss:$48 sps:$4 sm:$0xff]   ;;  %v8648_v20 = vld [vmem:[#allocation5 + $0x720] ss:$48 sps:$4 sm:$0xff]   ;;  %v8656_v21 = vld [vmem:[#allocation5 + $0x78c] ss:$48 sps:$4 sm:$0xff]  }
  0x7a   :  { %v8659_v22 = vld [vmem:[#allocation5 + $0x784] ss:$48 sps:$4 sm:$0xff]   ;;  %v9670_v23 = vld [vmem:[#allocation2 + $0x30] ss:$12 sps:$4 sm:$0xff]   ;;  %v9672_v24 = vld [vmem:[#allocation2 + $0x4c] ss:$12 sps:$4 sm:$0xff]  }
  0x7b   :  { %2053 = vmatpush1.bf16.msra.mxu0 %v8565_v30  ;;  %2279 = vmatpush1.bf16.msra.mxu1 %v8566_v31  ;;  %v8654_v25 = vld [vmem:[#allocation5 + $0x788] ss:$48 sps:$4 sm:$0xff]   ;;  %v8657_v26 = vld [vmem:[#allocation5 + $0x780] ss:$48 sps:$4 sm:$0xff]   ;;  %v8665_v27 = vld [vmem:[#allocation5 + $0x7ec] ss:$48 sps:$4 sm:$0xff]  }
  0x7c   :  { %2054 = vmatprep.subr.bf16.mxu0 %v8567_v32  ;;  %2280 = vmatprep.subr.bf16.mxu1 %v8569_v33  ;;  %v8668_v28 = vld [vmem:[#allocation5 + $0x7e4] ss:$48 sps:$4 sm:$0xff]   ;;  %v8663_v29 = vld [vmem:[#allocation5 + $0x7e8] ss:$48 sps:$4 sm:$0xff]   ;;  %v8666_v30 = vld [vmem:[#allocation5 + $0x7e0] ss:$48 sps:$4 sm:$0xff]  }
  0x7d   :  { %v8674_v31 = vld [vmem:[#allocation5 + $0x84c] ss:$48 sps:$4 sm:$0xff]   ;;  %v8677_v32 = vld [vmem:[#allocation5 + $0x844] ss:$48 sps:$4 sm:$0xff]  }
  0x7e   :  { %v8644_v33 = vld [vmem:[#allocation2 + $0x48] ss:$12 sps:$4 sm:$0xff]   ;;  %v8678_v48 = vld [vmem:[#allocation2 + $0xac] ss:$12 sps:$4 sm:$0xff]  }
  0x7f   :  { %2055 = vmatpush1.bf16.msra.mxu0 %v8571_v34  ;;  %2281 = vmatpush1.bf16.msra.mxu1 %v8572_v35  ;;  %v8651_v34 = vld [vmem:[#allocation2 + $0x64] ss:$12 sps:$4 sm:$0xff]   ;;  %v8672_v35 = vld [vmem:[#allocation5 + $0x848] ss:$48 sps:$4 sm:$0xff]  }
  0x80   :  { %2056 = vmatprep.subr.bf16.mxu0 %v8573_v36  ;;  %2282 = vmatprep.subr.bf16.mxu1 %v8575_v37  ;;  %v8675_v36 = vld [vmem:[#allocation5 + $0x840] ss:$48 sps:$4 sm:$0xff]   ;;  %v8683_v37 = vld [vmem:[#allocation5 + $0x8ac] ss:$48 sps:$4 sm:$0xff]  }
  0x83   :  { %2057 = vmatpush1.bf16.msra.mxu0 %v8577_v38  ;;  %2283 = vmatpush1.bf16.msra.mxu1 %v8578_v39  ;;  %v8686_v38 = vld [vmem:[#allocation5 + $0x8a4] ss:$48 sps:$4 sm:$0xff]   ;;  %v8681_v39 = vld [vmem:[#allocation5 + $0x8a8] ss:$48 sps:$4 sm:$0xff]  }
  0x84   :  { %2058 = vmatprep.subr.bf16.mxu0 %v8579_v40  ;;  %2284 = vmatprep.subr.bf16.mxu1 %v8581_v41  ;;  %v8684_v40 = vld [vmem:[#allocation5 + $0x8a0] ss:$48 sps:$4 sm:$0xff]   ;;  %v8690_v41 = vld [vmem:[#allocation5 + $0x14] ss:$48 sps:$4 sm:$0xff]  }
  0x87   :  { %2059 = vmatpush1.bf16.msra.mxu0 %v8583_v42  ;;  %2285 = vmatpush1.bf16.msra.mxu1 %v8584_v43  ;;  %v8693_v42 = vld [vmem:[#allocation5 + $0x1c] ss:$48 sps:$4 sm:$0xff]  }
  0x88   :  { %2060 = vmatprep.subr.bf16.mxu0 %v8585_v44  ;;  %2286 = vmatprep.subr.bf16.mxu1 %v8587_v45  ;;  %v8653_v43 = vld [vmem:[#allocation2 + $0x60] ss:$12 sps:$4 sm:$0xff]   ;;  %v8660_v44 = vld [vmem:[#allocation2 + $0x7c] ss:$12 sps:$4 sm:$0xff]   ;;  %v8662_v45 = vld [vmem:[#allocation2 + $0x78] ss:$12 sps:$4 sm:$0xff]  }
  0x8b   :  { %2061 = vmatpush1.bf16.msra.mxu0 %v8589_v46  ;;  %2287 = vmatpush1.bf16.msra.mxu1 %v8590_v47  ;;  %v8669_v46 = vld [vmem:[#allocation2 + $0x94] ss:$12 sps:$4 sm:$0xff]   ;;  %v8671_v47 = vld [vmem:[#allocation2 + $0x90] ss:$12 sps:$4 sm:$0xff]  }
  0x8c   :  { %2062 = vmatprep.subr.bf16.mxu0 %v8591_v49  ;;  %2288 = vmatprep.subr.bf16.mxu1 %v8593_v50  ;;  %v8680_v49 = vld [vmem:[#allocation2 + $0xa8] ss:$12 sps:$4 sm:$0xff]   ;;  %v9560_v50 = vmov 0  }
  0x8f   :  { %2063 = vmatpush1.bf16.msra.mxu0 %v8595_v51  ;;  %2289 = vmatpush1.bf16.msra.mxu1 %v8596_v52  ;;  %v8687_v51 = vld [vmem:[#allocation2 + $0x8] ss:$12 sps:$4 sm:$0xff]   ;;  %v8688_v52 = vld [vmem:[#allocation5 + $0x10] ss:$48 sps:$4 sm:$0xff]  }
  0x90   :  { %2064 = vmatprep.subr.bf16.mxu0 %v8597_v53  ;;  %2290 = vmatprep.subr.bf16.mxu1 %v8599_v54  ;;  %v8691_v53 = vld [vmem:[#allocation5 + $0x18] ss:$48 sps:$4 sm:$0xff]   ;;  %v8696_v54 = vld [vmem:[#allocation5 + $0x74] ss:$48 sps:$4 sm:$0xff]  }
  0x93   :  { %2065 = vmatpush1.bf16.msra.mxu0 %v8601_v55  ;;  %2291 = vmatpush1.bf16.msra.mxu1 %v8602_v56  ;;  %v8699_v55 = vld [vmem:[#allocation5 + $0x7c] ss:$48 sps:$4 sm:$0xff]   ;;  %v8694_v56 = vld [vmem:[#allocation5 + $0x70] ss:$48 sps:$4 sm:$0xff]  }
  0x94   :  { %2066 = vmatprep.subr.bf16.mxu0 %v8603_v57  ;;  %2292 = vmatprep.subr.bf16.mxu1 %v8605_v58  ;;  %v8697_v57 = vld [vmem:[#allocation5 + $0x78] ss:$48 sps:$4 sm:$0xff]   ;;  %v8703_v58 = vld [vmem:[#allocation5 + $0xd4] ss:$48 sps:$4 sm:$0xff]  }
  0x97   :  { %2067 = vmatpush1.bf16.msra.mxu0 %v8607_v59  ;;  %2293 = vmatpush1.bf16.msra.mxu1 %v8608_v60  ;;  %v8706_v59 = vld [vmem:[#allocation5 + $0xdc] ss:$48 sps:$4 sm:$0xff]  }
  0x98   :  { %2068 = vmatprep.subr.bf16.mxu0 %v8609_v61  ;;  %2294 = vmatprep.subr.bf16.mxu1 %v8611_v62  ;;  %v8700_v60 = vld [vmem:[#allocation2 + $0x20] ss:$12 sps:$4 sm:$0xff]   ;;  %v8704_v62 = vld [vmem:[#allocation5 + $0xd8] ss:$48 sps:$4 sm:$0xff]  }
  0x99   :  { %v8701_v61 = vld [vmem:[#allocation5 + $0xd0] ss:$48 sps:$4 sm:$0xff]  }
  0x9b   :  { %2069 = vmatpush1.bf16.msra.mxu0 %v8613_v63  ;;  %2295 = vmatpush1.bf16.msra.mxu1 %v8614_v0  ;;  %v8709_v63 = vld [vmem:[#allocation5 + $0x134] ss:$48 sps:$4 sm:$0xff]   ;;  %v8712_v0 = vld [vmem:[#allocation5 + $0x13c] ss:$48 sps:$4 sm:$0xff]  }
  0x9c   :  { %2377 = vmatprep.subr.bf16.mxu1 %v8620_v1  ;;  %2151 = vmatprep.subr.bf16.mxu0 %v8623_v2  ;;  %v8707_v1 = vld [vmem:[#allocation5 + $0x130] ss:$48 sps:$4 sm:$0xff]   ;;  %v8710_v2 = vld [vmem:[#allocation5 + $0x138] ss:$48 sps:$4 sm:$0xff]  }
  0x9e   :  { %2071 = vmatmul.mubr.bf16.vlgmr.msra.gmra.mrb[0].mxu0 %v9654_v3  ;;  %2297 = vmatmul.mubr.bf16.vlgmr.msra.gmra.mrb[0].mxu1 %v9654_v3 }
  0x9f   :  { %2378 = vmatpush1.bf16.msra.mxu1 %v8618_v4  ;;  %2152 = vmatpush1.bf16.msra.mxu0 %v8621_v5  ;;  %v8716_v4 = vld [vmem:[#allocation5 + $0x194] ss:$48 sps:$4 sm:$0xff]   ;;  %v8719_v5 = vld [vmem:[#allocation5 + $0x19c] ss:$48 sps:$4 sm:$0xff]  }
  0xa0   :  { %2080 = vmatprep.mubr.bf16.mxu0 %v9656_v6  ;;  %2306 = vmatprep.mubr.bf16.mxu1 %v9656_v6 }
  0xa1   :  { %2379 = vmatprep.subr.bf16.mxu1 %v8629_v7  ;;  %2153 = vmatprep.subr.bf16.mxu0 %v8632_v8  ;;  %v8713_v7 = vld [vmem:[#allocation2 + $0x38] ss:$12 sps:$4 sm:$0xff]   ;;  %v8714_v8 = vld [vmem:[#allocation5 + $0x190] ss:$48 sps:$4 sm:$0xff]  }
  0xa3   :  { %2380 = vmatpush1.bf16.msra.mxu1 %v8627_v9  ;;  %2154 = vmatpush1.bf16.msra.mxu0 %v8630_v10  ;;  %v8717_v9 = vld [vmem:[#allocation5 + $0x198] ss:$48 sps:$4 sm:$0xff]   ;;  %v8722_v10 = vld [vmem:[#allocation5 + $0x1f4] ss:$48 sps:$4 sm:$0xff]  }
  0xa4   :  { %2381 = vmatprep.subr.bf16.mxu1 %v8638_v11  ;;  %2155 = vmatprep.subr.bf16.mxu0 %v8641_v12  ;;  %v8725_v11 = vld [vmem:[#allocation5 + $0x1fc] ss:$48 sps:$4 sm:$0xff]   ;;  %v8720_v12 = vld [vmem:[#allocation5 + $0x1f0] ss:$48 sps:$4 sm:$0xff]  }
  0xa6   :  { %2081 = vmatmul.mubr.bf16.gmra.mrb[4].mxu0 %v9662_v13  ;;  %2307 = vmatmul.mubr.bf16.gmra.mrb[4].mxu1 %v9662_v13 }
  0xa7   :  { %2090 = vmatprep.mubr.bf16.mxu0 %v9664_v14  ;;  %2316 = vmatprep.mubr.bf16.mxu1 %v9664_v14 }
  0xa8   :  { %2382 = vmatpush1.bf16.msra.mxu1 %v8636_v15  ;;  %2156 = vmatpush1.bf16.msra.mxu0 %v8639_v16  ;;  %v8723_v15 = vld [vmem:[#allocation5 + $0x1f8] ss:$48 sps:$4 sm:$0xff]   ;;  %v8729_v16 = vld [vmem:[#allocation5 + $0x254] ss:$48 sps:$4 sm:$0xff]  }
  0xa9   :  { %2383 = vmatprep.subr.bf16.mxu1 %v8647_v17  ;;  %2157 = vmatprep.subr.bf16.mxu0 %v8650_v18  ;;  %v8732_v17 = vld [vmem:[#allocation5 + $0x25c] ss:$48 sps:$4 sm:$0xff]  }
  0xaa   :  { %v8726_v18 = vld [vmem:[#allocation2 + $0x50] ss:$12 sps:$4 sm:$0xff]  }
  0xac   :  { %2384 = vmatpush1.bf16.msra.mxu1 %v8645_v19  ;;  %2158 = vmatpush1.bf16.msra.mxu0 %v8648_v20  ;;  %v8727_v19 = vld [vmem:[#allocation5 + $0x250] ss:$48 sps:$4 sm:$0xff]   ;;  %v8730_v20 = vld [vmem:[#allocation5 + $0x258] ss:$48 sps:$4 sm:$0xff]  }
  0xad   :  { %2385 = vmatprep.subr.bf16.mxu1 %v8656_v21  ;;  %2159 = vmatprep.subr.bf16.mxu0 %v8659_v22  ;;  %v8735_v21 = vld [vmem:[#allocation5 + $0x2b4] ss:$48 sps:$4 sm:$0xff]   ;;  %v8738_v22 = vld [vmem:[#allocation5 + $0x2bc] ss:$48 sps:$4 sm:$0xff]  }
  0xae   :  { %2091 = vmatmul.mubr.bf16.gmra.mrb[8].mxu0 %v9670_v23  ;;  %2317 = vmatmul.mubr.bf16.gmra.mrb[8].mxu1 %v9670_v23 }
  0xaf   :  { %2100 = vmatprep.mubr.bf16.mxu0 %v9672_v24  ;;  %2326 = vmatprep.mubr.bf16.mxu1 %v9672_v24 }
  0xb0   :  { %2386 = vmatpush1.bf16.msra.mxu1 %v8654_v25  ;;  %2160 = vmatpush1.bf16.msra.mxu0 %v8657_v26  ;;  %v8733_v25 = vld [vmem:[#allocation5 + $0x2b0] ss:$48 sps:$4 sm:$0xff]   ;;  %v8736_v26 = vld [vmem:[#allocation5 + $0x2b8] ss:$48 sps:$4 sm:$0xff]  }
  0xb1   :  { %2387 = vmatprep.subr.bf16.mxu1 %v8665_v27  ;;  %2161 = vmatprep.subr.bf16.mxu0 %v8668_v28  ;;  %v8742_v27 = vld [vmem:[#allocation5 + $0x314] ss:$48 sps:$4 sm:$0xff]   ;;  %v8745_v28 = vld [vmem:[#allocation5 + $0x31c] ss:$48 sps:$4 sm:$0xff]  }
  0xb4   :  { %2388 = vmatpush1.bf16.msra.mxu1 %v8663_v29  ;;  %2162 = vmatpush1.bf16.msra.mxu0 %v8666_v30  ;;  %v8739_v29 = vld [vmem:[#allocation2 + $0x68] ss:$12 sps:$4 sm:$0xff]   ;;  %v8740_v30 = vld [vmem:[#allocation5 + $0x310] ss:$48 sps:$4 sm:$0xff]  }
  0xb5   :  { %2389 = vmatprep.subr.bf16.mxu1 %v8674_v31  ;;  %2163 = vmatprep.subr.bf16.mxu0 %v8677_v32  ;;  %v8743_v31 = vld [vmem:[#allocation5 + $0x318] ss:$48 sps:$4 sm:$0xff]   ;;  %v8748_v32 = vld [vmem:[#allocation5 + $0x374] ss:$48 sps:$4 sm:$0xff]  }
  0xb6   :  { %2101 = vmatmul.mubr.bf16.gmra.mrb[12].mxu0 %v8644_v33  ;;  %2327 = vmatmul.mubr.bf16.gmra.mrb[12].mxu1 %v8644_v33  ;;  %v8751_v33 = vld [vmem:[#allocation5 + $0x37c] ss:$48 sps:$4 sm:$0xff]  }
  0xb7   :  { %2110 = vmatprep.mubr.bf16.mxu0 %v8651_v34  ;;  %2336 = vmatprep.mubr.bf16.mxu1 %v8651_v34  ;;  %v8746_v34 = vld [vmem:[#allocation5 + $0x370] ss:$48 sps:$4 sm:$0xff]  }
  0xb8   :  { %2390 = vmatpush1.bf16.msra.mxu1 %v8672_v35  ;;  %2164 = vmatpush1.bf16.msra.mxu0 %v8675_v36  ;;  %v8749_v35 = vld [vmem:[#allocation5 + $0x378] ss:$48 sps:$4 sm:$0xff]   ;;  %v8755_v36 = vld [vmem:[#allocation5 + $0x3d4] ss:$48 sps:$4 sm:$0xff]  }
  0xb9   :  { %2391 = vmatprep.subr.bf16.mxu1 %v8683_v37  ;;  %2165 = vmatprep.subr.bf16.mxu0 %v8686_v38  ;;  %v8758_v37 = vld [vmem:[#allocation5 + $0x3dc] ss:$48 sps:$4 sm:$0xff]  }
  0xba   :  { %v8752_v38 = vld [vmem:[#allocation2 + $0x80] ss:$12 sps:$4 sm:$0xff]  }
  0xbc   :  { %2392 = vmatpush1.bf16.msra.mxu1 %v8681_v39  ;;  %2166 = vmatpush1.bf16.msra.mxu0 %v8684_v40  ;;  %v8753_v39 = vld [vmem:[#allocation5 + $0x3d0] ss:$48 sps:$4 sm:$0xff]   ;;  %v8756_v40 = vld [vmem:[#allocation5 + $0x3d8] ss:$48 sps:$4 sm:$0xff]  }
  0xbd   :  { %2490 = vmatprep.subr.bf16.mxu0 %v8690_v41  ;;  %2716 = vmatprep.subr.bf16.mxu1 %v8693_v42  ;;  %v8761_v41 = vld [vmem:[#allocation5 + $0x434] ss:$48 sps:$4 sm:$0xff]   ;;  %v8764_v42 = vld [vmem:[#allocation5 + $0x43c] ss:$48 sps:$4 sm:$0xff]  }
  0xbe   :  { %2111 = vmatmul.mubr.bf16.gmra.mrb[16].mxu0 %v8653_v43  ;;  %2337 = vmatmul.mubr.bf16.gmra.mrb[16].mxu1 %v8653_v43  ;;  %v8759_v43 = vld [vmem:[#allocation5 + $0x430] ss:$48 sps:$4 sm:$0xff]  }
  0xbf   :  { %2120 = vmatprep.mubr.bf16.mxu0 %v8660_v44  ;;  %2346 = vmatprep.mubr.bf16.mxu1 %v8660_v44  ;;  %v8762_v44 = vld [vmem:[#allocation5 + $0x438] ss:$48 sps:$4 sm:$0xff]  }
  0xc6   :  { %2121 = vmatmul.mubr.bf16.gmra.mrb[20].mxu0 %v8662_v45  ;;  %2347 = vmatmul.mubr.bf16.gmra.mrb[20].mxu1 %v8662_v45  ;;  %v8768_v45 = vld [vmem:[#allocation5 + $0x494] ss:$48 sps:$4 sm:$0xff]  }
  0xc7   :  { %2130 = vmatprep.mubr.bf16.mxu0 %v8669_v46  ;;  %2356 = vmatprep.mubr.bf16.mxu1 %v8669_v46  ;;  %v8771_v46 = vld [vmem:[#allocation5 + $0x49c] ss:$48 sps:$4 sm:$0xff]  }
  0xce   :  { %2131 = vmatmul.mubr.bf16.gmra.mrb[24].mxu0 %v8671_v47  ;;  %2357 = vmatmul.mubr.bf16.gmra.mrb[24].mxu1 %v8671_v47  ;;  %v8765_v47 = vld [vmem:[#allocation2 + $0x98] ss:$12 sps:$4 sm:$0xff]  }
  0xcf   :  { %2140 = vmatprep.mubr.bf16.mxu0 %v8678_v48  ;;  %2366 = vmatprep.mubr.bf16.mxu1 %v8678_v48  ;;  %v8766_v48 = vld [vmem:[#allocation5 + $0x490] ss:$48 sps:$4 sm:$0xff]  }
  0xd6   :  { %2141 = vmatmul.mubr.bf16.gmra.mrb[28].mxu0 %v8680_v49  ;;  %2367 = vmatmul.mubr.bf16.gmra.mrb[28].mxu1 %v8680_v49  ;;  %v8769_v49 = vld [vmem:[#allocation5 + $0x498] ss:$48 sps:$4 sm:$0xff]  }
  0xd7   :  { %2183 = vmatprep.mubr.bf16.mxu0 %v9560_v50  ;;  %2409 = vmatprep.mubr.bf16.mxu1 %v9560_v50 }
  0xde   :  { %2184 = vmatmul.mubr.bf16.vlgmr.msra.gmra.mrb[0].mxu0 %v8687_v51  ;;  %2410 = vmatmul.mubr.bf16.vlgmr.msra.gmra.mrb[0].mxu1 %v8687_v51  ;;  %v8774_v51 = vld [vmem:[#allocation5 + $0x4f4] ss:$48 sps:$4 sm:$0xff]  }
  0xdf   :  { %2491 = vmatpush1.bf16.msra.mxu0 %v8688_v52  ;;  %2717 = vmatpush1.bf16.msra.mxu1 %v8691_v53  ;;  %v8777_v52 = vld [vmem:[#allocation5 + $0x4fc] ss:$48 sps:$4 sm:$0xff]   ;;  %v8772_v53 = vld [vmem:[#allocation5 + $0x4f0] ss:$48 sps:$4 sm:$0xff]  }
  0xe0   :  { %2492 = vmatprep.subr.bf16.mxu0 %v8696_v54  ;;  %2718 = vmatprep.subr.bf16.mxu1 %v8699_v55  ;;  %v8775_v54 = vld [vmem:[#allocation5 + $0x4f8] ss:$48 sps:$4 sm:$0xff]   ;;  %v8781_v55 = vld [vmem:[#allocation5 + $0x554] ss:$48 sps:$4 sm:$0xff]  }
  0xe1   :  { %2193 = vmatprep.mubr.bf16.mxu0 %v9560_v50  ;;  %2419 = vmatprep.mubr.bf16.mxu1 %v9560_v50 }
  0xe3   :  { %2493 = vmatpush1.bf16.msra.mxu0 %v8694_v56  ;;  %2719 = vmatpush1.bf16.msra.mxu1 %v8697_v57  ;;  %v8784_v56 = vld [vmem:[#allocation5 + $0x55c] ss:$48 sps:$4 sm:$0xff]  }
  0xe4   :  { %2494 = vmatprep.subr.bf16.mxu0 %v8703_v58  ;;  %2720 = vmatprep.subr.bf16.mxu1 %v8706_v59  ;;  %v8778_v57 = vld [vmem:[#allocation2 + $0xb0] ss:$12 sps:$4 sm:$0xff]   ;;  %v8782_v59 = vld [vmem:[#allocation5 + $0x558] ss:$48 sps:$4 sm:$0xff]  }
  0xe5   :  { %v8779_v58 = vld [vmem:[#allocation5 + $0x550] ss:$48 sps:$4 sm:$0xff]  }
  0xe6   :  { %2194 = vmatmul.mubr.bf16.gmra.mrb[4].mxu0 %v8700_v60  ;;  %2420 = vmatmul.mubr.bf16.gmra.mrb[4].mxu1 %v8700_v60  ;;  %v8787_v60 = vld [vmem:[#allocation5 + $0x5b4] ss:$48 sps:$4 sm:$0xff]  }
  0xe7   :  { %2495 = vmatpush1.bf16.msra.mxu0 %v8701_v61  ;;  %2721 = vmatpush1.bf16.msra.mxu1 %v8704_v62  ;;  %v8790_v61 = vld [vmem:[#allocation5 + $0x5bc] ss:$48 sps:$4 sm:$0xff]   ;;  %v8785_v62 = vld [vmem:[#allocation5 + $0x5b0] ss:$48 sps:$4 sm:$0xff]  }
  0xe8   :  { %2496 = vmatprep.subr.bf16.mxu0 %v8709_v63  ;;  %2722 = vmatprep.subr.bf16.mxu1 %v8712_v0  ;;  %v8788_v63 = vld [vmem:[#allocation5 + $0x5b8] ss:$48 sps:$4 sm:$0xff]   ;;  %v8793_v0 = vld [vmem:[#allocation5 + $0x61c] ss:$48 sps:$4 sm:$0xff]  }
  0xe9   :  { %2203 = vmatprep.mubr.bf16.mxu0 %v9560_v50  ;;  %2429 = vmatprep.mubr.bf16.mxu1 %v9560_v50 }
  0xeb   :  { %2497 = vmatpush1.bf16.msra.mxu0 %v8707_v1  ;;  %2723 = vmatpush1.bf16.msra.mxu1 %v8710_v2  ;;  %v8796_v1 = vld [vmem:[#allocation5 + $0x614] ss:$48 sps:$4 sm:$0xff]  }
  0xec   :  { %2498 = vmatprep.subr.bf16.mxu0 %v8716_v4  ;;  %2724 = vmatprep.subr.bf16.mxu1 %v8719_v5  ;;  %v9367_v2 = vld [vmem:[#allocation2 + $0x4] ss:$12 sps:$4 sm:$0xff]   ;;  %v8791_v4 = vld [vmem:[#allocation5 + $0x618] ss:$48 sps:$4 sm:$0xff]  }
  0xed   :  { %v8794_v5 = vld [vmem:[#allocation5 + $0x610] ss:$48 sps:$4 sm:$0xff]  }
  0xee   :  { %2204 = vmatmul.mubr.bf16.gmra.mrb[8].mxu0 %v8713_v7  ;;  %2430 = vmatmul.mubr.bf16.gmra.mrb[8].mxu1 %v8713_v7  ;;  %v8799_v7 = vld [vmem:[#allocation5 + $0x67c] ss:$48 sps:$4 sm:$0xff]  }
  0xef   :  { %2499 = vmatpush1.bf16.msra.mxu0 %v8714_v8  ;;  %2725 = vmatpush1.bf16.msra.mxu1 %v8717_v9  ;;  %v8802_v8 = vld [vmem:[#allocation5 + $0x674] ss:$48 sps:$4 sm:$0xff]   ;;  %v8797_v9 = vld [vmem:[#allocation5 + $0x678] ss:$48 sps:$4 sm:$0xff]  }
  0xf0   :  { %2500 = vmatprep.subr.bf16.mxu0 %v8722_v10  ;;  %2726 = vmatprep.subr.bf16.mxu1 %v8725_v11  ;;  %v8800_v10 = vld [vmem:[#allocation5 + $0x670] ss:$48 sps:$4 sm:$0xff]   ;;  %v8805_v11 = vld [vmem:[#allocation5 + $0x6dc] ss:$48 sps:$4 sm:$0xff]  }
  0xf1   :  { %2213 = vmatprep.mubr.bf16.mxu0 %v9560_v50  ;;  %2439 = vmatprep.mubr.bf16.mxu1 %v9560_v50 }
  0xf3   :  { %2501 = vmatpush1.bf16.msra.mxu0 %v8720_v12  ;;  %2727 = vmatpush1.bf16.msra.mxu1 %v8723_v15  ;;  %v8808_v12 = vld [vmem:[#allocation5 + $0x6d4] ss:$48 sps:$4 sm:$0xff]   ;;  %v8803_v15 = vld [vmem:[#allocation5 + $0x6d8] ss:$48 sps:$4 sm:$0xff]  }
  0xf4   :  { %2502 = vmatprep.subr.bf16.mxu0 %v8729_v16  ;;  %2728 = vmatprep.subr.bf16.mxu1 %v8732_v17  ;;  %v8806_v16 = vld [vmem:[#allocation5 + $0x6d0] ss:$48 sps:$4 sm:$0xff]   ;;  %v8811_v17 = vld [vmem:[#allocation5 + $0x73c] ss:$48 sps:$4 sm:$0xff]  }
  0xf6   :  { %2214 = vmatmul.mubr.bf16.gmra.mrb[12].mxu0 %v8726_v18  ;;  %2440 = vmatmul.mubr.bf16.gmra.mrb[12].mxu1 %v8726_v18  ;;  %v8814_v18 = vld [vmem:[#allocation5 + $0x734] ss:$48 sps:$4 sm:$0xff]  }
  0xf7   :  { %2503 = vmatpush1.bf16.msra.mxu0 %v8727_v19  ;;  %2729 = vmatpush1.bf16.msra.mxu1 %v8730_v20  ;;  %v8812_v19 = vld [vmem:[#allocation5 + $0x730] ss:$48 sps:$4 sm:$0xff]   ;;  %v8820_v20 = vld [vmem:[#allocation5 + $0x794] ss:$48 sps:$4 sm:$0xff]  }
  0xf8   :  { %2504 = vmatprep.subr.bf16.mxu0 %v8735_v21  ;;  %2730 = vmatprep.subr.bf16.mxu1 %v8738_v22  ;;  %v8815_v21 = vld [vmem:[#allocation5 + $0x798] ss:$48 sps:$4 sm:$0xff]   ;;  %v8818_v22 = vld [vmem:[#allocation5 + $0x790] ss:$48 sps:$4 sm:$0xff]  }
  0xf9   :  { %2223 = vmatprep.mubr.bf16.mxu0 %v9560_v50  ;;  %2449 = vmatprep.mubr.bf16.mxu1 %v9560_v50 }
  0xfb   :  { %2505 = vmatpush1.bf16.msra.mxu0 %v8733_v25  ;;  %2731 = vmatpush1.bf16.msra.mxu1 %v8736_v26  ;;  %v8823_v25 = vld [vmem:[#allocation5 + $0x7fc] ss:$48 sps:$4 sm:$0xff]   ;;  %v8826_v26 = vld [vmem:[#allocation5 + $0x7f4] ss:$48 sps:$4 sm:$0xff]  }
  0xfc   :  { %2506 = vmatprep.subr.bf16.mxu0 %v8742_v27  ;;  %2732 = vmatprep.subr.bf16.mxu1 %v8745_v28  ;;  %v8824_v27 = vld [vmem:[#allocation5 + $0x7f0] ss:$48 sps:$4 sm:$0xff]   ;;  %v8829_v28 = vld [vmem:[#allocation5 + $0x85c] ss:$48 sps:$4 sm:$0xff]  }
  0xfe   :  { %2224 = vmatmul.mubr.bf16.gmra.mrb[16].mxu0 %v8739_v29  ;;  %2450 = vmatmul.mubr.bf16.gmra.mrb[16].mxu1 %v8739_v29  ;;  %v8832_v29 = vld [vmem:[#allocation5 + $0x854] ss:$48 sps:$4 sm:$0xff]  }
  0xff   :  { %2507 = vmatpush1.bf16.msra.mxu0 %v8740_v30  ;;  %2733 = vmatpush1.bf16.msra.mxu1 %v8743_v31  ;;  %v8827_v30 = vld [vmem:[#allocation5 + $0x858] ss:$48 sps:$4 sm:$0xff]   ;;  %v8830_v31 = vld [vmem:[#allocation5 + $0x850] ss:$48 sps:$4 sm:$0xff]  }
 0x100   :  { %2508 = vmatprep.subr.bf16.mxu0 %v8748_v32  ;;  %2734 = vmatprep.subr.bf16.mxu1 %v8751_v33  ;;  %v8835_v32 = vld [vmem:[#allocation5 + $0x8bc] ss:$48 sps:$4 sm:$0xff]   ;;  %v8838_v33 = vld [vmem:[#allocation5 + $0x8b4] ss:$48 sps:$4 sm:$0xff]  }
 0x101   :  { %2233 = vmatprep.mubr.bf16.mxu0 %v9560_v50  ;;  %2459 = vmatprep.mubr.bf16.mxu1 %v9560_v50 }
 0x103   :  { %2509 = vmatpush1.bf16.msra.mxu0 %v8746_v34  ;;  %2735 = vmatpush1.bf16.msra.mxu1 %v8749_v35  ;;  %v8836_v34 = vld [vmem:[#allocation5 + $0x8b0] ss:$48 sps:$4 sm:$0xff]  }
 0x104   :  { %2510 = vmatprep.subr.bf16.mxu0 %v8755_v36  ;;  %2736 = vmatprep.subr.bf16.mxu1 %v8758_v37  ;;  %v9370_v35 = vld [vmem:[#allocation2 + $0x64] ss:$12 sps:$4 sm:$0xff]   ;;  %v8844_v37 = vld [vmem:[#allocation5 + $0x2c] ss:$48 sps:$4 sm:$0xff]  }
 0x105   :  { %v8841_v36 = vld [vmem:[#allocation5 + $0x24] ss:$48 sps:$4 sm:$0xff]  }
 0x106   :  { %2234 = vmatmul.mubr.bf16.gmra.mrb[20].mxu0 %v8752_v38  ;;  %2460 = vmatmul.mubr.bf16.gmra.mrb[20].mxu1 %v8752_v38  ;;  %v9371_v38 = vld [vmem:[#allocation2 + $0x60] ss:$12 sps:$4 sm:$0xff]  }
 0x107   :  { %2511 = vmatpush1.bf16.msra.mxu0 %v8753_v39  ;;  %2737 = vmatpush1.bf16.msra.mxu1 %v8756_v40  ;;  %v9372_v39 = vld [vmem:[#allocation2 + $0x7c] ss:$12 sps:$4 sm:$0xff]   ;;  %v9373_v40 = vld [vmem:[#allocation2 + $0x78] ss:$12 sps:$4 sm:$0xff]  }
 0x108   :  { %2512 = vmatprep.subr.bf16.mxu0 %v8761_v41  ;;  %2738 = vmatprep.subr.bf16.mxu1 %v8764_v42  ;;  %v9374_v41 = vld [vmem:[#allocation2 + $0x94] ss:$12 sps:$4 sm:$0xff]   ;;  %v9375_v42 = vld [vmem:[#allocation2 + $0x90] ss:$12 sps:$4 sm:$0xff]  }
 0x109   :  { %2243 = vmatprep.mubr.bf16.mxu0 %v9560_v50  ;;  %2469 = vmatprep.mubr.bf16.mxu1 %v9560_v50 }
 0x10b   :  { %2513 = vmatpush1.bf16.msra.mxu0 %v8759_v43  ;;  %2739 = vmatpush1.bf16.msra.mxu1 %v8762_v44  ;;  %v9376_v43 = vld [vmem:[#allocation2 + $0xac] ss:$12 sps:$4 sm:$0xff]   ;;  %v9377_v44 = vld [vmem:[#allocation2 + $0xa8] ss:$12 sps:$4 sm:$0xff]  }
 0x10c   :  { %2514 = vmatprep.subr.bf16.mxu0 %v8768_v45  ;;  %2740 = vmatprep.subr.bf16.mxu1 %v8771_v46  ;;  %v8839_v45 = vld [vmem:[#allocation5 + $0x20] ss:$48 sps:$4 sm:$0xff]   ;;  %v8842_v46 = vld [vmem:[#allocation5 + $0x28] ss:$48 sps:$4 sm:$0xff]  }
 0x10e   :  { %2244 = vmatmul.mubr.bf16.gmra.mrb[24].mxu0 %v8765_v47  ;;  %2470 = vmatmul.mubr.bf16.gmra.mrb[24].mxu1 %v8765_v47  ;;  %v8847_v47 = vld [vmem:[#allocation5 + $0x84] ss:$48 sps:$4 sm:$0xff]  }
 0x10f   :  { %2515 = vmatpush1.bf16.msra.mxu0 %v8766_v48  ;;  %2741 = vmatpush1.bf16.msra.mxu1 %v8769_v49  ;;  %v8850_v48 = vld [vmem:[#allocation5 + $0x8c] ss:$48 sps:$4 sm:$0xff]   ;;  %v8845_v49 = vld [vmem:[#allocation5 + $0x80] ss:$48 sps:$4 sm:$0xff]  }
 0x110   :  { %2516 = vmatprep.subr.bf16.mxu0 %v8774_v51  ;;  %2742 = vmatprep.subr.bf16.mxu1 %v8777_v52  ;;  %v8848_v51 = vld [vmem:[#allocation5 + $0x88] ss:$48 sps:$4 sm:$0xff]  }
 0x111   :  { %2253 = vmatprep.mubr.bf16.mxu0 %v9560_v50  ;;  %2479 = vmatprep.mubr.bf16.mxu1 %v9560_v50  ;;  %v9378_v52 = vld [vmem:[#allocation2 + $0x8] ss:$12 sps:$4 sm:$0xff]  }
 0x113   :  { %2517 = vmatpush1.bf16.msra.mxu0 %v8772_v53  ;;  %2743 = vmatpush1.bf16.msra.mxu1 %v8775_v54  ;;  %v8853_v53 = vld [vmem:[#allocation5 + $0xe4] ss:$48 sps:$4 sm:$0xff]   ;;  %v8856_v54 = vld [vmem:[#allocation5 + $0xec] ss:$48 sps:$4 sm:$0xff]  }
 0x114   :  { %2518 = vmatprep.subr.bf16.mxu0 %v8781_v55  ;;  %2744 = vmatprep.subr.bf16.mxu1 %v8784_v56  ;;  %v8851_v55 = vld [vmem:[#allocation5 + $0xe0] ss:$48 sps:$4 sm:$0xff]   ;;  %v8854_v56 = vld [vmem:[#allocation5 + $0xe8] ss:$48 sps:$4 sm:$0xff]  }
 0x116   :  { %2254 = vmatmul.mubr.bf16.gmra.mrb[28].mxu0 %v8778_v57  ;;  %2480 = vmatmul.mubr.bf16.gmra.mrb[28].mxu1 %v8778_v57  ;;  %v8859_v57 = vld [vmem:[#allocation5 + $0x144] ss:$48 sps:$4 sm:$0xff]  }
 0x117   :  { %2519 = vmatpush1.bf16.msra.mxu0 %v8779_v58  ;;  %2745 = vmatpush1.bf16.msra.mxu1 %v8782_v59  ;;  %v8862_v58 = vld [vmem:[#allocation5 + $0x14c] ss:$48 sps:$4 sm:$0xff]   ;;  %v8857_v59 = vld [vmem:[#allocation5 + $0x140] ss:$48 sps:$4 sm:$0xff]  }
 0x118   :  { %2520 = vmatprep.subr.bf16.mxu0 %v8787_v60  ;;  %2746 = vmatprep.subr.bf16.mxu1 %v8790_v61  ;;  %v8860_v60 = vld [vmem:[#allocation5 + $0x148] ss:$48 sps:$4 sm:$0xff]   ;;  %v9379_v61 = vld [vmem:[#allocation2 + $0x20] ss:$12 sps:$4 sm:$0xff]  }
 0x119   :  { %2522 = vmatprep.mubr.bf16.mxu0 %v9367_v2  ;;  %2748 = vmatprep.mubr.bf16.mxu1 %v9367_v2  ;;  %v8871_v2 = vld [vmem:[#allocation5 + $0x204] ss:$48 sps:$4 sm:$0xff]  }
 0x11b   :  { %2521 = vmatpush1.bf16.msra.mxu0 %v8785_v62  ;;  %2747 = vmatpush1.bf16.msra.mxu1 %v8788_v63  ;;  %v8865_v62 = vld [vmem:[#allocation5 + $0x1a4] ss:$48 sps:$4 sm:$0xff]   ;;  %v8868_v63 = vld [vmem:[#allocation5 + $0x1ac] ss:$48 sps:$4 sm:$0xff]  }
 0x11c   :  { %2829 = vmatprep.subr.bf16.mxu1 %v8793_v0  ;;  %2603 = vmatprep.subr.bf16.mxu0 %v8796_v1  ;;  %v8863_v0 = vld [vmem:[#allocation5 + $0x1a0] ss:$48 sps:$4 sm:$0xff]   ;;  %v8866_v1 = vld [vmem:[#allocation5 + $0x1a8] ss:$48 sps:$4 sm:$0xff]  }
 0x11e   :  { %2523 = vmatmul.mubr.bf16.vlgmr.msra.gmra.mrb[32].mxu0 %v9654_v3  ;;  %2749 = vmatmul.mubr.bf16.vlgmr.msra.gmra.mrb[32].mxu1 %v9654_v3  ;;  %v8809_v3 = vld [vmem:[#allocation5 + $0x738] ss:$48 sps:$4 sm:$0xff]  }
 0x11f   :  { %2830 = vmatpush1.bf16.msra.mxu1 %v8791_v4  ;;  %2604 = vmatpush1.bf16.msra.mxu0 %v8794_v5  ;;  %v8874_v4 = vld [vmem:[#allocation5 + $0x20c] ss:$48 sps:$4 sm:$0xff]   ;;  %v8869_v5 = vld [vmem:[#allocation5 + $0x200] ss:$48 sps:$4 sm:$0xff]  }
 0x120   :  { %2532 = vmatprep.mubr.bf16.mxu0 %v9656_v6  ;;  %2758 = vmatprep.mubr.bf16.mxu1 %v9656_v6  ;;  %v8817_v6 = vld [vmem:[#allocation5 + $0x79c] ss:$48 sps:$4 sm:$0xff]  }
 0x121   :  { %2831 = vmatprep.subr.bf16.mxu1 %v8799_v7  ;;  %2605 = vmatprep.subr.bf16.mxu0 %v8802_v8  ;;  %v8872_v7 = vld [vmem:[#allocation5 + $0x208] ss:$48 sps:$4 sm:$0xff]  }
 0x122   :  { %v9380_v8 = vld [vmem:[#allocation2 + $0x38] ss:$12 sps:$4 sm:$0xff]  }
 0x123   :  { %2832 = vmatpush1.bf16.msra.mxu1 %v8797_v9  ;;  %2606 = vmatpush1.bf16.msra.mxu0 %v8800_v10  ;;  %v8877_v9 = vld [vmem:[#allocation5 + $0x264] ss:$48 sps:$4 sm:$0xff]   ;;  %v8880_v10 = vld [vmem:[#allocation5 + $0x26c] ss:$48 sps:$4 sm:$0xff]  }
 0x124   :  { %2833 = vmatprep.subr.bf16.mxu1 %v8805_v11  ;;  %2607 = vmatprep.subr.bf16.mxu0 %v8808_v12  ;;  %v8875_v11 = vld [vmem:[#allocation5 + $0x260] ss:$48 sps:$4 sm:$0xff]   ;;  %v8878_v12 = vld [vmem:[#allocation5 + $0x268] ss:$48 sps:$4 sm:$0xff]  }
 0x126   :  { %2533 = vmatmul.mubr.bf16.gmra.mrb[36].mxu0 %v9662_v13  ;;  %2759 = vmatmul.mubr.bf16.gmra.mrb[36].mxu1 %v9662_v13  ;;  %v8821_v13 = vld [vmem:[#allocation5 + $0x7f8] ss:$48 sps:$4 sm:$0xff]  }
 0x127   :  { %2542 = vmatprep.mubr.bf16.mxu0 %v9664_v14  ;;  %2768 = vmatprep.mubr.bf16.mxu1 %v9664_v14  ;;  %v9368_v14 = vld [vmem:[#allocation2 + $0x4c] ss:$12 sps:$4 sm:$0xff]  }
 0x128   :  { %2834 = vmatpush1.bf16.msra.mxu1 %v8803_v15  ;;  %2608 = vmatpush1.bf16.msra.mxu0 %v8806_v16  ;;  %v8883_v15 = vld [vmem:[#allocation5 + $0x2c4] ss:$48 sps:$4 sm:$0xff]   ;;  %v8886_v16 = vld [vmem:[#allocation5 + $0x2cc] ss:$48 sps:$4 sm:$0xff]  }
 0x129   :  { %2835 = vmatprep.subr.bf16.mxu1 %v8811_v17  ;;  %2609 = vmatprep.subr.bf16.mxu0 %v8814_v18  ;;  %v9381_v17 = vld [vmem:[#allocation2 + $0x50] ss:$12 sps:$4 sm:$0xff]  }
 0x12a   :  { %v8881_v18 = vld [vmem:[#allocation5 + $0x2c0] ss:$48 sps:$4 sm:$0xff]  }
 0x12c   :  { %2836 = vmatpush1.bf16.msra.mxu1 %v8809_v3  ;;  %2610 = vmatpush1.bf16.msra.mxu0 %v8812_v19  ;;  %v8884_v3 = vld [vmem:[#allocation5 + $0x2c8] ss:$48 sps:$4 sm:$0xff]   ;;  %v8889_v19 = vld [vmem:[#allocation5 + $0x324] ss:$48 sps:$4 sm:$0xff]  }
 0x12d   :  { %2837 = vmatprep.subr.bf16.mxu1 %v8817_v6  ;;  %2611 = vmatprep.subr.bf16.mxu0 %v8820_v20  ;;  %v8892_v6 = vld [vmem:[#allocation5 + $0x32c] ss:$48 sps:$4 sm:$0xff]   ;;  %v8887_v20 = vld [vmem:[#allocation5 + $0x320] ss:$48 sps:$4 sm:$0xff]  }
 0x12e   :  { %2543 = vmatmul.mubr.bf16.gmra.mrb[40].mxu0 %v9670_v23  ;;  %2769 = vmatmul.mubr.bf16.gmra.mrb[40].mxu1 %v9670_v23  ;;  %v9369_v23 = vld [vmem:[#allocation2 + $0x48] ss:$12 sps:$4 sm:$0xff]  }
 0x12f   :  { %2552 = vmatprep.mubr.bf16.mxu0 %v9672_v24  ;;  %2778 = vmatprep.mubr.bf16.mxu1 %v9368_v14  ;;  %v8833_v24 = vld [vmem:[#allocation5 + $0x8b8] ss:$48 sps:$4 sm:$0xff]  }
 0x130   :  { %2838 = vmatpush1.bf16.msra.mxu1 %v8815_v21  ;;  %2612 = vmatpush1.bf16.msra.mxu0 %v8818_v22  ;;  %v8890_v21 = vld [vmem:[#allocation5 + $0x328] ss:$48 sps:$4 sm:$0xff]   ;;  %v8895_v22 = vld [vmem:[#allocation5 + $0x384] ss:$48 sps:$4 sm:$0xff]  }
 0x131   :  { %2839 = vmatprep.subr.bf16.mxu1 %v8823_v25  ;;  %2613 = vmatprep.subr.bf16.mxu0 %v8826_v26  ;;  %v8898_v25 = vld [vmem:[#allocation5 + $0x38c] ss:$48 sps:$4 sm:$0xff]   ;;  %v9382_v26 = vld [vmem:[#allocation2 + $0x68] ss:$12 sps:$4 sm:$0xff]  }
 0x132   :  { %v8896_v14 = vld [vmem:[#allocation5 + $0x388] ss:$48 sps:$4 sm:$0xff]  }
 0x134   :  { %2840 = vmatpush1.bf16.msra.mxu1 %v8821_v13  ;;  %2614 = vmatpush1.bf16.msra.mxu0 %v8824_v27  ;;  %v8893_v13 = vld [vmem:[#allocation5 + $0x380] ss:$48 sps:$4 sm:$0xff]   ;;  %v8901_v27 = vld [vmem:[#allocation5 + $0x3e4] ss:$48 sps:$4 sm:$0xff]  }
 0x135   :  { %2841 = vmatprep.subr.bf16.mxu1 %v8829_v28  ;;  %2615 = vmatprep.subr.bf16.mxu0 %v8832_v29  ;;  %v8904_v28 = vld [vmem:[#allocation5 + $0x3ec] ss:$48 sps:$4 sm:$0xff]   ;;  %v8899_v29 = vld [vmem:[#allocation5 + $0x3e0] ss:$48 sps:$4 sm:$0xff]  }
 0x136   :  { %2553 = vmatmul.mubr.bf16.gmra.mrb[44].mxu0 %v9369_v23  ;;  %2779 = vmatmul.mubr.bf16.gmra.mrb[44].mxu1 %v9369_v23  ;;  %v8905_v23 = vld [vmem:[#allocation5 + $0x440] ss:$48 sps:$4 sm:$0xff]  }
 0x137   :  { %2562 = vmatprep.mubr.bf16.mxu0 %v9370_v35  ;;  %2788 = vmatprep.mubr.bf16.mxu1 %v9370_v35  ;;  %v8916_v35 = vld [vmem:[#allocation5 + $0x4ac] ss:$48 sps:$4 sm:$0xff]  }
 0x138   :  { %2842 = vmatpush1.bf16.msra.mxu1 %v8827_v30  ;;  %2616 = vmatpush1.bf16.msra.mxu0 %v8830_v31  ;;  %v8902_v30 = vld [vmem:[#allocation5 + $0x3e8] ss:$48 sps:$4 sm:$0xff]   ;;  %v8907_v31 = vld [vmem:[#allocation5 + $0x444] ss:$48 sps:$4 sm:$0xff]  }
 0x139   :  { %2843 = vmatprep.subr.bf16.mxu1 %v8835_v32  ;;  %2617 = vmatprep.subr.bf16.mxu0 %v8838_v33  ;;  %v8910_v32 = vld [vmem:[#allocation5 + $0x44c] ss:$48 sps:$4 sm:$0xff]  }
 0x13a   :  { %v9383_v33 = vld [vmem:[#allocation2 + $0x80] ss:$12 sps:$4 sm:$0xff]  }
 0x13c   :  { %2844 = vmatpush1.bf16.msra.mxu1 %v8833_v24  ;;  %2618 = vmatpush1.bf16.msra.mxu0 %v8836_v34  ;;  %v8908_v24 = vld [vmem:[#allocation5 + $0x448] ss:$48 sps:$4 sm:$0xff]   ;;  %v8913_v34 = vld [vmem:[#allocation5 + $0x4a4] ss:$48 sps:$4 sm:$0xff]  }
 0x13d   :  { %2942 = vmatprep.subr.bf16.mxu0 %v8841_v36  ;;  %3168 = vmatprep.subr.bf16.mxu1 %v8844_v37  ;;  %v8911_v36 = vld [vmem:[#allocation5 + $0x4a0] ss:$48 sps:$4 sm:$0xff]   ;;  %v8914_v37 = vld [vmem:[#allocation5 + $0x4a8] ss:$48 sps:$4 sm:$0xff]  }
 0x13e   :  { %2563 = vmatmul.mubr.bf16.gmra.mrb[48].mxu0 %v9371_v38  ;;  %2789 = vmatmul.mubr.bf16.gmra.mrb[48].mxu1 %v9371_v38  ;;  %v8919_v38 = vld [vmem:[#allocation5 + $0x504] ss:$48 sps:$4 sm:$0xff]  }
 0x13f   :  { %2572 = vmatprep.mubr.bf16.mxu0 %v9372_v39  ;;  %2798 = vmatprep.mubr.bf16.mxu1 %v9372_v39  ;;  %v8922_v39 = vld [vmem:[#allocation5 + $0x50c] ss:$48 sps:$4 sm:$0xff]  }
 0x146   :  { %2573 = vmatmul.mubr.bf16.gmra.mrb[52].mxu0 %v9373_v40  ;;  %2799 = vmatmul.mubr.bf16.gmra.mrb[52].mxu1 %v9373_v40  ;;  %v9384_v40 = vld [vmem:[#allocation2 + $0x98] ss:$12 sps:$4 sm:$0xff]  }
 0x147   :  { %2582 = vmatprep.mubr.bf16.mxu0 %v9374_v41  ;;  %2808 = vmatprep.mubr.bf16.mxu1 %v9374_v41  ;;  %v8917_v41 = vld [vmem:[#allocation5 + $0x500] ss:$48 sps:$4 sm:$0xff]  }
 0x14e   :  { %2583 = vmatmul.mubr.bf16.gmra.mrb[56].mxu0 %v9375_v42  ;;  %2809 = vmatmul.mubr.bf16.gmra.mrb[56].mxu1 %v9375_v42  ;;  %v8920_v42 = vld [vmem:[#allocation5 + $0x508] ss:$48 sps:$4 sm:$0xff]  }
 0x14f   :  { %2592 = vmatprep.mubr.bf16.mxu0 %v9376_v43  ;;  %2818 = vmatprep.mubr.bf16.mxu1 %v9376_v43  ;;  %v8925_v43 = vld [vmem:[#allocation5 + $0x564] ss:$48 sps:$4 sm:$0xff]  }
 0x156   :  { %2593 = vmatmul.mubr.bf16.gmra.mrb[60].mxu0 %v9377_v44  ;;  %2819 = vmatmul.mubr.bf16.gmra.mrb[60].mxu1 %v9377_v44  ;;  %v8928_v44 = vld [vmem:[#allocation5 + $0x56c] ss:$48 sps:$4 sm:$0xff]  }
 0x157   :  { %2635 = vmatprep.mubr.bf16.mxu0 %v9560_v50  ;;  %2861 = vmatprep.mubr.bf16.mxu1 %v9560_v50 }
 0x15e   :  { %2636 = vmatmul.mubr.bf16.vlgmr.msra.gmra.mrb[32].mxu0 %v9378_v52  ;;  %2862 = vmatmul.mubr.bf16.vlgmr.msra.gmra.mrb[32].mxu1 %v9378_v52  ;;  %v8932_v52 = vld [vmem:[#allocation5 + $0x5c8] ss:$48 sps:$4 sm:$0xff]  }
 0x15f   :  { %2943 = vmatpush1.bf16.msra.mxu0 %v8839_v45  ;;  %3169 = vmatpush1.bf16.msra.mxu1 %v8842_v46  ;;  %v8923_v45 = vld [vmem:[#allocation5 + $0x560] ss:$48 sps:$4 sm:$0xff]   ;;  %v8926_v46 = vld [vmem:[#allocation5 + $0x568] ss:$48 sps:$4 sm:$0xff]  }
 0x160   :  { %2944 = vmatprep.subr.bf16.mxu0 %v8847_v47  ;;  %3170 = vmatprep.subr.bf16.mxu1 %v8850_v48  ;;  %v8931_v47 = vld [vmem:[#allocation5 + $0x5c4] ss:$48 sps:$4 sm:$0xff]   ;;  %v8934_v48 = vld [vmem:[#allocation5 + $0x5cc] ss:$48 sps:$4 sm:$0xff]  }
 0x161   :  { %2645 = vmatprep.mubr.bf16.mxu0 %v9560_v50  ;;  %2871 = vmatprep.mubr.bf16.mxu1 %v9560_v50 }
 0x163   :  { %2945 = vmatpush1.bf16.msra.mxu0 %v8845_v49  ;;  %3171 = vmatpush1.bf16.msra.mxu1 %v8848_v51  ;;  %v9385_v49 = vld [vmem:[#allocation2 + $0xb0] ss:$12 sps:$4 sm:$0xff]  }
 0x164   :  { %2946 = vmatprep.subr.bf16.mxu0 %v8853_v53  ;;  %3172 = vmatprep.subr.bf16.mxu1 %v8856_v54  ;;  %v8929_v51 = vld [vmem:[#allocation5 + $0x5c0] ss:$48 sps:$4 sm:$0xff]   ;;  %v8937_v53 = vld [vmem:[#allocation5 + $0x62c] ss:$48 sps:$4 sm:$0xff]   ;;  %v8940_v54 = vld [vmem:[#allocation5 + $0x624] ss:$48 sps:$4 sm:$0xff]  }
 0x166   :  { %2646 = vmatmul.mubr.bf16.gmra.mrb[36].mxu0 %v9379_v61  ;;  %2872 = vmatmul.mubr.bf16.gmra.mrb[36].mxu1 %v9379_v61  ;;  %v8941_v61 = vld [vmem:[#allocation5 + $0x688] ss:$48 sps:$4 sm:$0xff]  }
 0x167   :  { %2947 = vmatpush1.bf16.msra.mxu0 %v8851_v55  ;;  %3173 = vmatpush1.bf16.msra.mxu1 %v8854_v56  ;;  %v9386_v55 = vld [vmem:[#allocation2 + $0x4] ss:$12 sps:$4 sm:$0xff]   ;;  %v8935_v56 = vld [vmem:[#allocation5 + $0x628] ss:$48 sps:$4 sm:$0xff]  }
 0x168   :  { %2948 = vmatprep.subr.bf16.mxu0 %v8859_v57  ;;  %3174 = vmatprep.subr.bf16.mxu1 %v8862_v58  ;;  %v8938_v57 = vld [vmem:[#allocation5 + $0x620] ss:$48 sps:$4 sm:$0xff]   ;;  %v8943_v58 = vld [vmem:[#allocation5 + $0x68c] ss:$48 sps:$4 sm:$0xff]  }
 0x169   :  { %2655 = vmatprep.mubr.bf16.mxu0 %v9560_v50  ;;  %2881 = vmatprep.mubr.bf16.mxu1 %v9560_v50 }
 0x16b   :  { %2949 = vmatpush1.bf16.msra.mxu0 %v8857_v59  ;;  %3175 = vmatpush1.bf16.msra.mxu1 %v8860_v60  ;;  %v8946_v59 = vld [vmem:[#allocation5 + $0x684] ss:$48 sps:$4 sm:$0xff]   ;;  %v9387_v60 = vld [vmem:[#allocation2] ss:$12 sps:$4 sm:$0xff]  }
 0x16c   :  { %2950 = vmatprep.subr.bf16.mxu0 %v8865_v62  ;;  %3176 = vmatprep.subr.bf16.mxu1 %v8868_v63  ;;  %v8944_v62 = vld [vmem:[#allocation5 + $0x680] ss:$48 sps:$4 sm:$0xff]   ;;  %v9388_v63 = vld [vmem:[#allocation2 + $0x1c] ss:$12 sps:$4 sm:$0xff]  }
 0x16e   :  { %2656 = vmatmul.mubr.bf16.gmra.mrb[40].mxu0 %v9380_v8  ;;  %2882 = vmatmul.mubr.bf16.gmra.mrb[40].mxu1 %v9380_v8 }
 0x16f   :  { %2951 = vmatpush1.bf16.msra.mxu0 %v8863_v0  ;;  %3177 = vmatpush1.bf16.msra.mxu1 %v8866_v1  ;;  %v8949_v0 = vld [vmem:[#allocation5 + $0x6ec] ss:$48 sps:$4 sm:$0xff]   ;;  %v8952_v1 = vld [vmem:[#allocation5 + $0x6e4] ss:$48 sps:$4 sm:$0xff]  }
 0x170   :  { %2952 = vmatprep.subr.bf16.mxu0 %v8871_v2  ;;  %3178 = vmatprep.subr.bf16.mxu1 %v8874_v4  ;;  %v410_v2 = vlaneseq  ;;  %v8947_v4 = vld [vmem:[#allocation5 + $0x6e8] ss:$48 sps:$4 sm:$0xff]  }
 0x171   :  { %2665 = vmatprep.mubr.bf16.mxu0 %v9560_v50  ;;  %2891 = vmatprep.mubr.bf16.mxu1 %v9560_v50 }
 0x172   :  { %v9721_v8 = vshrl.u32 %v410_v2, 7 }
 0x173   :  { %2953 = vmatpush1.bf16.msra.mxu0 %v8869_v5  ;;  %3179 = vmatpush1.bf16.msra.mxu1 %v8872_v7  ;;  %v8950_v5 = vld [vmem:[#allocation5 + $0x6e0] ss:$48 sps:$4 sm:$0xff]   ;;  %v8955_v7 = vld [vmem:[#allocation5 + $0x74c] ss:$48 sps:$4 sm:$0xff]  }
 0x174   :  { %2954 = vmatprep.subr.bf16.mxu0 %v8877_v9  ;;  %3180 = vmatprep.subr.bf16.mxu1 %v8880_v10  ;;  %v8958_v9 = vld [vmem:[#allocation5 + $0x744] ss:$48 sps:$4 sm:$0xff]  }
 0x175   :  { %v9389_v10 = vld [vmem:[#allocation2 + $0x18] ss:$12 sps:$4 sm:$0xff]  }
 0x176   :  { %2666 = vmatmul.mubr.bf16.gmra.mrb[44].mxu0 %v9381_v17  ;;  %2892 = vmatmul.mubr.bf16.gmra.mrb[44].mxu1 %v9381_v17  ;;  %v8964_v17 = vld [vmem:[#allocation5 + $0x7a4] ss:$48 sps:$4 sm:$0xff]  }
 0x177   :  { %2955 = vmatpush1.bf16.msra.mxu0 %v8875_v11  ;;  %3181 = vmatpush1.bf16.msra.mxu1 %v8878_v12  ;;  %v8953_v11 = vld [vmem:[#allocation5 + $0x748] ss:$48 sps:$4 sm:$0xff]   ;;  %v9390_v12 = vld [vmem:[#allocation2 + $0x34] ss:$12 sps:$4 sm:$0xff]  }
 0x178   :  { %2956 = vmatprep.subr.bf16.mxu0 %v8883_v15  ;;  %3182 = vmatprep.subr.bf16.mxu1 %v8886_v16  ;;  %v8956_v15 = vld [vmem:[#allocation5 + $0x740] ss:$48 sps:$4 sm:$0xff]   ;;  %v8961_v16 = vld [vmem:[#allocation5 + $0x7ac] ss:$48 sps:$4 sm:$0xff]  }
 0x179   :  { %2675 = vmatprep.mubr.bf16.mxu0 %v9560_v50  ;;  %2901 = vmatprep.mubr.bf16.mxu1 %v9560_v50 }
 0x17b   :  { %2957 = vmatpush1.bf16.msra.mxu0 %v8881_v18  ;;  %3183 = vmatpush1.bf16.msra.mxu1 %v8884_v3  ;;  %v406_v18 = vld [vmem:[#allocation7] sm:$0xff]  ;;  %v9724_v3 = vsub.s32 0, %v9721_v8 }
 0x17c   :  { %2958 = vmatprep.subr.bf16.mxu0 %v8889_v19  ;;  %3184 = vmatprep.subr.bf16.mxu1 %v8892_v6  ;;  %v9727_v19 = vsub.s32 2, %v9721_v8  ;;  %v9730_v6 = vsub.s32 1, %v9721_v8 }
 0x17e   :  { %2676 = vmatmul.mubr.bf16.gmra.mrb[48].mxu0 %v9382_v26  ;;  %2902 = vmatmul.mubr.bf16.gmra.mrb[48].mxu1 %v9382_v26  ;;  %v8970_v26 = vld [vmem:[#allocation5 + $0x804] ss:$48 sps:$4 sm:$0xff]  }
 0x17f   :  { %2959 = vmatpush1.bf16.msra.mxu0 %v8887_v20  ;;  %3185 = vmatpush1.bf16.msra.mxu1 %v8890_v21  ;;  %v10683_v20 = vsub.s32 3, %v9721_v8  ;;  %v8959_v21 = vld [vmem:[#allocation5 + $0x7a8] ss:$48 sps:$4 sm:$0xff]  }
 0x180   :  { %2960 = vmatprep.subr.bf16.mxu0 %v8895_v22  ;;  %3186 = vmatprep.subr.bf16.mxu1 %v8898_v25  ;;  %v8962_v22 = vld [vmem:[#allocation5 + $0x7a0] ss:$48 sps:$4 sm:$0xff]   ;;  %v8967_v25 = vld [vmem:[#allocation5 + $0x80c] ss:$48 sps:$4 sm:$0xff]  }
 0x181   :  { %2685 = vmatprep.mubr.bf16.mxu0 %v9560_v50  ;;  %2911 = vmatprep.mubr.bf16.mxu1 %v9560_v50 }
 0x183   :  { %2961 = vmatpush1.bf16.msra.mxu0 %v8893_v13  ;;  %3187 = vmatpush1.bf16.msra.mxu1 %v8896_v14  ;;  %v9391_v13 = vld [vmem:[#allocation2 + $0x30] ss:$12 sps:$4 sm:$0xff]   ;;  %v9734_v14 = vrot.slane %v406_v18, %v9724_v3 }
 0x184   :  { %2962 = vmatprep.subr.bf16.mxu0 %v8901_v27  ;;  %3188 = vmatprep.subr.bf16.mxu1 %v8904_v28  ;;  %v9737_v27 = vrot.slane %v406_v18, %v9727_v19  ;;  %v9740_v28 = vrot.slane %v406_v18, %v9730_v6 }
 0x186   :  { %2686 = vmatmul.mubr.bf16.gmra.mrb[52].mxu0 %v9383_v33  ;;  %2912 = vmatmul.mubr.bf16.gmra.mrb[52].mxu1 %v9383_v33  ;;  %v8973_v33 = vld [vmem:[#allocation5 + $0x86c] ss:$48 sps:$4 sm:$0xff]  }
 0x187   :  { %2963 = vmatpush1.bf16.msra.mxu0 %v8899_v29  ;;  %3189 = vmatpush1.bf16.msra.mxu1 %v8902_v30  ;;  %v9744_v29 = vrot.slane %v406_v18, %v10683_v20  ;;  %v9392_v30 = vld [vmem:[#allocation2 + $0x4c] ss:$12 sps:$4 sm:$0xff]  }
 0x188   :  { %2964 = vmatprep.subr.bf16.mxu0 %v8907_v31  ;;  %3190 = vmatprep.subr.bf16.mxu1 %v8910_v32  ;;  %v8965_v31 = vld [vmem:[#allocation5 + $0x808] ss:$48 sps:$4 sm:$0xff]   ;;  %v8968_v32 = vld [vmem:[#allocation5 + $0x800] ss:$48 sps:$4 sm:$0xff]  }
 0x189   :  { %2695 = vmatprep.mubr.bf16.mxu0 %v9560_v50  ;;  %2921 = vmatprep.mubr.bf16.mxu1 %v9560_v50 }
 0x18b   :  { %2965 = vmatpush1.bf16.msra.mxu0 %v8905_v23  ;;  %3191 = vmatpush1.bf16.msra.mxu1 %v8908_v24 }
 0x18c   :  { %2966 = vmatprep.subr.bf16.mxu0 %v8913_v34  ;;  %3192 = vmatprep.subr.bf16.mxu1 %v8916_v35  ;;  %v8976_v34 = vld [vmem:[#allocation5 + $0x864] ss:$48 sps:$4 sm:$0xff]  }
 0x18e   :  { %2696 = vmatmul.mubr.bf16.gmra.mrb[56].mxu0 %v9384_v40  ;;  %2922 = vmatmul.mubr.bf16.gmra.mrb[56].mxu1 %v9384_v40  ;;  %v8974_v40 = vld [vmem:[#allocation5 + $0x860] ss:$48 sps:$4 sm:$0xff]  }
 0x18f   :  { %2967 = vmatpush1.bf16.msra.mxu0 %v8911_v36  ;;  %3193 = vmatpush1.bf16.msra.mxu1 %v8914_v37 }
 0x190   :  { %2968 = vmatprep.subr.bf16.mxu0 %v8919_v38  ;;  %3194 = vmatprep.subr.bf16.mxu1 %v8922_v39  ;;  %v8971_v39 = vld [vmem:[#allocation5 + $0x868] ss:$48 sps:$4 sm:$0xff]  }
 0x191   :  { %2705 = vmatprep.mubr.bf16.mxu0 %v9560_v50  ;;  %2931 = vmatprep.mubr.bf16.mxu1 %v9560_v50 }
 0x193   :  { %2969 = vmatpush1.bf16.msra.mxu0 %v8917_v41  ;;  %3195 = vmatpush1.bf16.msra.mxu1 %v8920_v42 }
 0x194   :  { %2970 = vmatprep.subr.bf16.mxu0 %v8925_v43  ;;  %3196 = vmatprep.subr.bf16.mxu1 %v8928_v44 }
 0x196   :  { %2706 = vmatmul.mubr.bf16.gmra.mrb[60].mxu0 %v9385_v49  ;;  %2932 = vmatmul.mubr.bf16.gmra.mrb[60].mxu1 %v9385_v49  ;;  %v8979_v49 = vld [vmem:[#allocation5 + $0x8cc] ss:$48 sps:$4 sm:$0xff]  }
 0x197   :  { %2971 = vmatpush1.bf16.msra.mxu0 %v8923_v45  ;;  %3197 = vmatpush1.bf16.msra.mxu1 %v8926_v46 }
 0x198   :  { %2972 = vmatprep.subr.bf16.mxu0 %v8931_v47  ;;  %3198 = vmatprep.subr.bf16.mxu1 %v8934_v48 }
 0x199   :  { %2974 = vmatprep.mubr.bf16.mxu0 %v9386_v55  ;;  %3200 = vmatprep.mubr.bf16.mxu1 %v9386_v55  ;;  %v8982_v55 = vld [vmem:[#allocation5 + $0x8c4] ss:$48 sps:$4 sm:$0xff]  }
 0x19b   :  { %2973 = vmatpush1.bf16.msra.mxu0 %v8929_v51  ;;  %3199 = vmatpush1.bf16.msra.mxu1 %v8932_v52 }
 0x19c   :  { %3281 = vmatprep.subr.bf16.mxu1 %v8937_v53  ;;  %3055 = vmatprep.subr.bf16.mxu0 %v8940_v54 }
 0x19e   :  { %2975 = vmatmul.mubr.bf16.vlgmr.msra.gmra.mrb[64].mxu0 %v9387_v60  ;;  %3201 = vmatmul.mubr.bf16.vlgmr.msra.gmra.mrb[64].mxu1 %v9387_v60  ;;  %v9393_v60 = vld [vmem:[#allocation2 + $0x48] ss:$12 sps:$4 sm:$0xff]  }
 0x19f   :  { %3282 = vmatpush1.bf16.msra.mxu1 %v8935_v56  ;;  %3056 = vmatpush1.bf16.msra.mxu0 %v8938_v57 }
 0x1a0   :  { %2984 = vmatprep.mubr.bf16.mxu0 %v9388_v63  ;;  %3210 = vmatprep.mubr.bf16.mxu1 %v9388_v63 }
 0x1a1   :  { %3283 = vmatprep.subr.bf16.mxu1 %v8943_v58  ;;  %3057 = vmatprep.subr.bf16.mxu0 %v8946_v59 }
 0x1a3   :  { %3284 = vmatpush1.bf16.msra.mxu1 %v8941_v61  ;;  %3058 = vmatpush1.bf16.msra.mxu0 %v8944_v62  ;;  %v8977_v61 = vld [vmem:[#allocation5 + $0x8c8] ss:$48 sps:$4 sm:$0xff]   ;;  %v8980_v62 = vld [vmem:[#allocation5 + $0x8c0] ss:$48 sps:$4 sm:$0xff]  }
 0x1a4   :  { %3285 = vmatprep.subr.bf16.mxu1 %v8949_v0  ;;  %3059 = vmatprep.subr.bf16.mxu0 %v8952_v1  ;;  %v9394_v1 = vld [vmem:[#allocation2 + $0x64] ss:$12 sps:$4 sm:$0xff]  }
 0x1a6   :  { %2985 = vmatmul.mubr.bf16.gmra.mrb[68].mxu0 %v9389_v10  ;;  %3211 = vmatmul.mubr.bf16.gmra.mrb[68].mxu1 %v9389_v10  ;;  %v8985_v10 = vld [vmem:[#allocation8 + $0x4] ss:$12 sps:$4 sm:$0xff]  }
 0x1a7   :  { %2994 = vmatprep.mubr.bf16.mxu0 %v9390_v12  ;;  %3220 = vmatprep.mubr.bf16.mxu1 %v9390_v12 }
 0x1a8   :  { %3286 = vmatpush1.bf16.msra.mxu1 %v8947_v4  ;;  %3060 = vmatpush1.bf16.msra.mxu0 %v8950_v5 }
 0x1a9   :  { %3287 = vmatprep.subr.bf16.mxu1 %v8955_v7  ;;  %3061 = vmatprep.subr.bf16.mxu0 %v8958_v9 }
 0x1ac   :  { %3288 = vmatpush1.bf16.msra.mxu1 %v8953_v11  ;;  %3062 = vmatpush1.bf16.msra.mxu0 %v8956_v15  ;;  %v8986_v11 = vld [vmem:[#allocation8 + $0xc8] ss:$12 sps:$4 sm:$0xff]  }
 0x1ad   :  { %3289 = vmatprep.subr.bf16.mxu1 %v8961_v16  ;;  %3063 = vmatprep.subr.bf16.mxu0 %v8964_v17 }
 0x1ae   :  { %2995 = vmatmul.mubr.bf16.gmra.mrb[72].mxu0 %v9391_v13  ;;  %3221 = vmatmul.mubr.bf16.gmra.mrb[72].mxu1 %v9391_v13 }
 0x1af   :  { %3004 = vmatprep.mubr.bf16.mxu0 %v9392_v30  ;;  %3230 = vmatprep.mubr.bf16.mxu1 %v9392_v30 }
 0x1b0   :  { %3290 = vmatpush1.bf16.msra.mxu1 %v8959_v21  ;;  %3064 = vmatpush1.bf16.msra.mxu0 %v8962_v22 }
 0x1b1   :  { %v2185_v23 = vpop.f32.mrb[0].mxu0  ;;  %v2411_v24 = vpop.f32.mrb[0].mxu1  ;;  %3291 = vmatprep.subr.bf16.mxu1 %v8967_v25  ;;  %3065 = vmatprep.subr.bf16.mxu0 %v8970_v26 }
 0x1b2   :  { %v7930_v35 = vadd.f32 %v2185_v23, %v9734_v14  ;;  %v7962_v36 = vadd.f32 %v2411_v24, %v9737_v27  ;;  %v2187_v37 = vpop.f32.mrb[1].mxu0  ;;  %v2413_v38 = vpop.f32.mrb[1].mxu1 }
 0x1b3   :  { %v7931_v41 = vadd.f32 %v2187_v37, %v9740_v28  ;;  %v7963_v42 = vadd.f32 %v2413_v38, %v9744_v29  ;;  %v2189_v43 = vpop.f32.mrb[2].mxu0  ;;  %v2415_v44 = vpop.f32.mrb[2].mxu1 }
 0x1b4   :  { %v7932_v45 = vadd.f32 %v2189_v43, %v9734_v14  ;;  %v7964_v46 = vadd.f32 %v2415_v44, %v9737_v27  ;;  %v2191_v47 = vpop.f32.mrb[3].mxu0  ;;  %v2417_v48 = vpop.f32.mrb[3].mxu1  ;;  %3292 = vmatpush1.bf16.msra.mxu1 %v8965_v31  ;;  %3066 = vmatpush1.bf16.msra.mxu0 %v8968_v32  ;;  %v3394_v51 = vmax.f32 %v7930_v35, 0.0  ;;  %v3396_v52 = vmax.f32 %v7962_v36, 0.0 }
 0x1b5   :  { %v7933_v53 = vadd.f32 %v2191_v47, %v9740_v28  ;;  %v7965_v54 = vadd.f32 %v2417_v48, %v9744_v29  ;;  %3293 = vmatprep.subr.bf16.mxu1 %v8973_v33  ;;  %3067 = vmatprep.subr.bf16.mxu0 %v8976_v34  ;;  %v3395_v56 = vmax.f32 %v7931_v41, 0.0  ;;  %v3397_v57 = vmax.f32 %v7963_v42, 0.0  ;;  %v9396_v42 = vld [vmem:[#allocation2 + $0x7c] ss:$12 sps:$4 sm:$0xff]  }
 0x1b6   :  { %v3406_v58 = vmax.f32 %v7932_v45, 0.0  ;;  %v3408_v59 = vmax.f32 %v7964_v46, 0.0  ;;  %3005 = vmatmul.mubr.bf16.gmra.mrb[76].mxu0 %v9393_v60  ;;  %3231 = vmatmul.mubr.bf16.gmra.mrb[76].mxu1 %v9393_v60 }
 0x1b7   :  { %v3407_v63 = vmax.f32 %v7933_v53, 0.0  ;;  %v3409_v0 = vmax.f32 %v7965_v54, 0.0  ;;  %3014 = vmatprep.mubr.bf16.mxu0 %v9394_v1  ;;  %3240 = vmatprep.mubr.bf16.mxu1 %v9394_v1 }
 0x1b8   :  { %v9754_v2 = vpack.c.bf16 %v3406_v58, %v3394_v51  ;;  %v9756_v4 = vpack.c.bf16 %v3408_v59, %v3396_v52  ;;  %3294 = vmatpush1.bf16.msra.mxu1 %v8971_v39  ;;  %3068 = vmatpush1.bf16.msra.mxu0 %v8974_v40  ;;  %v9395_v39 = vld [vmem:[#allocation2 + $0x60] ss:$12 sps:$4 sm:$0xff]  }
 0x1b9   :  { %v9758_v5 = vpack.c.bf16 %v3407_v63, %v3395_v56  ;;  %v2195_v7 = vpop.f32.mrb[4].mxu0  ;;  %v2421_v9 = vpop.f32.mrb[4].mxu1  ;;  %3295 = vmatprep.subr.bf16.mxu1 %v8979_v49  ;;  %3069 = vmatprep.subr.bf16.mxu0 %v8982_v55  ;;  %v9760_v12 = vpack.c.bf16 %v3409_v0, %v3397_v57 }
 0x1ba   :  { %v7934_v15 = vadd.f32 %v2195_v7, %v9734_v14  ;;  %v7966_v16 = vadd.f32 %v2421_v9, %v9737_v27  ;;  %v2197_v17 = vpop.f32.mrb[5].mxu0  ;;  %v2423_v18 = vpop.f32.mrb[5].mxu1 }
 0x1bb   :  { %v7935_v21 = vadd.f32 %v2197_v17, %v9740_v28  ;;  %v7967_v22 = vadd.f32 %v2423_v18, %v9744_v29  ;;  %v2199_v25 = vpop.f32.mrb[6].mxu0  ;;  %v2425_v26 = vpop.f32.mrb[6].mxu1  ;;  %v9398_v18 = vld [vmem:[#allocation2 + $0x94] ss:$12 sps:$4 sm:$0xff]  }
 0x1bc   :  { %v7936_v13 = vadd.f32 %v2199_v25, %v9734_v14  ;;  %v7968_v30 = vadd.f32 %v2425_v26, %v9737_v27  ;;  %v2201_v31 = vpop.f32.mrb[7].mxu0  ;;  %v2427_v32 = vpop.f32.mrb[7].mxu1  ;;  %3296 = vmatpush1.bf16.msra.mxu1 %v8977_v61  ;;  %3070 = vmatpush1.bf16.msra.mxu0 %v8980_v62  ;;  %v3418_v33 = vmax.f32 %v7934_v15, 0.0  ;;  %v3420_v23 = vmax.f32 %v7966_v16, 0.0  ;;  %v9397_v15 = vld [vmem:[#allocation2 + $0x78] ss:$12 sps:$4 sm:$0xff]  }
 0x1bd   :  { %v7937_v24 = vadd.f32 %v2201_v31, %v9740_v28  ;;  %v7969_v34 = vadd.f32 %v2427_v32, %v9744_v29  ;;  %5619 = vmatprep.subr.bf16.mxu0 %v8985_v10  ;;  %7546 = vmatprep.subr.bf16.mxu1 %v8986_v11  ;;  %v3419_v35 = vmax.f32 %v7935_v21, 0.0  ;;  %v3421_v36 = vmax.f32 %v7967_v22, 0.0 }
 0x1be   :  { %v3430_v37 = vmax.f32 %v7936_v13, 0.0  ;;  %v3432_v38 = vmax.f32 %v7968_v30, 0.0  ;;  %3015 = vmatmul.mubr.bf16.gmra.mrb[80].mxu0 %v9395_v39  ;;  %3241 = vmatmul.mubr.bf16.gmra.mrb[80].mxu1 %v9395_v39 }
 0x1bf   :  { %v3431_v40 = vmax.f32 %v7937_v24, 0.0  ;;  %v3433_v41 = vmax.f32 %v7969_v34, 0.0  ;;  %3024 = vmatprep.mubr.bf16.mxu0 %v9396_v42  ;;  %3250 = vmatprep.mubr.bf16.mxu1 %v9396_v42 }
 0x1c0   :  { %v9770_v43 = vpack.c.bf16 %v3430_v37, %v3418_v33  ;;  %v9772_v44 = vpack.c.bf16 %v3432_v38, %v3420_v23 }
 0x1c1   :  { %v9774_v45 = vpack.c.bf16 %v3431_v40, %v3419_v35  ;;  %v2205_v46 = vpop.f32.mrb[8].mxu0  ;;  %v2431_v47 = vpop.f32.mrb[8].mxu1  ;;  %v9776_v48 = vpack.c.bf16 %v3433_v41, %v3421_v36 }
 0x1c2   :  { %v7938_v49 = vadd.f32 %v2205_v46, %v9734_v14  ;;  %v7970_v51 = vadd.f32 %v2431_v47, %v9737_v27  ;;  %v2207_v52 = vpop.f32.mrb[9].mxu0  ;;  %v2433_v53 = vpop.f32.mrb[9].mxu1 }
 0x1c3   :  { %v7939_v54 = vadd.f32 %v2207_v52, %v9740_v28  ;;  %v7971_v55 = vadd.f32 %v2433_v53, %v9744_v29  ;;  %v2209_v56 = vpop.f32.mrb[10].mxu0  ;;  %v2435_v57 = vpop.f32.mrb[10].mxu1 }
 0x1c4   :  { %v7940_v58 = vadd.f32 %v2209_v56, %v9734_v14  ;;  %v7972_v59 = vadd.f32 %v2435_v57, %v9737_v27  ;;  %v2211_v60 = vpop.f32.mrb[11].mxu0  ;;  %v2437_v61 = vpop.f32.mrb[11].mxu1  ;;  %v3442_v62 = vmax.f32 %v7938_v49, 0.0  ;;  %v3444_v63 = vmax.f32 %v7970_v51, 0.0  ;;  %v9400_v57 = vld [vmem:[#allocation2 + $0xac] ss:$12 sps:$4 sm:$0xff]  }
 0x1c5   :  { %v7941_v0 = vadd.f32 %v2211_v60, %v9740_v28  ;;  %v7973_v1 = vadd.f32 %v2437_v61, %v9744_v29  ;;  %v3443_v7 = vmax.f32 %v7939_v54, 0.0  ;;  %v3445_v9 = vmax.f32 %v7971_v55, 0.0  ;;  %v9399_v54 = vld [vmem:[#allocation2 + $0x90] ss:$12 sps:$4 sm:$0xff]  }
 0x1c6   :  { %v3454_v10 = vmax.f32 %v7940_v58, 0.0  ;;  %v3456_v11 = vmax.f32 %v7972_v59, 0.0  ;;  %3025 = vmatmul.mubr.bf16.gmra.mrb[84].mxu0 %v9397_v15  ;;  %3251 = vmatmul.mubr.bf16.gmra.mrb[84].mxu1 %v9397_v15 }
 0x1c7   :  { %v3455_v16 = vmax.f32 %v7941_v0, 0.0  ;;  %v3457_v17 = vmax.f32 %v7973_v1, 0.0  ;;  %3034 = vmatprep.mubr.bf16.mxu0 %v9398_v18  ;;  %3260 = vmatprep.mubr.bf16.mxu1 %v9398_v18 }
 0x1c8   :  { %v9786_v21 = vpack.c.bf16 %v3454_v10, %v3442_v62  ;;  %v9788_v22 = vpack.c.bf16 %v3456_v11, %v3444_v63 }
 0x1c9   :  { %v9790_v25 = vpack.c.bf16 %v3455_v16, %v3443_v7  ;;  %v2215_v26 = vpop.f32.mrb[12].mxu0  ;;  %v2441_v13 = vpop.f32.mrb[12].mxu1  ;;  %v9792_v30 = vpack.c.bf16 %v3457_v17, %v3445_v9 }
 0x1ca   :  { %v7942_v31 = vadd.f32 %v2215_v26, %v9734_v14  ;;  %v7974_v32 = vadd.f32 %v2441_v13, %v9737_v27  ;;  %v2217_v33 = vpop.f32.mrb[13].mxu0  ;;  %v2443_v23 = vpop.f32.mrb[13].mxu1 }
 0x1cb   :  { %v7943_v24 = vadd.f32 %v2217_v33, %v9740_v28  ;;  %v7975_v34 = vadd.f32 %v2443_v23, %v9744_v29  ;;  %v2219_v35 = vpop.f32.mrb[14].mxu0  ;;  %v2445_v36 = vpop.f32.mrb[14].mxu1 }
 0x1cc   :  { %v7944_v37 = vadd.f32 %v2219_v35, %v9734_v14  ;;  %v7976_v38 = vadd.f32 %v2445_v36, %v9737_v27  ;;  %v2221_v39 = vpop.f32.mrb[15].mxu0  ;;  %v2447_v40 = vpop.f32.mrb[15].mxu1  ;;  %v3466_v41 = vmax.f32 %v7942_v31, 0.0  ;;  %v3468_v42 = vmax.f32 %v7974_v32, 0.0  ;;  %v9401_v35 = vld [vmem:[#allocation2 + $0xa8] ss:$12 sps:$4 sm:$0xff]  }
 0x1cd   :  { %v7945_v46 = vadd.f32 %v2221_v39, %v9740_v28  ;;  %v7977_v47 = vadd.f32 %v2447_v40, %v9744_v29  ;;  %v3467_v49 = vmax.f32 %v7943_v24, 0.0  ;;  %v3469_v51 = vmax.f32 %v7975_v34, 0.0 }
 0x1ce   :  { %v3478_v52 = vmax.f32 %v7944_v37, 0.0  ;;  %v3480_v53 = vmax.f32 %v7976_v38, 0.0  ;;  %3035 = vmatmul.mubr.bf16.gmra.mrb[88].mxu0 %v9399_v54  ;;  %3261 = vmatmul.mubr.bf16.gmra.mrb[88].mxu1 %v9399_v54 }
 0x1cf   :  { %v3479_v55 = vmax.f32 %v7945_v46, 0.0  ;;  %v3481_v56 = vmax.f32 %v7977_v47, 0.0  ;;  %3044 = vmatprep.mubr.bf16.mxu0 %v9400_v57  ;;  %3270 = vmatprep.mubr.bf16.mxu1 %v9400_v57 }
 0x1d0   :  { %v9802_v58 = vpack.c.bf16 %v3478_v52, %v3466_v41  ;;  %v9804_v59 = vpack.c.bf16 %v3480_v53, %v3468_v42 }
 0x1d1   :  { %v9806_v60 = vpack.c.bf16 %v3479_v55, %v3467_v49  ;;  %v2225_v61 = vpop.f32.mrb[16].mxu0  ;;  %v2451_v62 = vpop.f32.mrb[16].mxu1  ;;  %v9808_v63 = vpack.c.bf16 %v3481_v56, %v3469_v51 }
 0x1d2   :  { %v7946_v0 = vadd.f32 %v2225_v61, %v9734_v14  ;;  %v7978_v1 = vadd.f32 %v2451_v62, %v9737_v27  ;;  %v2227_v7 = vpop.f32.mrb[17].mxu0  ;;  %v2453_v9 = vpop.f32.mrb[17].mxu1  ;;  %v8983_v62 = vld [vmem:[#allocation8] ss:$12 sps:$4 sm:$0xff]  }
 0x1d3   :  { %v7947_v10 = vadd.f32 %v2227_v7, %v9740_v28  ;;  %v7979_v11 = vadd.f32 %v2453_v9, %v9744_v29  ;;  %v2229_v15 = vpop.f32.mrb[18].mxu0  ;;  %v2455_v16 = vpop.f32.mrb[18].mxu1 }
 0x1d4   :  { %v7948_v17 = vadd.f32 %v2229_v15, %v9734_v14  ;;  %v7980_v18 = vadd.f32 %v2455_v16, %v9737_v27  ;;  %v2231_v26 = vpop.f32.mrb[19].mxu0  ;;  %v2457_v13 = vpop.f32.mrb[19].mxu1  ;;  %v3490_v33 = vmax.f32 %v7946_v0, 0.0  ;;  %v3492_v23 = vmax.f32 %v7978_v1, 0.0  ;;  %v8987_v0 = vld [vmem:[#allocation8 + $0x8] ss:$12 sps:$4 sm:$0xff]  }
 0x1d5   :  { %v7949_v31 = vadd.f32 %v2231_v26, %v9740_v28  ;;  %v7981_v32 = vadd.f32 %v2457_v13, %v9744_v29  ;;  %v3491_v36 = vmax.f32 %v7947_v10, 0.0  ;;  %v3493_v37 = vmax.f32 %v7979_v11, 0.0  ;;  %v8990_v11 = vld [vmem:[#allocation8 + $0x1c] ss:$12 sps:$4 sm:$0xff]  }
 0x1d6   :  { %v3502_v24 = vmax.f32 %v7948_v17, 0.0  ;;  %v3504_v34 = vmax.f32 %v7980_v18, 0.0  ;;  %3045 = vmatmul.mubr.bf16.gmra.mrb[92].mxu0 %v9401_v35  ;;  %3271 = vmatmul.mubr.bf16.gmra.mrb[92].mxu1 %v9401_v35  ;;  %v8994_v17 = vld [vmem:[#allocation8 + $0xe0] ss:$12 sps:$4 sm:$0xff]  }
 0x1d7   :  { %v3503_v38 = vmax.f32 %v7949_v31, 0.0  ;;  %v3505_v39 = vmax.f32 %v7981_v32, 0.0  ;;  %3087 = vmatprep.mubr.bf16.mxu0 %v9560_v50  ;;  %3313 = vmatprep.mubr.bf16.mxu1 %v9560_v50  ;;  %v9402_v32 = vld [vmem:[#allocation2 + $0x8] ss:$12 sps:$4 sm:$0xff]  }
 0x1d8   :  { %v9820_v40 = vpack.c.bf16 %v3502_v24, %v3490_v33  ;;  %v9822_v41 = vpack.c.bf16 %v3504_v34, %v3492_v23  ;;  %v8988_v33 = vld [vmem:[#allocation8 + $0x18] ss:$12 sps:$4 sm:$0xff]  }
 0x1d9   :  { %v9824_v42 = vpack.c.bf16 %v3503_v38, %v3491_v36  ;;  %v2235_v46 = vpop.f32.mrb[20].mxu0  ;;  %v2461_v47 = vpop.f32.mrb[20].mxu1  ;;  %v9826_v49 = vpack.c.bf16 %v3505_v39, %v3493_v37  ;;  %v8995_v36 = vld [vmem:[#allocation8 + $0x20] ss:$12 sps:$4 sm:$0xff]   ;;  %v9002_v39 = vld [vmem:[#allocation8 + $0xf8] ss:$12 sps:$4 sm:$0xff]  }
 0x1da   :  { %v7950_v51 = vadd.f32 %v2235_v46, %v9734_v14  ;;  %v7982_v52 = vadd.f32 %v2461_v47, %v9737_v27  ;;  %v2237_v53 = vpop.f32.mrb[21].mxu0  ;;  %v2463_v54 = vpop.f32.mrb[21].mxu1  ;;  %v8993_v38 = vld [vmem:[#allocation8 + $0x34] ss:$12 sps:$4 sm:$0xff]  }
 0x1db   :  { %v7951_v55 = vadd.f32 %v2237_v53, %v9740_v28  ;;  %v7983_v56 = vadd.f32 %v2463_v54, %v9744_v29  ;;  %v2239_v57 = vpop.f32.mrb[22].mxu0  ;;  %v2465_v61 = vpop.f32.mrb[22].mxu1 }
 0x1dc   :  { %v7952_v1 = vadd.f32 %v2239_v57, %v9734_v14  ;;  %v7984_v7 = vadd.f32 %v2465_v61, %v9737_v27  ;;  %v2241_v9 = vpop.f32.mrb[23].mxu0  ;;  %v2467_v10 = vpop.f32.mrb[23].mxu1  ;;  %v3514_v18 = vmax.f32 %v7950_v51, 0.0  ;;  %v3516_v26 = vmax.f32 %v7982_v52, 0.0 }
 0x1dd   :  { %v7953_v15 = vadd.f32 %v2241_v9, %v9740_v28  ;;  %v7985_v16 = vadd.f32 %v2467_v10, %v9744_v29  ;;  %v3515_v23 = vmax.f32 %v7951_v55, 0.0  ;;  %v3517_v24 = vmax.f32 %v7983_v56, 0.0 }
 0x1de   :  { %v3526_v13 = vmax.f32 %v7952_v1, 0.0  ;;  %v3528_v31 = vmax.f32 %v7984_v7, 0.0  ;;  %3088 = vmatmul.mubr.bf16.vlgmr.msra.gmra.mrb[64].mxu0 %v9402_v32  ;;  %3314 = vmatmul.mubr.bf16.vlgmr.msra.gmra.mrb[64].mxu1 %v9402_v32  ;;  %v8991_v7 = vld [vmem:[#allocation8 + $0x30] ss:$12 sps:$4 sm:$0xff]  }
 0x1df   :  { %v3527_v34 = vmax.f32 %v7953_v15, 0.0  ;;  %v3529_v35 = vmax.f32 %v7985_v16, 0.0  ;;  %5620 = vmatpush1.bf16.msra.mxu0 %v8983_v62  ;;  %7547 = vmatpush3.bf16.msra.mxu1 %v8987_v0  ;;  %v8998_v16 = vld [vmem:[#allocation8 + $0x4c] ss:$12 sps:$4 sm:$0xff]  }
 0x1e0   :  { %v9836_v37 = vpack.c.bf16 %v3526_v13, %v3514_v18  ;;  %5621 = vmatprep.subr.bf16.mxu0 %v8990_v11  ;;  %3097 = vmatprep.mubr.bf16.mxu0 %v9560_v50  ;;  %v9839_v46 = vpack.c.bf16 %v3528_v31, %v3516_v26  ;;  %v9003_v26 = vld [vmem:[#allocation8 + $0x38] ss:$12 sps:$4 sm:$0xff]  }
 0x1e1   :  { %v9841_v47 = vpack.c.bf16 %v3527_v34, %v3515_v23  ;;  %v2245_v51 = vpop.f32.mrb[24].mxu0  ;;  %v2471_v52 = vpop.f32.mrb[24].mxu1  ;;  %3323 = vmatprep.mubr.bf16.mxu1 %v9560_v50  ;;  %7548 = vmatprep.subr.bf16.mxu1 %v8994_v17  ;;  %v9844_v53 = vpack.c.bf16 %v3529_v35, %v3517_v24  ;;  %v9403_v23 = vld [vmem:[#allocation2 + $0x20] ss:$12 sps:$4 sm:$0xff]   ;;  %v9010_v24 = vld [vmem:[#allocation8 + $0x110] ss:$12 sps:$4 sm:$0xff]  }
 0x1e2   :  { %v7954_v54 = vadd.f32 %v2245_v51, %v9734_v14  ;;  %v7986_v55 = vadd.f32 %v2471_v52, %v9737_v27  ;;  %v2247_v56 = vpop.f32.mrb[25].mxu0  ;;  %v2473_v57 = vpop.f32.mrb[25].mxu1  ;;  %v9001_v52 = vld [vmem:[#allocation8 + $0x64] ss:$12 sps:$4 sm:$0xff]  }
 0x1e3   :  { %v7955_v61 = vadd.f32 %v2247_v56, %v9740_v28  ;;  %v7987_v62 = vadd.f32 %v2473_v57, %v9744_v29  ;;  %v2249_v0 = vpop.f32.mrb[26].mxu0  ;;  %v2475_v1 = vpop.f32.mrb[26].mxu1  ;;  %5622 = vmatpush1.bf16.msra.mxu0 %v8988_v33  ;;  %7549 = vmatpush3.bf16.msra.mxu1 %v8995_v36 }
 0x1e4   :  { %v7956_v9 = vadd.f32 %v2249_v0, %v9734_v14  ;;  %v7988_v10 = vadd.f32 %v2475_v1, %v9737_v27  ;;  %v2251_v11 = vpop.f32.mrb[27].mxu0  ;;  %v2477_v15 = vpop.f32.mrb[27].mxu1  ;;  %5623 = vmatprep.subr.bf16.mxu0 %v8993_v38  ;;  %7550 = vmatprep.subr.bf16.mxu1 %v9002_v39  ;;  %v3538_v13 = vmax.f32 %v7954_v54, 0.0  ;;  %v3540_v31 = vmax.f32 %v7986_v55, 0.0  ;;  %v8996_v38 = vld [vmem:[#allocation8 + $0x48] ss:$12 sps:$4 sm:$0xff]  }
 0x1e5   :  { %v7957_v17 = vadd.f32 %v2251_v11, %v9740_v28  ;;  %v7989_v18 = vadd.f32 %v2477_v15, %v9744_v29  ;;  %v3539_v34 = vmax.f32 %v7955_v61, 0.0  ;;  %v3541_v35 = vmax.f32 %v7987_v62, 0.0  ;;  %v9011_v61 = vld [vmem:[#allocation8 + $0x50] ss:$12 sps:$4 sm:$0xff]  }
 0x1e6   :  { %v3550_v32 = vmax.f32 %v7956_v9, 0.0  ;;  %v3552_v33 = vmax.f32 %v7988_v10, 0.0  ;;  %3098 = vmatmul.mubr.bf16.gmra.mrb[68].mxu0 %v9403_v23  ;;  %3324 = vmatmul.mubr.bf16.gmra.mrb[68].mxu1 %v9403_v23 }
 0x1e7   :  { %v3551_v36 = vmax.f32 %v7957_v17, 0.0  ;;  %v3553_v51 = vmax.f32 %v7989_v18, 0.0  ;;  %5624 = vmatpush1.bf16.msra.mxu0 %v8991_v7  ;;  %3107 = vmatprep.mubr.bf16.mxu0 %v9560_v50  ;;  %v8999_v17 = vld [vmem:[#allocation8 + $0x60] ss:$12 sps:$4 sm:$0xff]  }
 0x1e8   :  { %v9855_v39 = vpack.c.bf16 %v3550_v32, %v3538_v13  ;;  %5625 = vmatprep.subr.bf16.mxu0 %v8998_v16  ;;  %3333 = vmatprep.mubr.bf16.mxu1 %v9560_v50  ;;  %v9858_v54 = vpack.c.bf16 %v3552_v33, %v3540_v31  ;;  %v9006_v32 = vld [vmem:[#allocation8 + $0x7c] ss:$12 sps:$4 sm:$0xff]  }
 0x1e9   :  { %v9860_v55 = vpack.c.bf16 %v3551_v36, %v3539_v34  ;;  %v2255_v56 = vpop.f32.mrb[28].mxu0  ;;  %v2481_v57 = vpop.f32.mrb[28].mxu1  ;;  %7551 = vmatpush3.bf16.msra.mxu1 %v9003_v26  ;;  %v9862_v62 = vpack.c.bf16 %v3553_v51, %v3541_v35  ;;  %v9018_v34 = vld [vmem:[#allocation8 + $0x128] ss:$12 sps:$4 sm:$0xff]  }
 0x1ea   :  { %v7958_v0 = vadd.f32 %v2255_v56, %v9734_v14  ;;  %v7990_v1 = vadd.f32 %v2481_v57, %v9737_v27  ;;  %v2257_v7 = vpop.f32.mrb[29].mxu0  ;;  %v2483_v9 = vpop.f32.mrb[29].mxu1  ;;  %7552 = vmatprep.subr.bf16.mxu1 %v9010_v24  ;;  %v9004_v24 = vld [vmem:[#allocation8 + $0x78] ss:$12 sps:$4 sm:$0xff]  }
 0x1eb   :  { %v7959_v10 = vadd.f32 %v2257_v7, %v9740_v28  ;;  %v7991_v11 = vadd.f32 %v2483_v9, %v9744_v29  ;;  %v2259_v15 = vpop.f32.mrb[30].mxu0  ;;  %v2485_v16 = vpop.f32.mrb[30].mxu1  ;;  %5626 = vmatpush1.bf16.msra.mxu0 %v8996_v38  ;;  %v9404_v56 = vld [vmem:[#allocation2 + $0x38] ss:$12 sps:$4 sm:$0xff]  }
 0x1ec   :  { %v7960_v18 = vadd.f32 %v2259_v15, %v9734_v14  ;;  %v7992_v26 = vadd.f32 %v2485_v16, %v9737_v27  ;;  %v2261_v13 = vpop.f32.mrb[31].mxu0  ;;  %v2487_v31 = vpop.f32.mrb[31].mxu1  ;;  %5627 = vmatprep.subr.bf16.mxu0 %v9001_v52  ;;  %v3562_v35 = vmax.f32 %v7958_v0, 0.0  ;;  %v3564_v36 = vmax.f32 %v7990_v1, 0.0  ;;  %v9019_v14 = vld [vmem:[#allocation8 + $0x68] ss:$12 sps:$4 sm:$0xff]  }
 0x1ed   :  { %v7961_v33 = vadd.f32 %v2261_v13, %v9740_v28  ;;  %v7993_v23 = vadd.f32 %v2487_v31, %v9744_v29  ;;  %7553 = vmatpush3.bf16.msra.mxu1 %v9011_v61  ;;  %v3563_v27 = vmax.f32 %v7959_v10, 0.0  ;;  %v3565_v57 = vmax.f32 %v7991_v11, 0.0  ;;  %v9026_v28 = vld [vmem:[#allocation8 + $0x140] ss:$12 sps:$4 sm:$0xff]   ;;  %v9007_v10 = vld [vmem:[#allocation8 + $0x90] ss:$12 sps:$4 sm:$0xff]  }
 0x1ee   :  { %v3574_v51 = vmax.f32 %v7960_v18, 0.0  ;;  %v3576_v38 = vmax.f32 %v7992_v26, 0.0  ;;  %3108 = vmatmul.mubr.bf16.gmra.mrb[72].mxu0 %v9404_v56  ;;  %3334 = vmatmul.mubr.bf16.gmra.mrb[72].mxu1 %v9404_v56  ;;  %v9009_v61 = vld [vmem:[#allocation8 + $0x94] ss:$12 sps:$4 sm:$0xff]   ;;  %v9014_v11 = vld [vmem:[#allocation8 + $0xac] ss:$12 sps:$4 sm:$0xff]  }
 0x1ef   :  { %v3575_v7 = vmax.f32 %v7961_v33, 0.0  ;;  %v3577_v52 = vmax.f32 %v7993_v23, 0.0  ;;  %5628 = vmatpush1.bf16.msra.mxu0 %v8999_v17  ;;  %3117 = vmatprep.mubr.bf16.mxu0 %v9560_v50  ;;  %v9027_v15 = vld [vmem:[#allocation8 + $0x80] ss:$12 sps:$4 sm:$0xff]   ;;  %v9405_v16 = vld [vmem:[#allocation2 + $0x50] ss:$12 sps:$4 sm:$0xff]  }
 0x1f0   :  { %v9873_v29 = vpack.c.bf16 %v3574_v51, %v3562_v35  ;;  %5629 = vmatprep.subr.bf16.mxu0 %v9006_v32  ;;  %3343 = vmatprep.mubr.bf16.mxu1 %v9560_v50  ;;  %v9876_v0 = vpack.c.bf16 %v3576_v38, %v3564_v36  ;;  %v9034_v17 = vld [vmem:[#allocation8 + $0x158] ss:$12 sps:$4 sm:$0xff]   ;;  %v9012_v18 = vld [vmem:[#allocation8 + $0xa8] ss:$12 sps:$4 sm:$0xff]   ;;  %v9015_v31 = vld [vmem:[#allocation8 + $0xc0] ss:$12 sps:$4 sm:$0xff]  }
 0x1f1   :  { %v9878_v1 = vpack.c.bf16 %v3575_v7, %v3563_v27  ;;  %7554 = vmatprep.subr.bf16.mxu1 %v9018_v34  ;;  %v9880_v9 = vpack.c.bf16 %v3577_v52, %v3565_v57  ;;  %v9017_v26 = vld [vmem:[#allocation8 + $0xc4] ss:$12 sps:$4 sm:$0xff]   ;;  %v9022_v32 = vld [vmem:[#allocation8 + $0xdc] ss:$12 sps:$4 sm:$0xff]   ;;  %v9025_v36 = vld [vmem:[#allocation8 + $0xf4] ss:$12 sps:$4 sm:$0xff]  }
 0x1f2   :  { %7555 = vmatpush3.bf16.msra.mxu1 %v9019_v14  ;;  %v9035_v13 = vld [vmem:[#allocation8 + $0x98] ss:$12 sps:$4 sm:$0xff]   ;;  %v9042_v33 = vld [vmem:[#allocation8 + $0x170] ss:$12 sps:$4 sm:$0xff]   ;;  %v9050_v35 = vld [vmem:[#allocation8 + $0x248] ss:$12 sps:$4 sm:$0xff]  }
 0x1f3   :  { %5630 = vmatpush1.bf16.msra.mxu0 %v9004_v24  ;;  %7556 = vmatprep.subr.bf16.mxu1 %v9026_v28  ;;  %v9406_v23 = vld [vmem:[#allocation2 + $0x68] ss:$12 sps:$4 sm:$0xff]   ;;  %v9020_v34 = vld [vmem:[#allocation8 + $0xd8] ss:$12 sps:$4 sm:$0xff]   ;;  %v9407_v56 = vld [vmem:[#allocation2 + $0x80] ss:$12 sps:$4 sm:$0xff]  }
 0x1f4   :  { %5631 = vmatprep.subr.bf16.mxu0 %v9009_v61  ;;  %v9043_v24 = vld [vmem:[#allocation8 + $0xb0] ss:$12 sps:$4 sm:$0xff]   ;;  %v9030_v38 = vld [vmem:[#allocation8 + $0x10c] ss:$12 sps:$4 sm:$0xff]   ;;  %v9028_v14 = vld [vmem:[#allocation8 + $0x108] ss:$12 sps:$4 sm:$0xff]  }
 0x1f5   :  { %v9023_v51 = vld [vmem:[#allocation8 + $0xf0] ss:$12 sps:$4 sm:$0xff]   ;;  %v9031_v57 = vld [vmem:[#allocation8 + $0x120] ss:$12 sps:$4 sm:$0xff]   ;;  %v9036_v28 = vld [vmem:[#allocation8 + $0x138] ss:$12 sps:$4 sm:$0xff]  }
 0x1f6   :  { %3118 = vmatmul.mubr.bf16.gmra.mrb[76].mxu0 %v9405_v16  ;;  %3344 = vmatmul.mubr.bf16.gmra.mrb[76].mxu1 %v9405_v16  ;;  %v9033_v27 = vld [vmem:[#allocation8 + $0x124] ss:$12 sps:$4 sm:$0xff]   ;;  %v9038_v7 = vld [vmem:[#allocation8 + $0x13c] ss:$12 sps:$4 sm:$0xff]   ;;  %v9408_v52 = vld [vmem:[#allocation2 + $0x98] ss:$12 sps:$4 sm:$0xff]  }
 0x1f7   :  { %5632 = vmatpush1.bf16.msra.mxu0 %v9007_v10  ;;  %3127 = vmatprep.mubr.bf16.mxu0 %v9560_v50  ;;  %v9041_v61 = vld [vmem:[#allocation8 + $0x154] ss:$12 sps:$4 sm:$0xff]   ;;  %v9039_v10 = vld [vmem:[#allocation8 + $0x150] ss:$12 sps:$4 sm:$0xff]  }
 0x1f8   :  { %5633 = vmatprep.subr.bf16.mxu0 %v9014_v11  ;;  %3353 = vmatprep.mubr.bf16.mxu1 %v9560_v50  ;;  %v9046_v11 = vld [vmem:[#allocation8 + $0x16c] ss:$12 sps:$4 sm:$0xff]   ;;  %v9044_v16 = vld [vmem:[#allocation8 + $0x168] ss:$12 sps:$4 sm:$0xff]  }
 0x1f9   :  { %7557 = vmatpush3.bf16.msra.mxu1 %v9027_v15  ;;  %v9409_v15 = vld [vmem:[#allocation2 + $0xb0] ss:$12 sps:$4 sm:$0xff]  }
 0x1fa   :  { %7558 = vmatprep.subr.bf16.mxu1 %v9034_v17  ;;  %v9049_v17 = vld [vmem:[#allocation8 + $0x184] ss:$12 sps:$4 sm:$0xff]  }
 0x1fb   :  { %5634 = vmatpush1.bf16.msra.mxu0 %v9012_v18  ;;  %v9047_v18 = vld [vmem:[#allocation8 + $0x180] ss:$12 sps:$4 sm:$0xff]  }
 0x1fc   :  { %5635 = vmatprep.subr.bf16.mxu0 %v9017_v26  ;;  %v9054_v26 = vld [vmem:[#allocation8 + $0x19c] ss:$12 sps:$4 sm:$0xff]  }
 0x1fd   :  { %7559 = vmatpush3.bf16.msra.mxu1 %v9035_v13  ;;  %v9058_v13 = vld [vmem:[#allocation8 + $0x260] ss:$12 sps:$4 sm:$0xff]  }
 0x1fe   :  { %3128 = vmatmul.mubr.bf16.gmra.mrb[80].mxu0 %v9406_v23  ;;  %3354 = vmatmul.mubr.bf16.gmra.mrb[80].mxu1 %v9406_v23  ;;  %v9055_v23 = vld [vmem:[#allocation8 + $0x1b0] ss:$12 sps:$4 sm:$0xff]  }
 0x1ff   :  { %5636 = vmatpush1.bf16.msra.mxu0 %v9015_v31  ;;  %3137 = vmatprep.mubr.bf16.mxu0 %v9560_v50  ;;  %v9052_v31 = vld [vmem:[#allocation8 + $0x198] ss:$12 sps:$4 sm:$0xff]  }
 0x200   :  { %5637 = vmatprep.subr.bf16.mxu0 %v9022_v32  ;;  %3363 = vmatprep.mubr.bf16.mxu1 %v9560_v50  ;;  %v9059_v32 = vld [vmem:[#allocation8 + $0x1a0] ss:$12 sps:$4 sm:$0xff]  }
 0x201   :  { %7560 = vmatprep.subr.bf16.mxu1 %v9042_v33  ;;  %v9066_v33 = vld [vmem:[#allocation8 + $0x278] ss:$12 sps:$4 sm:$0xff]  }
 0x202   :  { %7561 = vmatpush3.bf16.msra.mxu1 %v9043_v24  ;;  %v9062_v24 = vld [vmem:[#allocation8 + $0x1cc] ss:$12 sps:$4 sm:$0xff]  }
 0x203   :  { %5638 = vmatpush1.bf16.msra.mxu0 %v9020_v34  ;;  %7610 = vmatprep.subr.bf16.mxu1 %v9050_v35  ;;  %v9067_v34 = vld [vmem:[#allocation8 + $0x1b8] ss:$12 sps:$4 sm:$0xff]  }
 0x204   :  { %5639 = vmatprep.subr.bf16.mxu0 %v9025_v36  ;;  %v9065_v35 = vld [vmem:[#allocation8 + $0x1e4] ss:$12 sps:$4 sm:$0xff]  }
 0x205   :  { %v9075_v36 = vld [vmem:[#allocation8 + $0x1d0] ss:$12 sps:$4 sm:$0xff]  }
 0x206   :  { %3138 = vmatmul.mubr.bf16.gmra.mrb[84].mxu0 %v9407_v56  ;;  %3364 = vmatmul.mubr.bf16.gmra.mrb[84].mxu1 %v9407_v56  ;;  %v9063_v56 = vld [vmem:[#allocation8 + $0x1e0] ss:$12 sps:$4 sm:$0xff]  }
 0x207   :  { %5640 = vmatpush1.bf16.msra.mxu0 %v9023_v51  ;;  %3147 = vmatprep.mubr.bf16.mxu0 %v9560_v50  ;;  %v428_v51 = vsub.s32 4, %v9721_v8 }
 0x208   :  { %5641 = vmatprep.subr.bf16.mxu0 %v9030_v38  ;;  %3373 = vmatprep.mubr.bf16.mxu1 %v9560_v50  ;;  %v436_v38 = vsub.s32 6, %v9721_v8 }
 0x20b   :  { %5642 = vmatpush1.bf16.msra.mxu0 %v9028_v14  ;;  %v440_v14 = vsub.s32 7, %v9721_v8 }
 0x20c   :  { %5643 = vmatprep.subr.bf16.mxu0 %v9033_v27  ;;  %v9070_v27 = vld [vmem:[#allocation8 + $0x1fc] ss:$12 sps:$4 sm:$0xff]  }
 0x20e   :  { %3148 = vmatmul.mubr.bf16.gmra.mrb[88].mxu0 %v9408_v52  ;;  %3374 = vmatmul.mubr.bf16.gmra.mrb[88].mxu1 %v9408_v52 }
 0x20f   :  { %5644 = vmatpush1.bf16.msra.mxu0 %v9031_v57  ;;  %3157 = vmatprep.mubr.bf16.mxu0 %v9560_v50  ;;  %v9082_v57 = vld [vmem:[#allocation8 + $0x2a8] ss:$12 sps:$4 sm:$0xff]  }
 0x210   :  { %5645 = vmatprep.subr.bf16.mxu0 %v9038_v7  ;;  %3383 = vmatprep.mubr.bf16.mxu1 %v9560_v50  ;;  %v9051_v50 = vld [vmem:[#allocation8 + $0x188] ss:$12 sps:$4 sm:$0xff]  }
 0x213   :  { %5646 = vmatpush1.bf16.msra.mxu0 %v9036_v28  ;;  %v9083_v28 = vld [vmem:[#allocation8 + $0x1e8] ss:$12 sps:$4 sm:$0xff]  }
 0x214   :  { %5647 = vmatprep.subr.bf16.mxu0 %v9041_v61 }
 0x216   :  { %3158 = vmatmul.mubr.bf16.gmra.mrb[92].mxu0 %v9409_v15  ;;  %3384 = vmatmul.mubr.bf16.gmra.mrb[92].mxu1 %v9409_v15  ;;  %v9090_v15 = vld [vmem:[#allocation8 + $0x2c0] ss:$12 sps:$4 sm:$0xff]  }
 0x217   :  { %5648 = vmatpush1.bf16.msra.mxu0 %v9039_v10  ;;  %5651 = vmatprep.mubr.bf16.mxu0 %v9758_v5 }
 0x218   :  { %6329 = vmatprep.mubr.bf16.mxu1 %v9758_v5  ;;  %5649 = vmatprep.subr.bf16.mxu0 %v9046_v11  ;;  %v9057_v5 = vld [vmem:[#allocation8 + $0x1b4] ss:$12 sps:$4 sm:$0xff]   ;;  %v9068_v11 = vld [vmem:[#allocation8 + $0x1f8] ss:$12 sps:$4 sm:$0xff]  }
 0x21b   :  { %5650 = vmatpush1.bf16.msra.mxu0 %v9044_v16  ;;  %v9073_v16 = vld [vmem:[#allocation8 + $0x214] ss:$12 sps:$4 sm:$0xff]  }
 0x21c   :  { %5732 = vmatprep.subr.bf16.mxu0 %v9049_v17 }
 0x21e   :  { %5652 = vmatmul.mubr.bf16.vlgmr.msra.gmra.mrb[96].mxu0 %v9754_v2  ;;  %6330 = vmatmul.mubr.bf16.vlgmr.msra.gmra.mrb[96].mxu1 %v9754_v2  ;;  %v9074_v2 = vld [vmem:[#allocation8 + $0x290] ss:$12 sps:$4 sm:$0xff]  }
 0x21f   :  { %5661 = vmatprep.mubr.bf16.mxu0 %v9774_v45  ;;  %5733 = vmatpush1.bf16.msra.mxu0 %v9047_v18 }
 0x220   :  { %6337 = vmatprep.mubr.bf16.mxu1 %v9774_v45  ;;  %7611 = vmatpush3.bf16.msra.mxu1 %v9051_v50  ;;  %v9060_v45 = vld [vmem:[#allocation8 + $0x1c8] ss:$12 sps:$4 sm:$0xff]  }
 0x221   :  { %5734 = vmatprep.subr.bf16.mxu0 %v9054_v26  ;;  %7612 = vmatprep.subr.bf16.mxu1 %v9058_v13 }
 0x223   :  { %5735 = vmatpush1.bf16.msra.mxu0 %v9052_v31 }
 0x224   :  { %5736 = vmatprep.subr.bf16.mxu0 %v9057_v5  ;;  %7613 = vmatpush3.bf16.msra.mxu1 %v9059_v32 }
 0x225   :  { %7614 = vmatprep.subr.bf16.mxu1 %v9066_v33 }
 0x226   :  { %5662 = vmatmul.mubr.bf16.gmra.mrb[100].mxu0 %v9770_v43  ;;  %6338 = vmatmul.mubr.bf16.gmra.mrb[100].mxu1 %v9770_v43  ;;  %v432_v43 = vsub.s32 5, %v9721_v8 }
 0x227   :  { %5671 = vmatprep.mubr.bf16.mxu0 %v9790_v25  ;;  %5737 = vmatpush1.bf16.msra.mxu0 %v9055_v23 }
 0x228   :  { %6345 = vmatprep.mubr.bf16.mxu1 %v9790_v25  ;;  %5738 = vmatprep.subr.bf16.mxu0 %v9062_v24  ;;  %v9410_v25 = vld [vmem:[#allocation7] sm:$0xff] }
 0x229   :  { %7615 = vmatpush3.bf16.msra.mxu1 %v9067_v34  ;;  %v9906_v7 = vrot.slane %v9410_v25, %v428_v51  ;;  %v9908_v52 = vrot.slane %v9410_v25, %v436_v38  ;;  %v9911_v61 = vrot.slane %v9410_v25, %v432_v43  ;;  %v9913_v10 = vrot.slane %v9410_v25, %v440_v14  ;;  %v9091_v51 = vld [vmem:[#allocation8 + $0x200] ss:$12 sps:$4 sm:$0xff]  }
 0x22a   :  { %7616 = vmatprep.subr.bf16.mxu1 %v9074_v2 }
 0x22b   :  { %5739 = vmatpush1.bf16.msra.mxu0 %v9060_v45  ;;  %v9078_v45 = vld [vmem:[#allocation8 + $0x22c] ss:$12 sps:$4 sm:$0xff]  }
 0x22c   :  { %5740 = vmatprep.subr.bf16.mxu0 %v9065_v35 }
 0x22d   :  { %7617 = vmatpush3.bf16.msra.mxu1 %v9075_v36 }
 0x22e   :  { %5672 = vmatmul.mubr.bf16.gmra.mrb[104].mxu0 %v9786_v21  ;;  %6346 = vmatmul.mubr.bf16.gmra.mrb[104].mxu1 %v9786_v21 }
 0x22f   :  { %5681 = vmatprep.mubr.bf16.mxu0 %v9806_v60  ;;  %5741 = vmatpush1.bf16.msra.mxu0 %v9063_v56 }
 0x230   :  { %6353 = vmatprep.mubr.bf16.mxu1 %v9806_v60  ;;  %5742 = vmatprep.subr.bf16.mxu0 %v9070_v27  ;;  %v9071_v60 = vld [vmem:[#allocation8 + $0x210] ss:$12 sps:$4 sm:$0xff]   ;;  %v9098_v27 = vld [vmem:[#allocation8 + $0x2d8] ss:$12 sps:$4 sm:$0xff]  }
 0x231   :  { %v2637_v21 = vpop.f32.mrb[32].mxu0  ;;  %v2863_v17 = vpop.f32.mrb[32].mxu1  ;;  %7618 = vmatprep.subr.bf16.mxu1 %v9082_v57 }
 0x232   :  { %v7994_v18 = vadd.f32 %v2637_v21, %v9906_v7  ;;  %v8026_v50 = vadd.f32 %v2863_v17, %v9908_v52  ;;  %v2639_v26 = vpop.f32.mrb[33].mxu0  ;;  %v2865_v13 = vpop.f32.mrb[33].mxu1  ;;  %7619 = vmatpush3.bf16.msra.mxu1 %v9083_v28  ;;  %v9081_v17 = vld [vmem:[#allocation8 + $0x244] ss:$12 sps:$4 sm:$0xff]  }
 0x233   :  { %v7995_v31 = vadd.f32 %v2639_v26, %v9911_v61  ;;  %v8027_v5 = vadd.f32 %v2865_v13, %v9913_v10  ;;  %v2641_v32 = vpop.f32.mrb[34].mxu0  ;;  %v2867_v33 = vpop.f32.mrb[34].mxu1  ;;  %5743 = vmatpush1.bf16.msra.mxu0 %v9068_v11  ;;  %7620 = vmatprep.subr.bf16.mxu1 %v9090_v15  ;;  %v9076_v15 = vld [vmem:[#allocation8 + $0x228] ss:$12 sps:$4 sm:$0xff]   ;;  %v9099_v13 = vld [vmem:[#allocation8 + $0x218] ss:$12 sps:$4 sm:$0xff]  }
 0x234   :  { %v7996_v23 = vadd.f32 %v2641_v32, %v9906_v7  ;;  %v8028_v24 = vadd.f32 %v2867_v33, %v9908_v52  ;;  %v2643_v34 = vpop.f32.mrb[35].mxu0  ;;  %v2869_v2 = vpop.f32.mrb[35].mxu1  ;;  %5744 = vmatprep.subr.bf16.mxu0 %v9073_v16  ;;  %v3398_v38 = vmax.f32 %v7994_v18, 0.0  ;;  %v3400_v56 = vmax.f32 %v8026_v50, 0.0 }
 0x235   :  { %v7997_v35 = vadd.f32 %v2643_v34, %v9911_v61  ;;  %v8029_v36 = vadd.f32 %v2869_v2, %v9913_v10  ;;  %v3399_v57 = vmax.f32 %v7995_v31, 0.0  ;;  %v3401_v25 = vmax.f32 %v8027_v5, 0.0  ;;  %v9079_v34 = vld [vmem:[#allocation8 + $0x240] ss:$12 sps:$4 sm:$0xff]  }
 0x236   :  { %v3410_v43 = vmax.f32 %v7996_v23, 0.0  ;;  %v3412_v14 = vmax.f32 %v8028_v24, 0.0  ;;  %5682 = vmatmul.mubr.bf16.gmra.mrb[108].mxu0 %v9802_v58  ;;  %6354 = vmatmul.mubr.bf16.gmra.mrb[108].mxu1 %v9802_v58 }
 0x237   :  { %v3411_v28 = vmax.f32 %v7997_v35, 0.0  ;;  %v3413_v11 = vmax.f32 %v8029_v36, 0.0  ;;  %5691 = vmatprep.mubr.bf16.mxu0 %v9824_v42  ;;  %5745 = vmatpush1.bf16.msra.mxu0 %v9071_v60 }
 0x238   :  { %v9927_v16 = vpack.c.bf16 %v3410_v43, %v3398_v38  ;;  %v9929_v21 = vpack.c.bf16 %v3412_v14, %v3400_v56  ;;  %6361 = vmatprep.mubr.bf16.mxu1 %v9824_v42  ;;  %5746 = vmatprep.subr.bf16.mxu0 %v9078_v45  ;;  %v9084_v43 = vld [vmem:[#allocation8 + $0x258] ss:$12 sps:$4 sm:$0xff]   ;;  %v9106_v14 = vld [vmem:[#allocation8 + $0x2f0] ss:$12 sps:$4 sm:$0xff]  }
 0x239   :  { %v9932_v18 = vpack.c.bf16 %v3411_v28, %v3399_v57  ;;  %v9934_v58 = vpack.c.bf16 %v3413_v11, %v3401_v25  ;;  %v2647_v50 = vpop.f32.mrb[36].mxu0  ;;  %v2873_v26 = vpop.f32.mrb[36].mxu1  ;;  %7621 = vmatpush3.bf16.msra.mxu1 %v9091_v51  ;;  %v9086_v51 = vld [vmem:[#allocation8 + $0x25c] ss:$12 sps:$4 sm:$0xff]  }
 0x23a   :  { %v7998_v31 = vadd.f32 %v2647_v50, %v9906_v7  ;;  %v8030_v5 = vadd.f32 %v2873_v26, %v9908_v52  ;;  %v2649_v32 = vpop.f32.mrb[37].mxu0  ;;  %v2875_v33 = vpop.f32.mrb[37].mxu1  ;;  %7622 = vmatprep.subr.bf16.mxu1 %v9098_v27  ;;  %v9107_v11 = vld [vmem:[#allocation8 + $0x230] ss:$12 sps:$4 sm:$0xff]  }
 0x23b   :  { %v7999_v60 = vadd.f32 %v2649_v32, %v9911_v61  ;;  %v8031_v42 = vadd.f32 %v2875_v33, %v9913_v10  ;;  %v2651_v23 = vpop.f32.mrb[38].mxu0  ;;  %v2877_v24 = vpop.f32.mrb[38].mxu1  ;;  %5747 = vmatpush1.bf16.msra.mxu0 %v9076_v15  ;;  %v9114_v32 = vld [vmem:[#allocation8 + $0x3c8] ss:$12 sps:$4 sm:$0xff]  }
 0x23c   :  { %v8000_v2 = vadd.f32 %v2651_v23, %v9906_v7  ;;  %v8032_v45 = vadd.f32 %v2877_v24, %v9908_v52  ;;  %v2653_v35 = vpop.f32.mrb[39].mxu0  ;;  %v2879_v36 = vpop.f32.mrb[39].mxu1  ;;  %5748 = vmatprep.subr.bf16.mxu0 %v9081_v17  ;;  %v3422_v27 = vmax.f32 %v7998_v31, 0.0  ;;  %v3424_v57 = vmax.f32 %v8030_v5, 0.0  ;;  %v9089_v31 = vld [vmem:[#allocation8 + $0x274] ss:$12 sps:$4 sm:$0xff]  }
 0x23d   :  { %v8001_v38 = vadd.f32 %v2653_v35, %v9911_v61  ;;  %v8033_v56 = vadd.f32 %v2879_v36, %v9913_v10  ;;  %7623 = vmatpush3.bf16.msra.mxu1 %v9099_v13  ;;  %v3423_v15 = vmax.f32 %v7999_v60, 0.0  ;;  %v3425_v50 = vmax.f32 %v8031_v42, 0.0 }
 0x23e   :  { %v3434_v25 = vmax.f32 %v8000_v2, 0.0  ;;  %v3436_v28 = vmax.f32 %v8032_v45, 0.0  ;;  %5692 = vmatmul.mubr.bf16.gmra.mrb[112].mxu0 %v9820_v40  ;;  %6362 = vmatmul.mubr.bf16.gmra.mrb[112].mxu1 %v9820_v40 }
 0x23f   :  { %v3435_v17 = vmax.f32 %v8001_v38, 0.0  ;;  %v3437_v26 = vmax.f32 %v8033_v56, 0.0  ;;  %5701 = vmatprep.mubr.bf16.mxu0 %v9841_v47  ;;  %5749 = vmatpush1.bf16.msra.mxu0 %v9079_v34 }
 0x240   :  { %v9947_v33 = vpack.c.bf16 %v3434_v25, %v3422_v27  ;;  %v9949_v13 = vpack.c.bf16 %v3436_v28, %v3424_v57  ;;  %6369 = vmatprep.mubr.bf16.mxu1 %v9841_v47  ;;  %5750 = vmatprep.subr.bf16.mxu0 %v9086_v51  ;;  %v9087_v51 = vld [vmem:[#allocation8 + $0x270] ss:$12 sps:$4 sm:$0xff]   ;;  %v9094_v57 = vld [vmem:[#allocation8 + $0x28c] ss:$12 sps:$4 sm:$0xff]  }
 0x241   :  { %v9952_v5 = vpack.c.bf16 %v3435_v17, %v3423_v15  ;;  %v9954_v40 = vpack.c.bf16 %v3437_v26, %v3425_v50  ;;  %v2657_v60 = vpop.f32.mrb[40].mxu0  ;;  %v2883_v42 = vpop.f32.mrb[40].mxu1  ;;  %7624 = vmatprep.subr.bf16.mxu1 %v9106_v14 }
 0x242   :  { %v8002_v23 = vadd.f32 %v2657_v60, %v9906_v7  ;;  %v8034_v24 = vadd.f32 %v2883_v42, %v9908_v52  ;;  %v2659_v34 = vpop.f32.mrb[41].mxu0  ;;  %v2885_v2 = vpop.f32.mrb[41].mxu1  ;;  %7625 = vmatpush3.bf16.msra.mxu1 %v9107_v11 }
 0x243   :  { %v8003_v45 = vadd.f32 %v2659_v34, %v9911_v61  ;;  %v8035_v47 = vadd.f32 %v2885_v2, %v9913_v10  ;;  %v2661_v35 = vpop.f32.mrb[42].mxu0  ;;  %v2887_v36 = vpop.f32.mrb[42].mxu1  ;;  %5751 = vmatpush1.bf16.msra.mxu0 %v9084_v43  ;;  %7674 = vmatprep.subr.bf16.mxu1 %v9114_v32 }
 0x244   :  { %v8004_v38 = vadd.f32 %v2661_v35, %v9906_v7  ;;  %v8036_v56 = vadd.f32 %v2887_v36, %v9908_v52  ;;  %v2663_v14 = vpop.f32.mrb[43].mxu0  ;;  %v2889_v27 = vpop.f32.mrb[43].mxu1  ;;  %5752 = vmatprep.subr.bf16.mxu0 %v9089_v31  ;;  %v3446_v11 = vmax.f32 %v8002_v23, 0.0  ;;  %v3448_v15 = vmax.f32 %v8034_v24, 0.0  ;;  %v9092_v31 = vld [vmem:[#allocation8 + $0x288] ss:$12 sps:$4 sm:$0xff]  }
 0x245   :  { %v8005_v25 = vadd.f32 %v2663_v14, %v9911_v61  ;;  %v8037_v28 = vadd.f32 %v2889_v27, %v9913_v10  ;;  %v3447_v43 = vmax.f32 %v8003_v45, 0.0  ;;  %v3449_v26 = vmax.f32 %v8035_v47, 0.0  ;;  %v9097_v23 = vld [vmem:[#allocation8 + $0x2a4] ss:$12 sps:$4 sm:$0xff]   ;;  %v9095_v27 = vld [vmem:[#allocation8 + $0x2a0] ss:$12 sps:$4 sm:$0xff]  }
 0x246   :  { %v3458_v50 = vmax.f32 %v8004_v38, 0.0  ;;  %v3460_v17 = vmax.f32 %v8036_v56, 0.0  ;;  %5702 = vmatmul.mubr.bf16.gmra.mrb[116].mxu0 %v9836_v37  ;;  %6370 = vmatmul.mubr.bf16.gmra.mrb[116].mxu1 %v9836_v37 }
 0x247   :  { %v3459_v32 = vmax.f32 %v8005_v25, 0.0  ;;  %v3461_v60 = vmax.f32 %v8037_v28, 0.0  ;;  %5711 = vmatprep.mubr.bf16.mxu0 %v9860_v55  ;;  %5753 = vmatpush1.bf16.msra.mxu0 %v9087_v51 }
 0x248   :  { %v9967_v42 = vpack.c.bf16 %v3458_v50, %v3446_v11  ;;  %v9969_v34 = vpack.c.bf16 %v3460_v17, %v3448_v15  ;;  %6377 = vmatprep.mubr.bf16.mxu1 %v9860_v55  ;;  %5754 = vmatprep.subr.bf16.mxu0 %v9094_v57  ;;  %v9102_v15 = vld [vmem:[#allocation8 + $0x2bc] ss:$12 sps:$4 sm:$0xff]  }
 0x249   :  { %v9972_v24 = vpack.c.bf16 %v3459_v32, %v3447_v43  ;;  %v9974_v2 = vpack.c.bf16 %v3461_v60, %v3449_v26  ;;  %v2667_v37 = vpop.f32.mrb[44].mxu0  ;;  %v2893_v45 = vpop.f32.mrb[44].mxu1 }
 0x24a   :  { %v8006_v47 = vadd.f32 %v2667_v37, %v9906_v7  ;;  %v8038_v35 = vadd.f32 %v2893_v45, %v9908_v52  ;;  %v2669_v36 = vpop.f32.mrb[45].mxu0  ;;  %v2895_v51 = vpop.f32.mrb[45].mxu1 }
 0x24b   :  { %v8007_v38 = vadd.f32 %v2669_v36, %v9911_v61  ;;  %v8039_v56 = vadd.f32 %v2895_v51, %v9913_v10  ;;  %v2671_v14 = vpop.f32.mrb[46].mxu0  ;;  %v2897_v55 = vpop.f32.mrb[46].mxu1  ;;  %5755 = vmatpush1.bf16.msra.mxu0 %v9092_v31 }
 0x24c   :  { %v8008_v57 = vadd.f32 %v2671_v14, %v9906_v7  ;;  %v8040_v25 = vadd.f32 %v2897_v55, %v9908_v52  ;;  %v2673_v28 = vpop.f32.mrb[47].mxu0  ;;  %v2899_v11 = vpop.f32.mrb[47].mxu1  ;;  %5756 = vmatprep.subr.bf16.mxu0 %v9097_v23  ;;  %v3470_v43 = vmax.f32 %v8006_v47, 0.0  ;;  %v3472_v26 = vmax.f32 %v8038_v35, 0.0  ;;  %v9100_v23 = vld [vmem:[#allocation8 + $0x2b8] ss:$12 sps:$4 sm:$0xff]  }
 0x24d   :  { %v8009_v50 = vadd.f32 %v2673_v28, %v9911_v61  ;;  %v8041_v17 = vadd.f32 %v2899_v11, %v9913_v10  ;;  %v3471_v31 = vmax.f32 %v8007_v38, 0.0  ;;  %v3473_v37 = vmax.f32 %v8039_v56, 0.0  ;;  %v9105_v47 = vld [vmem:[#allocation8 + $0x2d4] ss:$12 sps:$4 sm:$0xff]  }
 0x24e   :  { %v3482_v32 = vmax.f32 %v8008_v57, 0.0  ;;  %v3484_v60 = vmax.f32 %v8040_v25, 0.0  ;;  %5712 = vmatmul.mubr.bf16.gmra.mrb[120].mxu0 %v9855_v39  ;;  %6378 = vmatmul.mubr.bf16.gmra.mrb[120].mxu1 %v9855_v39 }
 0x24f   :  { %v3483_v45 = vmax.f32 %v8009_v50, 0.0  ;;  %v3485_v36 = vmax.f32 %v8041_v17, 0.0  ;;  %5721 = vmatprep.mubr.bf16.mxu0 %v9878_v1  ;;  %5757 = vmatpush1.bf16.msra.mxu0 %v9095_v27 }
 0x250   :  { %v9987_v51 = vpack.c.bf16 %v3482_v32, %v3470_v43  ;;  %v9989_v14 = vpack.c.bf16 %v3484_v60, %v3472_v26  ;;  %6385 = vmatprep.mubr.bf16.mxu1 %v9878_v1  ;;  %5758 = vmatprep.subr.bf16.mxu0 %v9102_v15  ;;  %v9103_v15 = vld [vmem:[#allocation8 + $0x2d0] ss:$12 sps:$4 sm:$0xff]   ;;  %v9110_v60 = vld [vmem:[#allocation8 + $0x2ec] ss:$12 sps:$4 sm:$0xff]  }
 0x251   :  { %v9992_v35 = vpack.c.bf16 %v3483_v45, %v3471_v31  ;;  %v9994_v55 = vpack.c.bf16 %v3485_v36, %v3473_v37  ;;  %v2677_v39 = vpop.f32.mrb[48].mxu0  ;;  %v2903_v38 = vpop.f32.mrb[48].mxu1 }
 0x252   :  { %v8010_v56 = vadd.f32 %v2677_v39, %v9906_v7  ;;  %v8042_v57 = vadd.f32 %v2903_v38, %v9908_v52  ;;  %v2679_v27 = vpop.f32.mrb[49].mxu0  ;;  %v2905_v25 = vpop.f32.mrb[49].mxu1 }
 0x253   :  { %v8011_v28 = vadd.f32 %v2679_v27, %v9911_v61  ;;  %v8043_v11 = vadd.f32 %v2905_v25, %v9913_v10  ;;  %v2681_v50 = vpop.f32.mrb[50].mxu0  ;;  %v2907_v1 = vpop.f32.mrb[50].mxu1  ;;  %5759 = vmatpush1.bf16.msra.mxu0 %v9100_v23 }
 0x254   :  { %v8012_v17 = vadd.f32 %v2681_v50, %v9906_v7  ;;  %v8044_v43 = vadd.f32 %v2907_v1, %v9908_v52  ;;  %v2683_v26 = vpop.f32.mrb[51].mxu0  ;;  %v2909_v32 = vpop.f32.mrb[51].mxu1  ;;  %5760 = vmatprep.subr.bf16.mxu0 %v9105_v47  ;;  %v3494_v45 = vmax.f32 %v8010_v56, 0.0  ;;  %v3496_v36 = vmax.f32 %v8042_v57, 0.0  ;;  %v9108_v47 = vld [vmem:[#allocation8 + $0x2e8] ss:$12 sps:$4 sm:$0xff]  }
 0x255   :  { %v8013_v31 = vadd.f32 %v2683_v26, %v9911_v61  ;;  %v8045_v37 = vadd.f32 %v2909_v32, %v9913_v10  ;;  %v3495_v23 = vmax.f32 %v8011_v28, 0.0  ;;  %v3497_v27 = vmax.f32 %v8043_v11, 0.0  ;;  %v9113_v56 = vld [vmem:[#allocation8 + $0x304] ss:$12 sps:$4 sm:$0xff]  }
 0x256   :  { %v3506_v39 = vmax.f32 %v8012_v17, 0.0  ;;  %v3508_v38 = vmax.f32 %v8044_v43, 0.0  ;;  %5722 = vmatmul.mubr.bf16.gmra.mrb[124].mxu0 %v9873_v29  ;;  %6386 = vmatmul.mubr.bf16.gmra.mrb[124].mxu1 %v9873_v29 }
 0x257   :  { %v3507_v25 = vmax.f32 %v8013_v31, 0.0  ;;  %v3509_v50 = vmax.f32 %v8045_v37, 0.0  ;;  %5761 = vmatpush1.bf16.msra.mxu0 %v9103_v15  ;;  %5764 = vmatprep.mubr.bf16.mxu0 %v9760_v12 }
 0x258   :  { %v10007_v1 = vpack.c.bf16 %v3506_v39, %v3494_v45  ;;  %v10009_v26 = vpack.c.bf16 %v3508_v38, %v3496_v36  ;;  %6426 = vmatprep.mubr.bf16.mxu1 %v9760_v12  ;;  %5762 = vmatprep.subr.bf16.mxu0 %v9110_v60  ;;  %v9111_v60 = vld [vmem:[#allocation8 + $0x300] ss:$12 sps:$4 sm:$0xff]  }
 0x259   :  { %v10012_v57 = vpack.c.bf16 %v3507_v25, %v3495_v23  ;;  %v10014_v17 = vpack.c.bf16 %v3509_v50, %v3497_v27  ;;  %v2687_v29 = vpop.f32.mrb[52].mxu0  ;;  %v2913_v28 = vpop.f32.mrb[52].mxu1  ;;  %v9115_v27 = vld [vmem:[#allocation8 + $0x308] ss:$12 sps:$4 sm:$0xff]  }
 0x25a   :  { %10689 = vst [vmem:[#allocation16_spill] sm:$0xff] %v10009_v26  ;;  %v8014_v11 = vadd.f32 %v2687_v29, %v9906_v7  ;;  %v8046_v15 = vadd.f32 %v2913_v28, %v9908_v52  ;;  %v2689_v43 = vpop.f32.mrb[53].mxu0  ;;  %v2915_v32 = vpop.f32.mrb[53].mxu1  ;;  %v9118_v29 = vld [vmem:[#allocation8 + $0x31c] ss:$12 sps:$4 sm:$0xff]  }
 0x25b   :  { %10690 = vst [vmem:[#allocation17_spill] sm:$0xff] %v10014_v17  ;;  %v8015_v31 = vadd.f32 %v2689_v43, %v9911_v61  ;;  %v8047_v37 = vadd.f32 %v2915_v32, %v9913_v10  ;;  %v2691_v45 = vpop.f32.mrb[54].mxu0  ;;  %v2917_v12 = vpop.f32.mrb[54].mxu1  ;;  %5763 = vmatpush1.bf16.msra.mxu0 %v9108_v47  ;;  %v9122_v28 = vld [vmem:[#allocation8 + $0x3e0] ss:$12 sps:$4 sm:$0xff]  }
 0x25c   :  { %v8016_v36 = vadd.f32 %v2691_v45, %v9906_v7  ;;  %v8048_v39 = vadd.f32 %v2917_v12, %v9908_v52  ;;  %v2693_v38 = vpop.f32.mrb[55].mxu0  ;;  %v2919_v23 = vpop.f32.mrb[55].mxu1  ;;  %5845 = vmatprep.subr.bf16.mxu0 %v9113_v56  ;;  %v3518_v43 = vmax.f32 %v8014_v11, 0.0  ;;  %v3520_v32 = vmax.f32 %v8046_v15, 0.0  ;;  %v9116_v56 = vld [vmem:[#allocation8 + $0x318] ss:$12 sps:$4 sm:$0xff]  }
 0x25d   :  { %v8017_v25 = vadd.f32 %v2693_v38, %v9911_v61  ;;  %v8049_v50 = vadd.f32 %v2919_v23, %v9913_v10  ;;  %v3519_v47 = vmax.f32 %v8015_v31, 0.0  ;;  %v3521_v45 = vmax.f32 %v8047_v37, 0.0  ;;  %v9121_v11 = vld [vmem:[#allocation8 + $0x334] ss:$12 sps:$4 sm:$0xff]  }
 0x25e   :  { %v3530_v20 = vmax.f32 %v8016_v36, 0.0  ;;  %v3532_v26 = vmax.f32 %v8048_v39, 0.0  ;;  %5765 = vmatmul.mubr.bf16.vlgmr.msra.gmra.mrb[96].mxu0 %v9756_v4  ;;  %6427 = vmatmul.mubr.bf16.vlgmr.msra.gmra.mrb[128].mxu1 %v9756_v4  ;;  %v9123_v15 = vld [vmem:[#allocation8 + $0x320] ss:$12 sps:$4 sm:$0xff]   ;;  %v9130_v39 = vld [vmem:[#allocation8 + $0x3f8] ss:$12 sps:$4 sm:$0xff]  }
 0x25f   :  { %v3531_v12 = vmax.f32 %v8017_v25, 0.0  ;;  %v3533_v17 = vmax.f32 %v8049_v50, 0.0  ;;  %5774 = vmatprep.mubr.bf16.mxu0 %v9776_v48  ;;  %5846 = vmatpush1.bf16.msra.mxu0 %v9111_v60 }
 0x260   :  { %v10027_v38 = vpack.c.bf16 %v3530_v20, %v3518_v43  ;;  %v10029_v23 = vpack.c.bf16 %v3532_v26, %v3520_v32  ;;  %6434 = vmatprep.mubr.bf16.mxu1 %v9776_v48  ;;  %7675 = vmatpush3.bf16.msra.mxu1 %v9115_v27 }
 0x261   :  { %v10032_v36 = vpack.c.bf16 %v3531_v12, %v3519_v47  ;;  %v10034_v4 = vpack.c.bf16 %v3533_v17, %v3521_v45  ;;  %v2697_v31 = vpop.f32.mrb[56].mxu0  ;;  %v2923_v37 = vpop.f32.mrb[56].mxu1  ;;  %5847 = vmatprep.subr.bf16.mxu0 %v9118_v29  ;;  %7676 = vmatprep.subr.bf16.mxu1 %v9122_v28  ;;  %v9119_v17 = vld [vmem:[#allocation8 + $0x330] ss:$12 sps:$4 sm:$0xff]   ;;  %v9126_v45 = vld [vmem:[#allocation8 + $0x34c] ss:$12 sps:$4 sm:$0xff]  }
 0x262   :  { %10691 = vst [vmem:[#allocation18_spill] sm:$0xff] %v10029_v23  ;;  %v8018_v60 = vadd.f32 %v2697_v31, %v9906_v7  ;;  %v8050_v20 = vadd.f32 %v2923_v37, %v9908_v52  ;;  %v2699_v26 = vpop.f32.mrb[57].mxu0  ;;  %v2925_v25 = vpop.f32.mrb[57].mxu1  ;;  %v9131_v37 = vld [vmem:[#allocation8 + $0x338] ss:$12 sps:$4 sm:$0xff]  }
 0x263   :  { %10692 = vst [vmem:[#allocation19_spill] sm:$0xff] %v10034_v4  ;;  %v8019_v48 = vadd.f32 %v2699_v26, %v9911_v61  ;;  %v8051_v27 = vadd.f32 %v2925_v25, %v9913_v10  ;;  %v2701_v50 = vpop.f32.mrb[58].mxu0  ;;  %v2927_v43 = vpop.f32.mrb[58].mxu1  ;;  %5848 = vmatpush1.bf16.msra.mxu0 %v9116_v56 }
 0x264   :  { %v8020_v32 = vadd.f32 %v2701_v50, %v9906_v7  ;;  %v8052_v29 = vadd.f32 %v2927_v43, %v9908_v52  ;;  %v2703_v28 = vpop.f32.mrb[59].mxu0  ;;  %v2929_v47 = vpop.f32.mrb[59].mxu1  ;;  %5849 = vmatprep.subr.bf16.mxu0 %v9121_v11  ;;  %7677 = vmatpush3.bf16.msra.mxu1 %v9123_v15  ;;  %v3542_v26 = vmax.f32 %v8018_v60, 0.0  ;;  %v3544_v25 = vmax.f32 %v8050_v20, 0.0  ;;  %v9138_v50 = vld [vmem:[#allocation8 + $0x410] ss:$12 sps:$4 sm:$0xff]  }
 0x265   :  { %v8021_v12 = vadd.f32 %v2703_v28, %v9911_v61  ;;  %v8053_v31 = vadd.f32 %v2929_v47, %v9913_v10  ;;  %7678 = vmatprep.subr.bf16.mxu1 %v9130_v39  ;;  %v3543_v43 = vmax.f32 %v8019_v48, 0.0  ;;  %v3545_v4 = vmax.f32 %v8051_v27, 0.0  ;;  %v9124_v28 = vld [vmem:[#allocation8 + $0x348] ss:$12 sps:$4 sm:$0xff]   ;;  %v9129_v60 = vld [vmem:[#allocation8 + $0x364] ss:$12 sps:$4 sm:$0xff]  }
 0x266   :  { %v3554_v23 = vmax.f32 %v8020_v32, 0.0  ;;  %v3556_v56 = vmax.f32 %v8052_v29, 0.0  ;;  %5775 = vmatmul.mubr.bf16.gmra.mrb[100].mxu0 %v9772_v44  ;;  %6435 = vmatmul.mubr.bf16.gmra.mrb[132].mxu1 %v9772_v44  ;;  %v9139_v32 = vld [vmem:[#allocation8 + $0x350] ss:$12 sps:$4 sm:$0xff]  }
 0x267   :  { %v3555_v11 = vmax.f32 %v8021_v12, 0.0  ;;  %v3557_v15 = vmax.f32 %v8053_v31, 0.0  ;;  %5784 = vmatprep.mubr.bf16.mxu0 %v9792_v30  ;;  %5850 = vmatpush1.bf16.msra.mxu0 %v9119_v17 }
 0x268   :  { %v10047_v47 = vpack.c.bf16 %v3554_v23, %v3542_v26  ;;  %v10049_v39 = vpack.c.bf16 %v3556_v56, %v3544_v25  ;;  %6442 = vmatprep.mubr.bf16.mxu1 %v9792_v30  ;;  %5851 = vmatprep.subr.bf16.mxu0 %v9126_v45 }
 0x269   :  { %v10052_v20 = vpack.c.bf16 %v3555_v11, %v3543_v43  ;;  %v10054_v44 = vpack.c.bf16 %v3557_v15, %v3545_v4  ;;  %v2707_v48 = vpop.f32.mrb[60].mxu0  ;;  %v2933_v27 = vpop.f32.mrb[60].mxu1  ;;  %7679 = vmatpush3.bf16.msra.mxu1 %v9131_v37  ;;  %v9127_v4 = vld [vmem:[#allocation8 + $0x360] ss:$12 sps:$4 sm:$0xff]   ;;  %v9134_v11 = vld [vmem:[#allocation8 + $0x37c] ss:$12 sps:$4 sm:$0xff]  }
 0x26a   :  { %10693 = vst [vmem:[#allocation20_spill] sm:$0xff] %v10049_v39  ;;  %v8022_v29 = vadd.f32 %v2707_v48, %v9906_v7  ;;  %v8054_v17 = vadd.f32 %v2933_v27, %v9908_v52  ;;  %v2709_v23 = vpop.f32.mrb[61].mxu0  ;;  %v2935_v12 = vpop.f32.mrb[61].mxu1  ;;  %7680 = vmatprep.subr.bf16.mxu1 %v9138_v50  ;;  %v9132_v48 = vld [vmem:[#allocation8 + $0x378] ss:$12 sps:$4 sm:$0xff]  }
 0x26b   :  { %v8023_v31 = vadd.f32 %v2709_v23, %v9911_v61  ;;  %v8055_v30 = vadd.f32 %v2935_v12, %v9913_v10  ;;  %v2711_v45 = vpop.f32.mrb[62].mxu0  ;;  %v2937_v26 = vpop.f32.mrb[62].mxu1  ;;  %5852 = vmatpush1.bf16.msra.mxu0 %v9124_v28  ;;  %v9146_v27 = vld [vmem:[#allocation8 + $0x428] ss:$12 sps:$4 sm:$0xff]  }
 0x26c   :  { %v8024_v25 = vadd.f32 %v2711_v45, %v9906_v7  ;;  %v8056_v37 = vadd.f32 %v2937_v26, %v9908_v52  ;;  %v2713_v56 = vpop.f32.mrb[63].mxu0  ;;  %v2939_v43 = vpop.f32.mrb[63].mxu1  ;;  %5853 = vmatprep.subr.bf16.mxu0 %v9129_v60  ;;  %v3566_v23 = vmax.f32 %v8022_v29, 0.0  ;;  %v3568_v12 = vmax.f32 %v8054_v17, 0.0  ;;  %v9147_v7 = vld [vmem:[#allocation8 + $0x368] ss:$12 sps:$4 sm:$0xff]  }
 0x26d   :  { %v8025_v15 = vadd.f32 %v2713_v56, %v9911_v61  ;;  %v8057_v50 = vadd.f32 %v2939_v43, %v9913_v10  ;;  %7681 = vmatpush3.bf16.msra.mxu1 %v9139_v32  ;;  %v3567_v52 = vmax.f32 %v8023_v31, 0.0  ;;  %v3569_v45 = vmax.f32 %v8055_v30, 0.0  ;;  %v9154_v61 = vld [vmem:[#allocation8 + $0x440] ss:$12 sps:$4 sm:$0xff]   ;;  %v9135_v31 = vld [vmem:[#allocation8 + $0x390] ss:$12 sps:$4 sm:$0xff]  }
 0x26e   :  { %v3578_v39 = vmax.f32 %v8024_v25, 0.0  ;;  %v3580_v28 = vmax.f32 %v8056_v37, 0.0  ;;  %5785 = vmatmul.mubr.bf16.gmra.mrb[104].mxu0 %v9788_v22  ;;  %6443 = vmatmul.mubr.bf16.gmra.mrb[136].mxu1 %v9788_v22  ;;  %v9137_v29 = vld [vmem:[#allocation8 + $0x394] ss:$12 sps:$4 sm:$0xff]   ;;  %v9142_v30 = vld [vmem:[#allocation8 + $0x3ac] ss:$12 sps:$4 sm:$0xff]  }
 0x26f   :  { %v3579_v60 = vmax.f32 %v8025_v15, 0.0  ;;  %v3581_v26 = vmax.f32 %v8057_v50, 0.0  ;;  %5794 = vmatprep.mubr.bf16.mxu0 %v9808_v63  ;;  %5854 = vmatpush1.bf16.msra.mxu0 %v9127_v4  ;;  %v9155_v4 = vld [vmem:[#allocation8 + $0x380] ss:$12 sps:$4 sm:$0xff]   ;;  %v9145_v25 = vld [vmem:[#allocation8 + $0x3c4] ss:$12 sps:$4 sm:$0xff]  }
 0x270   :  { %v10067_v10 = vpack.c.bf16 %v3578_v39, %v3566_v23  ;;  %v10069_v32 = vpack.c.bf16 %v3580_v28, %v3568_v12  ;;  %6450 = vmatprep.mubr.bf16.mxu1 %v9808_v63  ;;  %5855 = vmatprep.subr.bf16.mxu0 %v9134_v11  ;;  %v9162_v39 = vld [vmem:[#allocation8 + $0x458] ss:$12 sps:$4 sm:$0xff]   ;;  %v9140_v63 = vld [vmem:[#allocation8 + $0x3a8] ss:$12 sps:$4 sm:$0xff]   ;;  %v9143_v56 = vld [vmem:[#allocation8 + $0x3c0] ss:$12 sps:$4 sm:$0xff]  }
 0x271   :  { %v10072_v17 = vpack.c.bf16 %v3579_v60, %v3567_v52  ;;  %v10074_v22 = vpack.c.bf16 %v3581_v26, %v3569_v45  ;;  %7682 = vmatprep.subr.bf16.mxu1 %v9146_v27  ;;  %v9163_v37 = vld [vmem:[#allocation8 + $0x398] ss:$12 sps:$4 sm:$0xff]   ;;  %v9150_v43 = vld [vmem:[#allocation8 + $0x3dc] ss:$12 sps:$4 sm:$0xff]   ;;  %v9153_v50 = vld [vmem:[#allocation8 + $0x3f4] ss:$12 sps:$4 sm:$0xff]  }
 0x272   :  { %7683 = vmatpush3.bf16.msra.mxu1 %v9147_v7  ;;  %v9170_v11 = vld [vmem:[#allocation8 + $0x470] ss:$12 sps:$4 sm:$0xff]   ;;  %v9178_v15 = vld [vmem:[#allocation8 + $0x548] ss:$12 sps:$4 sm:$0xff]   ;;  %v9158_v27 = vld [vmem:[#allocation8 + $0x40c] ss:$12 sps:$4 sm:$0xff]  }
 0x273   :  { %5856 = vmatpush1.bf16.msra.mxu0 %v9132_v48  ;;  %7684 = vmatprep.subr.bf16.mxu1 %v9154_v61  ;;  %v9151_v48 = vld [vmem:[#allocation8 + $0x3f0] ss:$12 sps:$4 sm:$0xff]   ;;  %v9159_v23 = vld [vmem:[#allocation8 + $0x420] ss:$12 sps:$4 sm:$0xff]   ;;  %v9179_v45 = vld [vmem:[#allocation8 + $0x488] ss:$12 sps:$4 sm:$0xff]  }
 0x274   :  { %5857 = vmatprep.subr.bf16.mxu0 %v9137_v29  ;;  %v9166_v12 = vld [vmem:[#allocation8 + $0x43c] ss:$12 sps:$4 sm:$0xff]   ;;  %v9169_v28 = vld [vmem:[#allocation8 + $0x454] ss:$12 sps:$4 sm:$0xff]   ;;  %v9174_v7 = vld [vmem:[#allocation8 + $0x46c] ss:$12 sps:$4 sm:$0xff]  }
 0x275   :  { %v9177_v52 = vld [vmem:[#allocation8 + $0x484] ss:$12 sps:$4 sm:$0xff]   ;;  %v9182_v60 = vld [vmem:[#allocation8 + $0x49c] ss:$12 sps:$4 sm:$0xff]   ;;  %v9186_v26 = vld [vmem:[#allocation8 + $0x560] ss:$12 sps:$4 sm:$0xff]  }
 0x276   :  { %5795 = vmatmul.mubr.bf16.gmra.mrb[108].mxu0 %v9804_v59  ;;  %6451 = vmatmul.mubr.bf16.gmra.mrb[140].mxu1 %v9804_v59  ;;  %v9171_v59 = vld [vmem:[#allocation8 + $0x3b0] ss:$12 sps:$4 sm:$0xff]   ;;  %v9187_v61 = vld [vmem:[#allocation8 + $0x4a0] ss:$12 sps:$4 sm:$0xff]   ;;  %v9194_v29 = vld [vmem:[#allocation8 + $0x578] ss:$12 sps:$4 sm:$0xff]  }
 0x277   :  { %5804 = vmatprep.mubr.bf16.mxu0 %v9826_v49  ;;  %5858 = vmatpush1.bf16.msra.mxu0 %v9135_v31  ;;  %v9183_v31 = vld [vmem:[#allocation8 + $0x4b0] ss:$12 sps:$4 sm:$0xff]  }
 0x278   :  { %6458 = vmatprep.mubr.bf16.mxu1 %v9826_v49  ;;  %5859 = vmatprep.subr.bf16.mxu0 %v9142_v30  ;;  %v9148_v49 = vld [vmem:[#allocation8 + $0x3d8] ss:$12 sps:$4 sm:$0xff]  }
 0x279   :  { %7685 = vmatpush3.bf16.msra.mxu1 %v9155_v4  ;;  %v9190_v30 = vld [vmem:[#allocation8 + $0x4cc] ss:$12 sps:$4 sm:$0xff]  }
 0x27a   :  { %7686 = vmatprep.subr.bf16.mxu1 %v9162_v39  ;;  %v9195_v4 = vld [vmem:[#allocation8 + $0x4b8] ss:$12 sps:$4 sm:$0xff]  }
 0x27b   :  { %5860 = vmatpush1.bf16.msra.mxu0 %v9140_v63  ;;  %v9193_v39 = vld [vmem:[#allocation8 + $0x4e4] ss:$12 sps:$4 sm:$0xff]  }
 0x27c   :  { %5861 = vmatprep.subr.bf16.mxu0 %v9145_v25  ;;  %v9203_v63 = vld [vmem:[#allocation8 + $0x4d0] ss:$12 sps:$4 sm:$0xff]   ;;  %v9191_v25 = vld [vmem:[#allocation8 + $0x4e0] ss:$12 sps:$4 sm:$0xff]  }
 0x27d   :  { %7687 = vmatpush3.bf16.msra.mxu1 %v9163_v37  ;;  %v407_v37 = vld [vmem:[#allocation7 + $0x8] sm:$0xf] }
 0x27e   :  { %5805 = vmatmul.mubr.bf16.gmra.mrb[112].mxu0 %v9822_v41  ;;  %6459 = vmatmul.mubr.bf16.gmra.mrb[144].mxu1 %v9822_v41  ;;  %v9156_v41 = vld [vmem:[#allocation8 + $0x408] ss:$12 sps:$4 sm:$0xff]  }
 0x27f   :  { %5814 = vmatprep.mubr.bf16.mxu0 %v9844_v53  ;;  %5862 = vmatpush1.bf16.msra.mxu0 %v9143_v56  ;;  %v9198_v56 = vld [vmem:[#allocation8 + $0x4fc] ss:$12 sps:$4 sm:$0xff]  }
 0x280   :  { %6466 = vmatprep.mubr.bf16.mxu1 %v9844_v53  ;;  %5863 = vmatprep.subr.bf16.mxu0 %v9150_v43  ;;  %v9161_v53 = vld [vmem:[#allocation8 + $0x424] ss:$12 sps:$4 sm:$0xff]   ;;  %v9210_v43 = vld [vmem:[#allocation8 + $0x5a8] ss:$12 sps:$4 sm:$0xff]  }
 0x281   :  { %7688 = vmatprep.subr.bf16.mxu1 %v9170_v11  ;;  %v9211_v11 = vld [vmem:[#allocation8 + $0x4e8] ss:$12 sps:$4 sm:$0xff]  }
 0x282   :  { %7689 = vmatpush3.bf16.msra.mxu1 %v9171_v59  ;;  %v10114_v59 = vrot.slane %v407_v37, %v9730_v6 }
 0x283   :  { %5864 = vmatpush1.bf16.msra.mxu0 %v9148_v49  ;;  %7738 = vmatprep.subr.bf16.mxu1 %v9178_v15  ;;  %v10694_v49 = vsub.s32 3, %v9721_v8 }
 0x284   :  { %5865 = vmatprep.subr.bf16.mxu0 %v9153_v50  ;;  %v9196_v50 = vld [vmem:[#allocation8 + $0x4f8] ss:$12 sps:$4 sm:$0xff]  }
 0x285   :  { %v10118_v15 = vrot.slane %v407_v37, %v10694_v49 }
 0x286   :  { %5815 = vmatmul.mubr.bf16.gmra.mrb[116].mxu0 %v9839_v46  ;;  %6467 = vmatmul.mubr.bf16.gmra.mrb[148].mxu1 %v9839_v46  ;;  %v9164_v46 = vld [vmem:[#allocation8 + $0x438] ss:$12 sps:$4 sm:$0xff]  }
 0x287   :  { %5824 = vmatprep.mubr.bf16.mxu0 %v9862_v62  ;;  %5866 = vmatpush1.bf16.msra.mxu0 %v9151_v48  ;;  %v9218_v48 = vld [vmem:[#allocation8 + $0x5c0] ss:$12 sps:$4 sm:$0xff]  }
 0x288   :  { %6474 = vmatprep.mubr.bf16.mxu1 %v9862_v62  ;;  %5867 = vmatprep.subr.bf16.mxu0 %v9158_v27  ;;  %v9167_v62 = vld [vmem:[#allocation8 + $0x450] ss:$12 sps:$4 sm:$0xff]  }
 0x28b   :  { %5868 = vmatpush1.bf16.msra.mxu0 %v9156_v41 }
 0x28c   :  { %5869 = vmatprep.subr.bf16.mxu0 %v9161_v53 }
 0x28e   :  { %5825 = vmatmul.mubr.bf16.gmra.mrb[120].mxu0 %v9858_v54  ;;  %6475 = vmatmul.mubr.bf16.gmra.mrb[152].mxu1 %v9858_v54  ;;  %v9172_v54 = vld [vmem:[#allocation8 + $0x468] ss:$12 sps:$4 sm:$0xff]  }
 0x28f   :  { %5834 = vmatprep.mubr.bf16.mxu0 %v9880_v9  ;;  %5870 = vmatpush1.bf16.msra.mxu0 %v9159_v23 }
 0x290   :  { %6482 = vmatprep.mubr.bf16.mxu1 %v9880_v9  ;;  %5871 = vmatprep.subr.bf16.mxu0 %v9166_v12  ;;  %v9175_v9 = vld [vmem:[#allocation8 + $0x480] ss:$12 sps:$4 sm:$0xff]  }
 0x293   :  { %5872 = vmatpush1.bf16.msra.mxu0 %v9164_v46 }
 0x294   :  { %5873 = vmatprep.subr.bf16.mxu0 %v9169_v28 }
 0x296   :  { %5835 = vmatmul.mubr.bf16.gmra.mrb[124].mxu0 %v9876_v0  ;;  %6483 = vmatmul.mubr.bf16.gmra.mrb[156].mxu1 %v9876_v0  ;;  %v9180_v0 = vld [vmem:[#allocation8 + $0x498] ss:$12 sps:$4 sm:$0xff]  }
 0x297   :  { %5874 = vmatpush1.bf16.msra.mxu0 %v9167_v62  ;;  %5877 = vmatprep.mubr.bf16.mxu0 %v9932_v18 }
 0x298   :  { %6523 = vmatprep.mubr.bf16.mxu1 %v9932_v18  ;;  %5875 = vmatprep.subr.bf16.mxu0 %v9174_v7  ;;  %v9185_v18 = vld [vmem:[#allocation8 + $0x4b4] ss:$12 sps:$4 sm:$0xff]  }
 0x29b   :  { %5876 = vmatpush1.bf16.msra.mxu0 %v9172_v54 }
 0x29c   :  { %5958 = vmatprep.subr.bf16.mxu0 %v9177_v52 }
 0x29e   :  { %5878 = vmatmul.mubr.bf16.vlgmr.msra.gmra.mrb[96].mxu0 %v9927_v16  ;;  %6524 = vmatmul.mubr.bf16.vlgmr.msra.gmra.mrb[160].mxu1 %v9927_v16  ;;  %v9202_v16 = vld [vmem:[#allocation8 + $0x590] ss:$12 sps:$4 sm:$0xff]  }
 0x29f   :  { %5887 = vmatprep.mubr.bf16.mxu0 %v9952_v5  ;;  %5959 = vmatpush1.bf16.msra.mxu0 %v9175_v9 }
 0x2a0   :  { %6531 = vmatprep.mubr.bf16.mxu1 %v9952_v5  ;;  %7739 = vmatpush3.bf16.msra.mxu1 %v9179_v45  ;;  %v9188_v5 = vld [vmem:[#allocation8 + $0x4c8] ss:$12 sps:$4 sm:$0xff]  }
 0x2a1   :  { %5960 = vmatprep.subr.bf16.mxu0 %v9182_v60  ;;  %7740 = vmatprep.subr.bf16.mxu1 %v9186_v26  ;;  %v9206_v60 = vld [vmem:[#allocation8 + $0x52c] ss:$12 sps:$4 sm:$0xff]  }
 0x2a3   :  { %5961 = vmatpush1.bf16.msra.mxu0 %v9180_v0 }
 0x2a4   :  { %5962 = vmatprep.subr.bf16.mxu0 %v9185_v18  ;;  %7741 = vmatpush3.bf16.msra.mxu1 %v9187_v61  ;;  %v9219_v18 = vld [vmem:[#allocation8 + $0x500] ss:$12 sps:$4 sm:$0xff]  }
 0x2a5   :  { %7742 = vmatprep.subr.bf16.mxu1 %v9194_v29 }
 0x2a6   :  { %5888 = vmatmul.mubr.bf16.gmra.mrb[100].mxu0 %v9947_v33  ;;  %6532 = vmatmul.mubr.bf16.gmra.mrb[164].mxu1 %v9947_v33  ;;  %v10107_v33 = vrot.slane %v407_v37, %v9724_v3 }
 0x2a7   :  { %5897 = vmatprep.mubr.bf16.mxu0 %v9972_v24  ;;  %5963 = vmatpush1.bf16.msra.mxu0 %v9183_v31 }
 0x2a8   :  { %6539 = vmatprep.mubr.bf16.mxu1 %v9972_v24  ;;  %5964 = vmatprep.subr.bf16.mxu0 %v9190_v30  ;;  %v10110_v24 = vrot.slane %v407_v37, %v9727_v19 }
 0x2a9   :  { %7743 = vmatpush3.bf16.msra.mxu1 %v9195_v4  ;;  %v9226_v4 = vld [vmem:[#allocation8 + $0x5d8] ss:$12 sps:$4 sm:$0xff]  }
 0x2aa   :  { %7744 = vmatprep.subr.bf16.mxu1 %v9202_v16 }
 0x2ab   :  { %5965 = vmatpush1.bf16.msra.mxu0 %v9188_v5 }
 0x2ac   :  { %5966 = vmatprep.subr.bf16.mxu0 %v9193_v39 }
 0x2ad   :  { %7745 = vmatpush3.bf16.msra.mxu1 %v9203_v63 }
 0x2ae   :  { %5898 = vmatmul.mubr.bf16.gmra.mrb[104].mxu0 %v9967_v42  ;;  %6540 = vmatmul.mubr.bf16.gmra.mrb[168].mxu1 %v9967_v42  ;;  %v9201_v42 = vld [vmem:[#allocation8 + $0x514] ss:$12 sps:$4 sm:$0xff]  }
 0x2af   :  { %5907 = vmatprep.mubr.bf16.mxu0 %v9992_v35  ;;  %5967 = vmatpush1.bf16.msra.mxu0 %v9191_v25  ;;  %v9204_v25 = vld [vmem:[#allocation8 + $0x528] ss:$12 sps:$4 sm:$0xff]  }
 0x2b0   :  { %6547 = vmatprep.mubr.bf16.mxu1 %v9992_v35  ;;  %5968 = vmatprep.subr.bf16.mxu0 %v9198_v56  ;;  %v9199_v35 = vld [vmem:[#allocation8 + $0x510] ss:$12 sps:$4 sm:$0xff]  }
 0x2b1   :  { %v3089_v27 = vpop.f32.mrb[64].mxu0  ;;  %v3315_v41 = vpop.f32.mrb[64].mxu1  ;;  %7746 = vmatprep.subr.bf16.mxu1 %v9210_v43  ;;  %v9209_v43 = vld [vmem:[#allocation8 + $0x544] ss:$12 sps:$4 sm:$0xff]  }
 0x2b2   :  { %v8058_v53 = vadd.f32 %v3089_v27, %v10107_v33  ;;  %v8090_v23 = vadd.f32 %v3315_v41, %v10110_v24  ;;  %v3091_v12 = vpop.f32.mrb[65].mxu0  ;;  %v3317_v46 = vpop.f32.mrb[65].mxu1  ;;  %7747 = vmatpush3.bf16.msra.mxu1 %v9211_v11 }
 0x2b3   :  { %v8059_v8 = vadd.f32 %v3091_v12, %v10114_v59  ;;  %v8091_v28 = vadd.f32 %v3317_v46, %v10118_v15  ;;  %v3093_v62 = vpop.f32.mrb[66].mxu0  ;;  %v3319_v7 = vpop.f32.mrb[66].mxu1  ;;  %5969 = vmatpush1.bf16.msra.mxu0 %v9196_v50  ;;  %7748 = vmatprep.subr.bf16.mxu1 %v9218_v48  ;;  %v9227_v48 = vld [vmem:[#allocation8 + $0x518] ss:$12 sps:$4 sm:$0xff]  }
 0x2b4   :  { %v8060_v54 = vadd.f32 %v3093_v62, %v10107_v33  ;;  %v8092_v52 = vadd.f32 %v3319_v7, %v10110_v24  ;;  %v3095_v9 = vpop.f32.mrb[67].mxu0  ;;  %v3321_v45 = vpop.f32.mrb[67].mxu1  ;;  %5970 = vmatprep.subr.bf16.mxu0 %v9201_v42  ;;  %v3402_v61 = vmax.f32 %v8058_v53, 0.0  ;;  %v3404_v29 = vmax.f32 %v8090_v23, 0.0 }
 0x2b5   :  { %v8061_v26 = vadd.f32 %v3095_v9, %v10114_v59  ;;  %v8093_v0 = vadd.f32 %v3321_v45, %v10118_v15  ;;  %v3403_v16 = vmax.f32 %v8059_v8, 0.0  ;;  %v3405_v5 = vmax.f32 %v8091_v28, 0.0  ;;  %v9207_v8 = vld [vmem:[#allocation8 + $0x540] ss:$12 sps:$4 sm:$0xff]   ;;  %v9212_v45 = vld [vmem:[#allocation8 + $0x558] ss:$12 sps:$4 sm:$0xff]  }
 0x2b6   :  { %v3414_v31 = vmax.f32 %v8060_v54, 0.0  ;;  %v3416_v30 = vmax.f32 %v8092_v52, 0.0  ;;  %5908 = vmatmul.mubr.bf16.gmra.mrb[108].mxu0 %v9987_v51  ;;  %6548 = vmatmul.mubr.bf16.gmra.mrb[172].mxu1 %v9987_v51  ;;  %v9214_v54 = vld [vmem:[#allocation8 + $0x55c] ss:$12 sps:$4 sm:$0xff]  }
 0x2b7   :  { %v3415_v39 = vmax.f32 %v8061_v26, 0.0  ;;  %v3417_v63 = vmax.f32 %v8093_v0, 0.0  ;;  %5917 = vmatprep.mubr.bf16.mxu0 %v10012_v57  ;;  %5971 = vmatpush1.bf16.msra.mxu0 %v9199_v35 }
 0x2b8   :  { %v10132_v37 = vpack.c.bf16 %v3414_v31, %v3402_v61  ;;  %v10134_v56 = vpack.c.bf16 %v3416_v30, %v3404_v29  ;;  %6555 = vmatprep.mubr.bf16.mxu1 %v10012_v57  ;;  %5972 = vmatprep.subr.bf16.mxu0 %v9206_v60  ;;  %v9234_v60 = vld [vmem:[#allocation8 + $0x5f0] ss:$12 sps:$4 sm:$0xff]  }
 0x2b9   :  { %v10137_v11 = vpack.c.bf16 %v3415_v39, %v3403_v16  ;;  %v10139_v51 = vpack.c.bf16 %v3417_v63, %v3405_v5  ;;  %v3099_v49 = vpop.f32.mrb[68].mxu0  ;;  %v3325_v50 = vpop.f32.mrb[68].mxu1  ;;  %7749 = vmatpush3.bf16.msra.mxu1 %v9219_v18  ;;  %v9235_v29 = vld [vmem:[#allocation8 + $0x530] ss:$12 sps:$4 sm:$0xff]   ;;  %v9242_v5 = vld [vmem:[#allocation8 + $0x6c8] ss:$12 sps:$4 sm:$0xff]  }
 0x2ba   :  { %v8062_v42 = vadd.f32 %v3099_v49, %v10107_v33  ;;  %v8094_v27 = vadd.f32 %v3325_v50, %v10110_v24  ;;  %v3101_v41 = vpop.f32.mrb[69].mxu0  ;;  %v3327_v53 = vpop.f32.mrb[69].mxu1  ;;  %7750 = vmatprep.subr.bf16.mxu1 %v9226_v4 }
 0x2bb   :  { %v8063_v23 = vadd.f32 %v3101_v41, %v10114_v59  ;;  %v8095_v57 = vadd.f32 %v3327_v53, %v10118_v15  ;;  %v3103_v12 = vpop.f32.mrb[70].mxu0  ;;  %v3329_v46 = vpop.f32.mrb[70].mxu1  ;;  %5973 = vmatpush1.bf16.msra.mxu0 %v9204_v25  ;;  %v9217_v25 = vld [vmem:[#allocation8 + $0x574] ss:$12 sps:$4 sm:$0xff]  }
 0x2bc   :  { %v8064_v28 = vadd.f32 %v3103_v12, %v10107_v33  ;;  %v8096_v62 = vadd.f32 %v3329_v46, %v10110_v24  ;;  %v3105_v7 = vpop.f32.mrb[71].mxu0  ;;  %v3331_v35 = vpop.f32.mrb[71].mxu1  ;;  %5974 = vmatprep.subr.bf16.mxu0 %v9209_v43  ;;  %v3426_v26 = vmax.f32 %v8062_v42, 0.0  ;;  %v3428_v0 = vmax.f32 %v8094_v27, 0.0  ;;  %v9215_v12 = vld [vmem:[#allocation8 + $0x570] ss:$12 sps:$4 sm:$0xff]  }
 0x2bd   :  { %v8065_v52 = vadd.f32 %v3105_v7, %v10114_v59  ;;  %v8097_v9 = vadd.f32 %v3331_v35, %v10118_v15  ;;  %7751 = vmatpush3.bf16.msra.mxu1 %v9227_v48  ;;  %v3427_v31 = vmax.f32 %v8063_v23, 0.0  ;;  %v3429_v30 = vmax.f32 %v8095_v57, 0.0  ;;  %v9222_v7 = vld [vmem:[#allocation8 + $0x58c] ss:$12 sps:$4 sm:$0xff]  }
 0x2be   :  { %v3438_v18 = vmax.f32 %v8064_v28, 0.0  ;;  %v3440_v61 = vmax.f32 %v8096_v62, 0.0  ;;  %5918 = vmatmul.mubr.bf16.gmra.mrb[112].mxu0 %v10007_v1  ;;  %6556 = vmatmul.mubr.bf16.gmra.mrb[176].mxu1 %v10007_v1 }
 0x2bf   :  { %v3439_v4 = vmax.f32 %v8065_v52, 0.0  ;;  %v3441_v16 = vmax.f32 %v8097_v9, 0.0  ;;  %5927 = vmatprep.mubr.bf16.mxu0 %v10032_v36  ;;  %5975 = vmatpush1.bf16.msra.mxu0 %v9207_v8 }
 0x2c0   :  { %v10152_v39 = vpack.c.bf16 %v3438_v18, %v3426_v26  ;;  %v10154_v63 = vpack.c.bf16 %v3440_v61, %v3428_v0  ;;  %6563 = vmatprep.mubr.bf16.mxu1 %v10032_v36  ;;  %5976 = vmatprep.subr.bf16.mxu0 %v9214_v54 }
 0x2c1   :  { %v10157_v43 = vpack.c.bf16 %v3439_v4, %v3427_v31  ;;  %v10159_v1 = vpack.c.bf16 %v3441_v16, %v3429_v30  ;;  %v3109_v49 = vpop.f32.mrb[72].mxu0  ;;  %v3335_v50 = vpop.f32.mrb[72].mxu1  ;;  %7752 = vmatprep.subr.bf16.mxu1 %v9234_v60  ;;  %v9225_v4 = vld [vmem:[#allocation8 + $0x5a4] ss:$12 sps:$4 sm:$0xff]  }
 0x2c2   :  { %v8066_v48 = vadd.f32 %v3109_v49, %v10107_v33  ;;  %v8098_v42 = vadd.f32 %v3335_v50, %v10110_v24  ;;  %v3111_v27 = vpop.f32.mrb[73].mxu0  ;;  %v3337_v41 = vpop.f32.mrb[73].mxu1  ;;  %7753 = vmatpush3.bf16.msra.mxu1 %v9235_v29  ;;  %v9220_v29 = vld [vmem:[#allocation8 + $0x588] ss:$12 sps:$4 sm:$0xff]  }
 0x2c3   :  { %v8067_v53 = vadd.f32 %v3111_v27, %v10114_v59  ;;  %v8099_v36 = vadd.f32 %v3337_v41, %v10118_v15  ;;  %v3113_v23 = vpop.f32.mrb[74].mxu0  ;;  %v3339_v57 = vpop.f32.mrb[74].mxu1  ;;  %5977 = vmatpush1.bf16.msra.mxu0 %v9212_v45  ;;  %7802 = vmatprep.subr.bf16.mxu1 %v9242_v5 }
 0x2c4   :  { %v8068_v46 = vadd.f32 %v3113_v23, %v10107_v33  ;;  %v8100_v8 = vadd.f32 %v3339_v57, %v10110_v24  ;;  %v3115_v28 = vpop.f32.mrb[75].mxu0  ;;  %v3341_v62 = vpop.f32.mrb[75].mxu1  ;;  %5978 = vmatprep.subr.bf16.mxu0 %v9217_v25  ;;  %v3450_v52 = vmax.f32 %v8066_v48, 0.0  ;;  %v3452_v9 = vmax.f32 %v8098_v42, 0.0 }
 0x2c5   :  { %v8069_v35 = vadd.f32 %v3115_v28, %v10114_v59  ;;  %v8101_v54 = vadd.f32 %v3341_v62, %v10118_v15  ;;  %v3451_v45 = vmax.f32 %v8067_v53, 0.0  ;;  %v3453_v0 = vmax.f32 %v8099_v36, 0.0  ;;  %v9223_v36 = vld [vmem:[#allocation8 + $0x5a0] ss:$12 sps:$4 sm:$0xff]  }
 0x2c6   :  { %v3462_v60 = vmax.f32 %v8068_v46, 0.0  ;;  %v3464_v26 = vmax.f32 %v8100_v8, 0.0  ;;  %5928 = vmatmul.mubr.bf16.gmra.mrb[116].mxu0 %v10027_v38  ;;  %6564 = vmatmul.mubr.bf16.gmra.mrb[180].mxu1 %v10027_v38  ;;  %v9230_v8 = vld [vmem:[#allocation8 + $0x5bc] ss:$12 sps:$4 sm:$0xff]  }
 0x2c7   :  { %v3463_v18 = vmax.f32 %v8069_v35, 0.0  ;;  %v3465_v61 = vmax.f32 %v8101_v54, 0.0  ;;  %5937 = vmatprep.mubr.bf16.mxu0 %v10052_v20  ;;  %5979 = vmatpush1.bf16.msra.mxu0 %v9215_v12 }
 0x2c8   :  { %v10172_v31 = vpack.c.bf16 %v3462_v60, %v3450_v52  ;;  %v10174_v30 = vpack.c.bf16 %v3464_v26, %v3452_v9  ;;  %6571 = vmatprep.mubr.bf16.mxu1 %v10052_v20  ;;  %5980 = vmatprep.subr.bf16.mxu0 %v9222_v7 }
 0x2c9   :  { %v10177_v16 = vpack.c.bf16 %v3463_v18, %v3451_v45  ;;  %v10179_v5 = vpack.c.bf16 %v3465_v61, %v3453_v0  ;;  %v3119_v38 = vpop.f32.mrb[76].mxu0  ;;  %v3345_v25 = vpop.f32.mrb[76].mxu1  ;;  %v9228_v0 = vld [vmem:[#allocation8 + $0x5b8] ss:$12 sps:$4 sm:$0xff]  }
 0x2ca   :  { %v8070_v49 = vadd.f32 %v3119_v38, %v10107_v33  ;;  %v8102_v50 = vadd.f32 %v3345_v25, %v10110_v24  ;;  %v3121_v48 = vpop.f32.mrb[77].mxu0  ;;  %v3347_v42 = vpop.f32.mrb[77].mxu1 }
 0x2cb   :  { %v8071_v27 = vadd.f32 %v3121_v48, %v10114_v59  ;;  %v8103_v41 = vadd.f32 %v3347_v42, %v10118_v15  ;;  %v3123_v53 = vpop.f32.mrb[78].mxu0  ;;  %v3349_v20 = vpop.f32.mrb[78].mxu1  ;;  %5981 = vmatpush1.bf16.msra.mxu0 %v9220_v29  ;;  %v9233_v29 = vld [vmem:[#allocation8 + $0x5d4] ss:$12 sps:$4 sm:$0xff]  }
 0x2cc   :  { %v8072_v23 = vadd.f32 %v3123_v53, %v10107_v33  ;;  %v8104_v57 = vadd.f32 %v3349_v20, %v10110_v24  ;;  %v3125_v12 = vpop.f32.mrb[79].mxu0  ;;  %v3351_v46 = vpop.f32.mrb[79].mxu1  ;;  %5982 = vmatprep.subr.bf16.mxu0 %v9225_v4  ;;  %v3474_v7 = vmax.f32 %v8070_v49, 0.0  ;;  %v3476_v35 = vmax.f32 %v8102_v50, 0.0  ;;  %v9231_v20 = vld [vmem:[#allocation8 + $0x5d0] ss:$12 sps:$4 sm:$0xff]  }
 0x2cd   :  { %v8073_v28 = vadd.f32 %v3125_v12, %v10114_v59  ;;  %v8105_v62 = vadd.f32 %v3351_v46, %v10118_v15  ;;  %v3475_v9 = vmax.f32 %v8071_v27, 0.0  ;;  %v3477_v60 = vmax.f32 %v8103_v41, 0.0  ;;  %v9238_v46 = vld [vmem:[#allocation8 + $0x5ec] ss:$12 sps:$4 sm:$0xff]  }
 0x2ce   :  { %v3486_v54 = vmax.f32 %v8072_v23, 0.0  ;;  %v3488_v52 = vmax.f32 %v8104_v57, 0.0  ;;  %5938 = vmatmul.mubr.bf16.gmra.mrb[120].mxu0 %v10047_v47  ;;  %6572 = vmatmul.mubr.bf16.gmra.mrb[184].mxu1 %v10047_v47 }
 0x2cf   :  { %v3487_v26 = vmax.f32 %v8073_v28, 0.0  ;;  %v3489_v45 = vmax.f32 %v8105_v62, 0.0  ;;  %5947 = vmatprep.mubr.bf16.mxu0 %v10072_v17  ;;  %5983 = vmatpush1.bf16.msra.mxu0 %v9223_v36 }
 0x2d0   :  { %v10192_v18 = vpack.c.bf16 %v3486_v54, %v3474_v7  ;;  %v10194_v61 = vpack.c.bf16 %v3488_v52, %v3476_v35  ;;  %6579 = vmatprep.mubr.bf16.mxu1 %v10072_v17  ;;  %5984 = vmatprep.subr.bf16.mxu0 %v9230_v8 }
 0x2d1   :  { %v10197_v4 = vpack.c.bf16 %v3487_v26, %v3475_v9  ;;  %v10199_v38 = vpack.c.bf16 %v3489_v45, %v3477_v60  ;;  %v3129_v47 = vpop.f32.mrb[80].mxu0  ;;  %v3355_v25 = vpop.f32.mrb[80].mxu1  ;;  %v9236_v45 = vld [vmem:[#allocation8 + $0x5e8] ss:$12 sps:$4 sm:$0xff]  }
 0x2d2   :  { %v8074_v49 = vadd.f32 %v3129_v47, %v10107_v33  ;;  %v8106_v50 = vadd.f32 %v3355_v25, %v10110_v24  ;;  %v3131_v48 = vpop.f32.mrb[81].mxu0  ;;  %v3357_v42 = vpop.f32.mrb[81].mxu1  ;;  %v9241_v47 = vld [vmem:[#allocation8 + $0x604] ss:$12 sps:$4 sm:$0xff]  }
 0x2d3   :  { %v8075_v27 = vadd.f32 %v3131_v48, %v10114_v59  ;;  %v8107_v41 = vadd.f32 %v3357_v42, %v10118_v15  ;;  %v3133_v53 = vpop.f32.mrb[82].mxu0  ;;  %v3359_v17 = vpop.f32.mrb[82].mxu1  ;;  %5985 = vmatpush1.bf16.msra.mxu0 %v9228_v0 }
 0x2d4   :  { %v8076_v36 = vadd.f32 %v3133_v53, %v10107_v33  ;;  %v8108_v23 = vadd.f32 %v3359_v17, %v10110_v24  ;;  %v3135_v57 = vpop.f32.mrb[83].mxu0  ;;  %v3361_v12 = vpop.f32.mrb[83].mxu1  ;;  %5986 = vmatprep.subr.bf16.mxu0 %v9233_v29  ;;  %v3498_v62 = vmax.f32 %v8074_v49, 0.0  ;;  %v3500_v7 = vmax.f32 %v8106_v50, 0.0 }
 0x2d5   :  { %v8077_v8 = vadd.f32 %v3135_v57, %v10114_v59  ;;  %v8109_v28 = vadd.f32 %v3361_v12, %v10118_v15  ;;  %v3499_v52 = vmax.f32 %v8075_v27, 0.0  ;;  %v3501_v9 = vmax.f32 %v8107_v41, 0.0 }
 0x2d6   :  { %v3510_v35 = vmax.f32 %v8076_v36, 0.0  ;;  %v3512_v54 = vmax.f32 %v8108_v23, 0.0  ;;  %5948 = vmatmul.mubr.bf16.gmra.mrb[124].mxu0 %v10067_v10  ;;  %6580 = vmatmul.mubr.bf16.gmra.mrb[188].mxu1 %v10067_v10  ;;  %v9239_v36 = vld [vmem:[#allocation8 + $0x600] ss:$12 sps:$4 sm:$0xff]  }
 0x2d7   :  { %v3511_v60 = vmax.f32 %v8077_v8, 0.0  ;;  %v3513_v26 = vmax.f32 %v8109_v28, 0.0  ;;  %5987 = vmatpush1.bf16.msra.mxu0 %v9231_v20  ;;  %5990 = vmatprep.mubr.bf16.mxu0 %v9934_v58  ;;  %v9243_v8 = vld [vmem:[#allocation8 + $0x608] ss:$12 sps:$4 sm:$0xff]  }
 0x2d8   :  { %v10212_v0 = vpack.c.bf16 %v3510_v35, %v3498_v62  ;;  %v10214_v29 = vpack.c.bf16 %v3512_v54, %v3500_v7  ;;  %6620 = vmatprep.mubr.bf16.mxu1 %v9934_v58  ;;  %5988 = vmatprep.subr.bf16.mxu0 %v9238_v46  ;;  %v9246_v7 = vld [vmem:[#allocation8 + $0x61c] ss:$12 sps:$4 sm:$0xff]   ;;  %v9250_v35 = vld [vmem:[#allocation8 + $0x6e0] ss:$12 sps:$4 sm:$0xff]  }
 0x2d9   :  { %v10217_v25 = vpack.c.bf16 %v3511_v60, %v3499_v52  ;;  %v10219_v49 = vpack.c.bf16 %v3513_v26, %v3501_v9  ;;  %v3139_v10 = vpop.f32.mrb[84].mxu0  ;;  %v3365_v50 = vpop.f32.mrb[84].mxu1 }
 0x2da   :  { %v8078_v48 = vadd.f32 %v3139_v10, %v10107_v33  ;;  %v8110_v42 = vadd.f32 %v3365_v50, %v10110_v24  ;;  %v3141_v27 = vpop.f32.mrb[85].mxu0  ;;  %v3367_v41 = vpop.f32.mrb[85].mxu1 }
 0x2db   :  { %v8079_v53 = vadd.f32 %v3141_v27, %v10114_v59  ;;  %v8111_v17 = vadd.f32 %v3367_v41, %v10118_v15  ;;  %v3143_v20 = vpop.f32.mrb[86].mxu0  ;;  %v3369_v58 = vpop.f32.mrb[86].mxu1  ;;  %5989 = vmatpush1.bf16.msra.mxu0 %v9236_v45 }
 0x2dc   :  { %v8080_v23 = vadd.f32 %v3143_v20, %v10107_v33  ;;  %v8112_v57 = vadd.f32 %v3369_v58, %v10110_v24  ;;  %v3145_v12 = vpop.f32.mrb[87].mxu0  ;;  %v3371_v46 = vpop.f32.mrb[87].mxu1  ;;  %6071 = vmatprep.subr.bf16.mxu0 %v9241_v47  ;;  %v3522_v54 = vmax.f32 %v8078_v48, 0.0  ;;  %v3524_v52 = vmax.f32 %v8110_v42, 0.0  ;;  %v9244_v47 = vld [vmem:[#allocation8 + $0x618] ss:$12 sps:$4 sm:$0xff]  }
 0x2dd   :  { %v8081_v28 = vadd.f32 %v3145_v12, %v10114_v59  ;;  %v8113_v62 = vadd.f32 %v3371_v46, %v10118_v15  ;;  %v3523_v26 = vmax.f32 %v8079_v53, 0.0  ;;  %v3525_v45 = vmax.f32 %v8111_v17, 0.0  ;;  %v9249_v48 = vld [vmem:[#allocation8 + $0x634] ss:$12 sps:$4 sm:$0xff]   ;;  %v9258_v58 = vld [vmem:[#allocation8 + $0x6f8] ss:$12 sps:$4 sm:$0xff]  }
 0x2de   :  { %v3534_v9 = vmax.f32 %v8080_v23, 0.0  ;;  %v3536_v60 = vmax.f32 %v8112_v57, 0.0  ;;  %5991 = vmatmul.mubr.bf16.vlgmr.msra.gmra.mrb[96].mxu0 %v9929_v21  ;;  %6621 = vmatmul.mubr.bf16.vlgmr.msra.gmra.mrb[192].mxu1 %v9929_v21  ;;  %v9251_v42 = vld [vmem:[#allocation8 + $0x620] ss:$12 sps:$4 sm:$0xff]  }
 0x2df   :  { %v3535_v10 = vmax.f32 %v8081_v28, 0.0  ;;  %v3537_v50 = vmax.f32 %v8113_v62, 0.0  ;;  %6000 = vmatprep.mubr.bf16.mxu0 %v9954_v40  ;;  %6072 = vmatpush1.bf16.msra.mxu0 %v9239_v36  ;;  %v9247_v62 = vld [vmem:[#allocation8 + $0x630] ss:$12 sps:$4 sm:$0xff]  }
 0x2e0   :  { %v10232_v27 = vpack.c.bf16 %v3534_v9, %v3522_v54  ;;  %v10234_v41 = vpack.c.bf16 %v3536_v60, %v3524_v52  ;;  %6628 = vmatprep.mubr.bf16.mxu1 %v9954_v40  ;;  %7803 = vmatpush3.bf16.msra.mxu1 %v9243_v8  ;;  %v9254_v9 = vld [vmem:[#allocation8 + $0x64c] ss:$12 sps:$4 sm:$0xff]  }
 0x2e1   :  { %v10237_v20 = vpack.c.bf16 %v3535_v10, %v3523_v26  ;;  %v10239_v21 = vpack.c.bf16 %v3537_v50, %v3525_v45  ;;  %v3149_v53 = vpop.f32.mrb[88].mxu0  ;;  %v3375_v17 = vpop.f32.mrb[88].mxu1  ;;  %6073 = vmatprep.subr.bf16.mxu0 %v9246_v7  ;;  %7804 = vmatprep.subr.bf16.mxu1 %v9250_v35  ;;  %v9259_v45 = vld [vmem:[#allocation8 + $0x638] ss:$12 sps:$4 sm:$0xff]  }
 0x2e2   :  { %v8082_v36 = vadd.f32 %v3149_v53, %v10107_v33  ;;  %v8114_v23 = vadd.f32 %v3375_v17, %v10110_v24  ;;  %v3151_v57 = vpop.f32.mrb[89].mxu0  ;;  %v3377_v12 = vpop.f32.mrb[89].mxu1  ;;  %v9266_v17 = vld [vmem:[#allocation8 + $0x710] ss:$12 sps:$4 sm:$0xff]  }
 0x2e3   :  { %v8083_v40 = vadd.f32 %v3151_v57, %v10114_v59  ;;  %v8115_v46 = vadd.f32 %v3377_v12, %v10118_v15  ;;  %v3153_v8 = vpop.f32.mrb[90].mxu0  ;;  %v3379_v28 = vpop.f32.mrb[90].mxu1  ;;  %6074 = vmatpush1.bf16.msra.mxu0 %v9244_v47 }
 0x2e4   :  { %v8084_v54 = vadd.f32 %v3153_v8, %v10107_v33  ;;  %v8116_v7 = vadd.f32 %v3379_v28, %v10110_v24  ;;  %v3155_v35 = vpop.f32.mrb[91].mxu0  ;;  %v3381_v52 = vpop.f32.mrb[91].mxu1  ;;  %6075 = vmatprep.subr.bf16.mxu0 %v9249_v48  ;;  %7805 = vmatpush3.bf16.msra.mxu1 %v9251_v42  ;;  %v3546_v10 = vmax.f32 %v8082_v36, 0.0  ;;  %v3548_v50 = vmax.f32 %v8114_v23, 0.0  ;;  %v9252_v8 = vld [vmem:[#allocation8 + $0x648] ss:$12 sps:$4 sm:$0xff]  }
 0x2e5   :  { %v8085_v60 = vadd.f32 %v3155_v35, %v10114_v59  ;;  %v8117_v26 = vadd.f32 %v3381_v52, %v10118_v15  ;;  %7806 = vmatprep.subr.bf16.mxu1 %v9258_v58  ;;  %v3547_v57 = vmax.f32 %v8083_v40, 0.0  ;;  %v3549_v12 = vmax.f32 %v8115_v46, 0.0  ;;  %v9257_v36 = vld [vmem:[#allocation8 + $0x664] ss:$12 sps:$4 sm:$0xff]  }
 0x2e6   :  { %v3558_v53 = vmax.f32 %v8084_v54, 0.0  ;;  %v3560_v47 = vmax.f32 %v8116_v7, 0.0  ;;  %6001 = vmatmul.mubr.bf16.gmra.mrb[100].mxu0 %v9949_v13  ;;  %6629 = vmatmul.mubr.bf16.gmra.mrb[196].mxu1 %v9949_v13  ;;  %v9267_v54 = vld [vmem:[#allocation8 + $0x650] ss:$12 sps:$4 sm:$0xff]  }
 0x2e7   :  { %v3559_v48 = vmax.f32 %v8085_v60, 0.0  ;;  %v3561_v42 = vmax.f32 %v8117_v26, 0.0  ;;  %6010 = vmatprep.mubr.bf16.mxu0 %v9974_v2  ;;  %6076 = vmatpush1.bf16.msra.mxu0 %v9247_v62 }
 0x2e8   :  { %v10252_v28 = vpack.c.bf16 %v3558_v53, %v3546_v10  ;;  %v10254_v58 = vpack.c.bf16 %v3560_v47, %v3548_v50  ;;  %6636 = vmatprep.mubr.bf16.mxu1 %v9974_v2  ;;  %6077 = vmatprep.subr.bf16.mxu0 %v9254_v9  ;;  %v9255_v10 = vld [vmem:[#allocation8 + $0x660] ss:$12 sps:$4 sm:$0xff]  }
 0x2e9   :  { %v10257_v23 = vpack.c.bf16 %v3559_v48, %v3547_v57  ;;  %v10259_v13 = vpack.c.bf16 %v3561_v42, %v3549_v12  ;;  %v3159_v40 = vpop.f32.mrb[92].mxu0  ;;  %v3385_v46 = vpop.f32.mrb[92].mxu1  ;;  %7807 = vmatpush3.bf16.msra.mxu1 %v9259_v45  ;;  %v9262_v57 = vld [vmem:[#allocation8 + $0x67c] ss:$12 sps:$4 sm:$0xff]   ;;  %v9260_v48 = vld [vmem:[#allocation8 + $0x678] ss:$12 sps:$4 sm:$0xff]  }
 0x2ea   :  { %v8086_v7 = vadd.f32 %v3159_v40, %v10107_v33  ;;  %v8118_v62 = vadd.f32 %v3385_v46, %v10110_v24  ;;  %v3161_v35 = vpop.f32.mrb[93].mxu0  ;;  %v3387_v52 = vpop.f32.mrb[93].mxu1  ;;  %7808 = vmatprep.subr.bf16.mxu1 %v9266_v17  ;;  %v9274_v42 = vld [vmem:[#allocation8 + $0x728] ss:$12 sps:$4 sm:$0xff]  }
 0x2eb   :  { %v8087_v60 = vadd.f32 %v3161_v35, %v10114_v59  ;;  %v8119_v2 = vadd.f32 %v3387_v52, %v10118_v15  ;;  %v3163_v9 = vpop.f32.mrb[94].mxu0  ;;  %v3389_v26 = vpop.f32.mrb[94].mxu1  ;;  %6078 = vmatpush1.bf16.msra.mxu0 %v9252_v8 }
 0x2ec   :  { %v8088_v50 = vadd.f32 %v3163_v9, %v10107_v33  ;;  %v8120_v45 = vadd.f32 %v3389_v26, %v10110_v24  ;;  %v3165_v53 = vpop.f32.mrb[95].mxu0  ;;  %v3391_v47 = vpop.f32.mrb[95].mxu1  ;;  %6079 = vmatprep.subr.bf16.mxu0 %v9257_v36  ;;  %v3570_v40 = vmax.f32 %v8086_v7, 0.0  ;;  %v3572_v46 = vmax.f32 %v8118_v62, 0.0  ;;  %v9275_v33 = vld [vmem:[#allocation8 + $0x668] ss:$12 sps:$4 sm:$0xff]  }
 0x2ed   :  { %v8089_v12 = vadd.f32 %v3165_v53, %v10114_v59  ;;  %v8121_v17 = vadd.f32 %v3391_v47, %v10118_v15  ;;  %7809 = vmatpush3.bf16.msra.mxu1 %v9267_v54  ;;  %v3571_v24 = vmax.f32 %v8087_v60, 0.0  ;;  %v3573_v52 = vmax.f32 %v8119_v2, 0.0  ;;  %v9282_v59 = vld [vmem:[#allocation8 + $0x740] ss:$12 sps:$4 sm:$0xff]  }
 0x2ee   :  { %v3582_v35 = vmax.f32 %v8088_v50, 0.0  ;;  %v3584_v8 = vmax.f32 %v8120_v45, 0.0  ;;  %6011 = vmatmul.mubr.bf16.gmra.mrb[104].mxu0 %v9969_v34  ;;  %6637 = vmatmul.mubr.bf16.gmra.mrb[200].mxu1 %v9969_v34  ;;  %v9265_v7 = vld [vmem:[#allocation8 + $0x694] ss:$12 sps:$4 sm:$0xff]   ;;  %v9263_v50 = vld [vmem:[#allocation8 + $0x690] ss:$12 sps:$4 sm:$0xff]  }
 0x2ef   :  { %v3583_v36 = vmax.f32 %v8089_v12, 0.0  ;;  %v3585_v9 = vmax.f32 %v8121_v17, 0.0  ;;  %6020 = vmatprep.mubr.bf16.mxu0 %v9994_v55  ;;  %6080 = vmatpush1.bf16.msra.mxu0 %v9255_v10  ;;  %v9270_v53 = vld [vmem:[#allocation8 + $0x6ac] ss:$12 sps:$4 sm:$0xff]   ;;  %v9268_v17 = vld [vmem:[#allocation8 + $0x6a8] ss:$12 sps:$4 sm:$0xff]  }
 0x2f0   :  { %v10272_v15 = vpack.c.bf16 %v3582_v35, %v3570_v40  ;;  %v10274_v54 = vpack.c.bf16 %v3584_v8, %v3572_v46  ;;  %6644 = vmatprep.mubr.bf16.mxu1 %v9994_v55  ;;  %6081 = vmatprep.subr.bf16.mxu0 %v9262_v57  ;;  %v9283_v47 = vld [vmem:[#allocation8 + $0x680] ss:$12 sps:$4 sm:$0xff]   ;;  %v9290_v57 = vld [vmem:[#allocation8 + $0x758] ss:$12 sps:$4 sm:$0xff]  }
 0x2f1   :  { %v10277_v62 = vpack.c.bf16 %v3583_v36, %v3571_v24  ;;  %v10279_v34 = vpack.c.bf16 %v3585_v9, %v3573_v52  ;;  %v7562_v60 = vpop.f32.mrb[96].mxu1  ;;  %7810 = vmatprep.subr.bf16.mxu1 %v9274_v42  ;;  %v10695_v12 = vld [vmem:[#allocation17_spill] sm:$0xff]  ;;  %v9291_v40 = vld [vmem:[#allocation8 + $0x698] ss:$12 sps:$4 sm:$0xff]   ;;  %v9278_v24 = vld [vmem:[#allocation8 + $0x6dc] ss:$12 sps:$4 sm:$0xff]  }
 0x2f2   :  { %v7563_v2 = vpop.f32.mrb[97].mxu1  ;;  %7811 = vmatpush3.bf16.msra.mxu1 %v9275_v33  ;;  %v9271_v33 = vld [vmem:[#allocation8 + $0x6c0] ss:$12 sps:$4 sm:$0xff]   ;;  %v9298_v36 = vld [vmem:[#allocation8 + $0x770] ss:$12 sps:$4 sm:$0xff]   ;;  %v10696_v9 = vld [vmem:[#allocation16_spill] sm:$0xff] }
 0x2f3   :  { %v10281_v26 = vadd.f32 %v7563_v2, %v7562_v60  ;;  %6082 = vmatpush1.bf16.msra.mxu0 %v9260_v48  ;;  %v7565_v10 = vpop.f32.mrb[98].mxu1  ;;  %7812 = vmatprep.subr.bf16.mxu1 %v9282_v59  ;;  %v9273_v48 = vld [vmem:[#allocation8 + $0x6c4] ss:$12 sps:$4 sm:$0xff]   ;;  %v9306_v2 = vld [vmem:[#allocation8 + $0x848] ss:$12 sps:$4 sm:$0xff]  }
 0x2f4   :  { %v7566_v45 = vpop.f32.mrb[99].mxu1  ;;  %6083 = vmatprep.subr.bf16.mxu0 %v9265_v7  ;;  %v9299_v59 = vld [vmem:[#allocation8 + $0x6b0] ss:$12 sps:$4 sm:$0xff]   ;;  %v9276_v60 = vld [vmem:[#allocation8 + $0x6d8] ss:$12 sps:$4 sm:$0xff]  }
 0x2f5   :  { %v10283_v55 = vadd.f32 %v7566_v45, %v7565_v10  ;;  %v10697_v7 = vld [vmem:[#allocation19_spill] sm:$0xff] }
 0x2f6   :  { %6021 = vmatmul.mubr.bf16.gmra.mrb[108].mxu0 %v9989_v14  ;;  %6645 = vmatmul.mubr.bf16.gmra.mrb[204].mxu1 %v9989_v14  ;;  %v9281_v10 = vld [vmem:[#allocation8 + $0x6f4] ss:$12 sps:$4 sm:$0xff]  }
 0x2f7   :  { %6030 = vmatprep.mubr.bf16.mxu0 %v10695_v12  ;;  %6084 = vmatpush1.bf16.msra.mxu0 %v9263_v50 }
 0x2f8   :  { %6652 = vmatprep.mubr.bf16.mxu1 %v10695_v12  ;;  %6085 = vmatprep.subr.bf16.mxu0 %v9270_v53 }
 0x2f9   :  { %v7568_v42 = vpop.f32.mrb[100].mxu1  ;;  %7813 = vmatpush3.bf16.msra.mxu1 %v9283_v47 }
 0x2fa   :  { %v7569_v46 = vpop.f32.mrb[101].mxu1  ;;  %7814 = vmatprep.subr.bf16.mxu1 %v9290_v57  ;;  %v9279_v57 = vld [vmem:[#allocation8 + $0x6f0] ss:$12 sps:$4 sm:$0xff]  }
 0x2fb   :  { %v10289_v35 = vadd.f32 %v7569_v46, %v7568_v42  ;;  %6086 = vmatpush1.bf16.msra.mxu0 %v9268_v17  ;;  %v7571_v8 = vpop.f32.mrb[102].mxu1  ;;  %v9286_v17 = vld [vmem:[#allocation8 + $0x70c] ss:$12 sps:$4 sm:$0xff]   ;;  %v9289_v46 = vld [vmem:[#allocation8 + $0x724] ss:$12 sps:$4 sm:$0xff]  }
 0x2fc   :  { %v7572_v14 = vpop.f32.mrb[103].mxu1  ;;  %6087 = vmatprep.subr.bf16.mxu0 %v9273_v48  ;;  %v10698_v42 = vld [vmem:[#allocation18_spill] sm:$0xff] }
 0x2fd   :  { %v10291_v52 = vadd.f32 %v7572_v14, %v7571_v8  ;;  %7815 = vmatpush3.bf16.msra.mxu1 %v9291_v40  ;;  %v9284_v40 = vld [vmem:[#allocation8 + $0x708] ss:$12 sps:$4 sm:$0xff]  }
 0x2fe   :  { %6031 = vmatmul.mubr.bf16.gmra.mrb[112].mxu0 %v10696_v9  ;;  %6653 = vmatmul.mubr.bf16.gmra.mrb[208].mxu1 %v10696_v9 }
 0x2ff   :  { %6040 = vmatprep.mubr.bf16.mxu0 %v10697_v7  ;;  %6088 = vmatpush1.bf16.msra.mxu0 %v9271_v33 }
 0x300   :  { %6660 = vmatprep.mubr.bf16.mxu1 %v10697_v7  ;;  %6089 = vmatprep.subr.bf16.mxu0 %v9278_v24 }
 0x301   :  { %v7574_v50 = vpop.f32.mrb[104].mxu1  ;;  %7816 = vmatprep.subr.bf16.mxu1 %v9298_v36  ;;  %v9287_v36 = vld [vmem:[#allocation8 + $0x720] ss:$12 sps:$4 sm:$0xff]  }
 0x302   :  { %v7575_v45 = vpop.f32.mrb[105].mxu1  ;;  %7817 = vmatpush3.bf16.msra.mxu1 %v9299_v59  ;;  %v9294_v59 = vld [vmem:[#allocation8 + $0x73c] ss:$12 sps:$4 sm:$0xff]  }
 0x303   :  { %v10297_v53 = vadd.f32 %v7575_v45, %v7574_v50  ;;  %6090 = vmatpush1.bf16.msra.mxu0 %v9276_v60  ;;  %v7577_v47 = vpop.f32.mrb[106].mxu1  ;;  %7866 = vmatprep.subr.bf16.mxu1 %v9306_v2  ;;  %v10699_v60 = vld [vmem:[#allocation20_spill] sm:$0xff]  ;;  %v9297_v2 = vld [vmem:[#allocation8 + $0x754] ss:$12 sps:$4 sm:$0xff]  }
 0x304   :  { %v7578_v12 = vpop.f32.mrb[107].mxu1  ;;  %6091 = vmatprep.subr.bf16.mxu0 %v9281_v10 }
 0x305   :  { %v10299_v48 = vadd.f32 %v7578_v12, %v7577_v47 }
 0x306   :  { %6041 = vmatmul.mubr.bf16.gmra.mrb[116].mxu0 %v10698_v42  ;;  %6661 = vmatmul.mubr.bf16.gmra.mrb[212].mxu1 %v10698_v42 }
 0x307   :  { %6050 = vmatprep.mubr.bf16.mxu0 %v10054_v44  ;;  %6092 = vmatpush1.bf16.msra.mxu0 %v9279_v57  ;;  %v9295_v57 = vld [vmem:[#allocation8 + $0x750] ss:$12 sps:$4 sm:$0xff]  }
 0x308   :  { %6668 = vmatprep.mubr.bf16.mxu1 %v10054_v44  ;;  %6093 = vmatprep.subr.bf16.mxu0 %v9286_v17  ;;  %v9292_v44 = vld [vmem:[#allocation8 + $0x738] ss:$12 sps:$4 sm:$0xff]  }
 0x309   :  { %v7580_v8 = vpop.f32.mrb[108].mxu1  ;;  %v9302_v17 = vld [vmem:[#allocation8 + $0x76c] ss:$12 sps:$4 sm:$0xff]  }
 0x30a   :  { %v7581_v33 = vpop.f32.mrb[109].mxu1 }
 0x30b   :  { %v10305_v14 = vadd.f32 %v7581_v33, %v7580_v8  ;;  %6094 = vmatpush1.bf16.msra.mxu0 %v9284_v40  ;;  %v7583_v24 = vpop.f32.mrb[110].mxu1  ;;  %v9305_v40 = vld [vmem:[#allocation8 + $0x784] ss:$12 sps:$4 sm:$0xff]  }
 0x30c   :  { %v7584_v9 = vpop.f32.mrb[111].mxu1  ;;  %6095 = vmatprep.subr.bf16.mxu0 %v9289_v46 }
 0x30d   :  { %v10307_v7 = vadd.f32 %v7584_v9, %v7583_v24 }
 0x30e   :  { %6051 = vmatmul.mubr.bf16.gmra.mrb[120].mxu0 %v10699_v60  ;;  %6669 = vmatmul.mubr.bf16.gmra.mrb[216].mxu1 %v10699_v60 }
 0x30f   :  { %6060 = vmatprep.mubr.bf16.mxu0 %v10074_v22  ;;  %6096 = vmatpush1.bf16.msra.mxu0 %v9287_v36  ;;  %v9303_v36 = vld [vmem:[#allocation8 + $0x780] ss:$12 sps:$4 sm:$0xff]  }
 0x310   :  { %6676 = vmatprep.mubr.bf16.mxu1 %v10074_v22  ;;  %6097 = vmatprep.subr.bf16.mxu0 %v9294_v59  ;;  %v9300_v22 = vld [vmem:[#allocation8 + $0x768] ss:$12 sps:$4 sm:$0xff]  }
 0x311   :  { %v7586_v10 = vpop.f32.mrb[112].mxu1  ;;  %v9307_v59 = vld [vmem:[#allocation8 + $0x788] ss:$12 sps:$4 sm:$0xff]  }
 0x312   :  { %v7587_v50 = vpop.f32.mrb[113].mxu1 }
 0x313   :  { %v10313_v45 = vadd.f32 %v7587_v50, %v7586_v10  ;;  %6098 = vmatpush1.bf16.msra.mxu0 %v9292_v44  ;;  %v7589_v47 = vpop.f32.mrb[114].mxu1  ;;  %v9314_v44 = vld [vmem:[#allocation8 + $0x860] ss:$12 sps:$4 sm:$0xff]  }
 0x314   :  { %v7590_v12 = vpop.f32.mrb[115].mxu1  ;;  %6099 = vmatprep.subr.bf16.mxu0 %v9297_v2  ;;  %v9313_v2 = vld [vmem:[#allocation8 + $0x7b4] ss:$12 sps:$4 sm:$0xff]  }
 0x315   :  { %v10315_v42 = vadd.f32 %v7590_v12, %v7589_v47  ;;  %v9315_v10 = vld [vmem:[#allocation8 + $0x7a0] ss:$12 sps:$4 sm:$0xff]   ;;  %v9322_v47 = vld [vmem:[#allocation8 + $0x878] ss:$12 sps:$4 sm:$0xff]  }
 0x316   :  { %6061 = vmatmul.mubr.bf16.gmra.mrb[124].mxu0 %v10069_v32  ;;  %6677 = vmatmul.mubr.bf16.gmra.mrb[220].mxu1 %v10069_v32  ;;  %v9310_v32 = vld [vmem:[#allocation8 + $0x79c] ss:$12 sps:$4 sm:$0xff]  }
 0x317   :  { %6100 = vmatpush1.bf16.msra.mxu0 %v9295_v57  ;;  %6103 = vmatprep.mubr.bf16.mxu0 %v10137_v11 }
 0x318   :  { %6717 = vmatprep.mubr.bf16.mxu1 %v10137_v11  ;;  %6101 = vmatprep.subr.bf16.mxu0 %v9302_v17  ;;  %v9308_v11 = vld [vmem:[#allocation8 + $0x798] ss:$12 sps:$4 sm:$0xff]  }
 0x319   :  { %v7592_v46 = vpop.f32.mrb[116].mxu1 }
 0x31a   :  { %v7593_v8 = vpop.f32.mrb[117].mxu1 }
 0x31b   :  { %v10321_v33 = vadd.f32 %v7593_v8, %v7592_v46  ;;  %6102 = vmatpush1.bf16.msra.mxu0 %v9300_v22  ;;  %v7595_v24 = vpop.f32.mrb[118].mxu1  ;;  %v9311_v22 = vld [vmem:[#allocation8 + $0x7b0] ss:$12 sps:$4 sm:$0xff]  }
 0x31c   :  { %v7596_v9 = vpop.f32.mrb[119].mxu1  ;;  %6184 = vmatprep.subr.bf16.mxu0 %v9305_v40  ;;  %v9318_v40 = vld [vmem:[#allocation8 + $0x7cc] ss:$12 sps:$4 sm:$0xff]   ;;  %v9330_v8 = vld [vmem:[#allocation8 + $0x890] ss:$12 sps:$4 sm:$0xff]  }
 0x31d   :  { %v10323_v60 = vadd.f32 %v7596_v9, %v7595_v24  ;;  %v9316_v24 = vld [vmem:[#allocation8 + $0x7c8] ss:$12 sps:$4 sm:$0xff]  }
 0x31e   :  { %6104 = vmatmul.mubr.bf16.vlgmr.msra.gmra.mrb[96].mxu0 %v10132_v37  ;;  %6718 = vmatmul.mubr.bf16.vlgmr.msra.gmra.mrb[224].mxu1 %v10132_v37 }
 0x31f   :  { %6113 = vmatprep.mubr.bf16.mxu0 %v10157_v43  ;;  %6185 = vmatpush1.bf16.msra.mxu0 %v9303_v36  ;;  %v9321_v36 = vld [vmem:[#allocation8 + $0x7e4] ss:$12 sps:$4 sm:$0xff]  }
 0x320   :  { %6725 = vmatprep.mubr.bf16.mxu1 %v10157_v43  ;;  %7867 = vmatpush3.bf16.msra.mxu1 %v9307_v59  ;;  %v9323_v43 = vld [vmem:[#allocation8 + $0x7b8] ss:$12 sps:$4 sm:$0xff]   ;;  %v9331_v59 = vld [vmem:[#allocation8 + $0x7d0] ss:$12 sps:$4 sm:$0xff]  }
 0x321   :  { %v7598_v50 = vpop.f32.mrb[120].mxu1  ;;  %6186 = vmatprep.subr.bf16.mxu0 %v9310_v32  ;;  %7868 = vmatprep.subr.bf16.mxu1 %v9314_v44 }
 0x322   :  { %v7599_v57 = vpop.f32.mrb[121].mxu1 }
 0x323   :  { %v10329_v12 = vadd.f32 %v7599_v57, %v7598_v50  ;;  %6187 = vmatpush1.bf16.msra.mxu0 %v9308_v11  ;;  %v7601_v17 = vpop.f32.mrb[122].mxu1  ;;  %v9326_v50 = vld [vmem:[#allocation8 + $0x7fc] ss:$12 sps:$4 sm:$0xff]  }
 0x324   :  { %v7602_v37 = vpop.f32.mrb[123].mxu1  ;;  %6188 = vmatprep.subr.bf16.mxu0 %v9313_v2  ;;  %7869 = vmatpush3.bf16.msra.mxu1 %v9315_v10  ;;  %v9319_v2 = vld [vmem:[#allocation8 + $0x7e0] ss:$12 sps:$4 sm:$0xff]   ;;  %v9339_v57 = vld [vmem:[#allocation8 + $0x7e8] ss:$12 sps:$4 sm:$0xff]  }
 0x325   :  { %v10331_v46 = vadd.f32 %v7602_v37, %v7601_v17  ;;  %7870 = vmatprep.subr.bf16.mxu1 %v9322_v47  ;;  %v9346_v37 = vld [vmem:[#allocation8 + $0x8c0] ss:$12 sps:$4 sm:$0xff]  }
 0x326   :  { %6114 = vmatmul.mubr.bf16.gmra.mrb[100].mxu0 %v10152_v39  ;;  %6726 = vmatmul.mubr.bf16.gmra.mrb[228].mxu1 %v10152_v39  ;;  %v10339_v39 = vld [vmem:[#allocation10] sm:$0x7] }
 0x327   :  { %6123 = vmatprep.mubr.bf16.mxu0 %v10177_v16  ;;  %6189 = vmatpush1.bf16.msra.mxu0 %v9311_v22  ;;  %v10347_v17 = vrot.slane %v10339_v39, %v9727_v19  ;;  %v9324_v22 = vld [vmem:[#allocation8 + $0x7f8] ss:$12 sps:$4 sm:$0xff]  }
 0x328   :  { %6733 = vmatprep.mubr.bf16.mxu1 %v10177_v16  ;;  %6190 = vmatprep.subr.bf16.mxu0 %v9318_v40  ;;  %v9338_v16 = vld [vmem:[#allocation8 + $0x8a8] ss:$12 sps:$4 sm:$0xff]  }
 0x329   :  { %v7604_v9 = vpop.f32.mrb[124].mxu1  ;;  %7871 = vmatpush3.bf16.msra.mxu1 %v9323_v43  ;;  %v9329_v40 = vld [vmem:[#allocation8 + $0x814] ss:$12 sps:$4 sm:$0xff]  }
 0x32a   :  { %v7605_v32 = vpop.f32.mrb[125].mxu1  ;;  %7872 = vmatprep.subr.bf16.mxu1 %v9330_v8 }
 0x32b   :  { %v10337_v44 = vadd.f32 %v7605_v32, %v7604_v9  ;;  %6191 = vmatpush1.bf16.msra.mxu0 %v9316_v24  ;;  %v7607_v11 = vpop.f32.mrb[126].mxu1 }
 0x32c   :  { %v7608_v10 = vpop.f32.mrb[127].mxu1  ;;  %6192 = vmatprep.subr.bf16.mxu0 %v9321_v36  ;;  %v9327_v36 = vld [vmem:[#allocation8 + $0x810] ss:$12 sps:$4 sm:$0xff]  }
 0x32d   :  { %v10341_v47 = vadd.f32 %v7608_v10, %v7607_v11  ;;  %7873 = vmatpush3.bf16.msra.mxu1 %v9331_v59  ;;  %v9334_v59 = vld [vmem:[#allocation8 + $0x82c] ss:$12 sps:$4 sm:$0xff]  }
 0x32e   :  { %6124 = vmatmul.mubr.bf16.gmra.mrb[104].mxu0 %v10172_v31  ;;  %6734 = vmatmul.mubr.bf16.gmra.mrb[232].mxu1 %v10172_v31  ;;  %v6332_v31 = vadd.f32 %v10281_v26, %v10347_v17  ;;  %v9354_v26 = vld [vmem:[#allocation8 + $0x8d8] ss:$12 sps:$4 sm:$0xff]  }
 0x32f   :  { %6133 = vmatprep.mubr.bf16.mxu0 %v10197_v4  ;;  %6193 = vmatpush1.bf16.msra.mxu0 %v9319_v2  ;;  %v9347_v2 = vld [vmem:[#allocation8 + $0x800] ss:$12 sps:$4 sm:$0xff]  }
 0x330   :  { %6741 = vmatprep.mubr.bf16.mxu1 %v10197_v4  ;;  %6194 = vmatprep.subr.bf16.mxu0 %v9326_v50  ;;  %v6335_v4 = vadd.f32 %v10283_v55, %v10347_v17  ;;  %v9332_v50 = vld [vmem:[#allocation8 + $0x828] ss:$12 sps:$4 sm:$0xff]  }
 0x331   :  { %v7626_v43 = vpop.f32.mrb[128].mxu1  ;;  %7874 = vmatprep.subr.bf16.mxu1 %v9338_v16  ;;  %v9337_v16 = vld [vmem:[#allocation8 + $0x844] ss:$12 sps:$4 sm:$0xff]  }
 0x332   :  { %v7627_v8 = vpop.f32.mrb[129].mxu1  ;;  %7875 = vmatpush3.bf16.msra.mxu1 %v9339_v57  ;;  %v9355_v57 = vld [vmem:[#allocation8 + $0x818] ss:$12 sps:$4 sm:$0xff]  }
 0x333   :  { %v7628_v24 = vadd.f32 %v7627_v8, %v7626_v43  ;;  %6195 = vmatpush1.bf16.msra.mxu0 %v9324_v22  ;;  %v7629_v19 = vpop.f32.mrb[130].mxu1  ;;  %7876 = vmatprep.subr.bf16.mxu1 %v9346_v37  ;;  %v6340_v37 = vadd.f32 %v10289_v35, %v10347_v17  ;;  %v9335_v43 = vld [vmem:[#allocation8 + $0x840] ss:$12 sps:$4 sm:$0xff]   ;;  %v9363_v35 = vld [vmem:[#allocation8 + $0x830] ss:$12 sps:$4 sm:$0xff]  }
 0x334   :  { %v7630_v9 = vpop.f32.mrb[131].mxu1  ;;  %6196 = vmatprep.subr.bf16.mxu0 %v9329_v40 }
 0x335   :  { %v10355_v32 = vadd.f32 %v7628_v24, %v6332_v31  ;;  %v7631_v11 = vadd.f32 %v7630_v9, %v7629_v19  ;;  %v9342_v31 = vld [vmem:[#allocation8 + $0x85c] ss:$12 sps:$4 sm:$0xff]  }
 0x336   :  { %6134 = vmatmul.mubr.bf16.gmra.mrb[108].mxu0 %v10192_v18  ;;  %6742 = vmatmul.mubr.bf16.gmra.mrb[236].mxu1 %v10192_v18 }
 0x337   :  { %v10359_v10 = vadd.f32 %v7631_v11, %v6335_v4  ;;  %6143 = vmatprep.mubr.bf16.mxu0 %v10217_v25  ;;  %6197 = vmatpush1.bf16.msra.mxu0 %v9327_v36  ;;  %v9362_v36 = vld [vmem:[#allocation8 + $0x8f0] ss:$12 sps:$4 sm:$0xff]  }
 0x338   :  { %6749 = vmatprep.mubr.bf16.mxu1 %v10217_v25  ;;  %6198 = vmatprep.subr.bf16.mxu0 %v9334_v59  ;;  %v6343_v25 = vadd.f32 %v10291_v52, %v10347_v17  ;;  %v9340_v59 = vld [vmem:[#allocation8 + $0x858] ss:$12 sps:$4 sm:$0xff]   ;;  %v9345_v52 = vld [vmem:[#allocation8 + $0x874] ss:$12 sps:$4 sm:$0xff]  }
 0x339   :  { %v7632_v55 = vpop.f32.mrb[132].mxu1  ;;  %7877 = vmatpush3.bf16.msra.mxu1 %v9347_v2  ;;  %v6348_v2 = vadd.f32 %v10297_v53, %v10347_v17  ;;  %v9348_v53 = vld [vmem:[#allocation8 + $0x888] ss:$12 sps:$4 sm:$0xff]  }
 0x33a   :  { %v7633_v22 = vpop.f32.mrb[133].mxu1  ;;  %7878 = vmatprep.subr.bf16.mxu1 %v9354_v26 }
 0x33b   :  { %v7634_v18 = vadd.f32 %v7633_v22, %v7632_v55  ;;  %6199 = vmatpush1.bf16.msra.mxu0 %v9332_v50  ;;  %v7635_v40 = vpop.f32.mrb[134].mxu1  ;;  %v9343_v50 = vld [vmem:[#allocation8 + $0x870] ss:$12 sps:$4 sm:$0xff]   ;;  %v9350_v55 = vld [vmem:[#allocation8 + $0x88c] ss:$12 sps:$4 sm:$0xff]  }
 0x33c   :  { %v7636_v8 = vpop.f32.mrb[135].mxu1  ;;  %6200 = vmatprep.subr.bf16.mxu0 %v9337_v16 }
 0x33d   :  { %v10367_v24 = vadd.f32 %v7634_v18, %v6340_v37  ;;  %v7637_v19 = vadd.f32 %v7636_v8, %v7635_v40  ;;  %7879 = vmatpush3.bf16.msra.mxu1 %v9355_v57  ;;  %v6351_v57 = vadd.f32 %v10299_v48, %v10347_v17  ;;  %v9353_v18 = vld [vmem:[#allocation8 + $0x8a4] ss:$12 sps:$4 sm:$0xff]   ;;  %v6356_v48 = vadd.f32 %v10305_v14, %v10347_v17 }
 0x33e   :  { %6144 = vmatmul.mubr.bf16.gmra.mrb[112].mxu0 %v10212_v0  ;;  %6750 = vmatmul.mubr.bf16.gmra.mrb[240].mxu1 %v10212_v0  ;;  %v9356_v14 = vld [vmem:[#allocation8 + $0x8b8] ss:$12 sps:$4 sm:$0xff]  }
 0x33f   :  { %v10371_v9 = vadd.f32 %v7637_v19, %v6343_v25  ;;  %6153 = vmatprep.mubr.bf16.mxu0 %v10237_v20  ;;  %6201 = vmatpush1.bf16.msra.mxu0 %v9335_v43  ;;  %v9351_v25 = vld [vmem:[#allocation8 + $0x8a0] ss:$12 sps:$4 sm:$0xff]   ;;  %v9358_v19 = vld [vmem:[#allocation8 + $0x8bc] ss:$12 sps:$4 sm:$0xff]  }
 0x340   :  { %6757 = vmatprep.mubr.bf16.mxu1 %v10237_v20  ;;  %6202 = vmatprep.subr.bf16.mxu0 %v9342_v31 }
 0x341   :  { %v7638_v4 = vpop.f32.mrb[136].mxu1  ;;  %7880 = vmatprep.subr.bf16.mxu1 %v9362_v36  ;;  %v6359_v36 = vadd.f32 %v10307_v7, %v10347_v17  ;;  %v6364_v7 = vadd.f32 %v10313_v45, %v10347_v17  ;;  %v9364_v45 = vld [vmem:[#allocation8 + $0x8e8] ss:$12 sps:$4 sm:$0xff]  }
 0x342   :  { %v7639_v11 = vpop.f32.mrb[137].mxu1  ;;  %7881 = vmatpush3.bf16.msra.mxu1 %v9363_v35 }
 0x343   :  { %v7640_v26 = vadd.f32 %v7639_v11, %v7638_v4  ;;  %6203 = vmatpush1.bf16.msra.mxu0 %v9340_v59  ;;  %v7641_v0 = vpop.f32.mrb[138].mxu1 }
 0x344   :  { %v7642_v16 = vpop.f32.mrb[139].mxu1  ;;  %6204 = vmatprep.subr.bf16.mxu0 %v9345_v52  ;;  %v9361_v52 = vld [vmem:[#allocation8 + $0x8d4] ss:$12 sps:$4 sm:$0xff]  }
 0x345   :  { %v10379_v20 = vadd.f32 %v7640_v26, %v6348_v2  ;;  %v7643_v22 = vadd.f32 %v7642_v16, %v7641_v0  ;;  %v9359_v0 = vld [vmem:[#allocation8 + $0x8d0] ss:$12 sps:$4 sm:$0xff]   ;;  %v6367_v16 = vadd.f32 %v10315_v42, %v10347_v17  ;;  %v6372_v42 = vadd.f32 %v10321_v33, %v10347_v17 }
 0x346   :  { %6154 = vmatmul.mubr.bf16.gmra.mrb[116].mxu0 %v10232_v27  ;;  %6758 = vmatmul.mubr.bf16.gmra.mrb[244].mxu1 %v10232_v27 }
 0x347   :  { %v10383_v37 = vadd.f32 %v7643_v22, %v6351_v57  ;;  %6163 = vmatprep.mubr.bf16.mxu0 %v10257_v23  ;;  %6205 = vmatpush1.bf16.msra.mxu0 %v9343_v50  ;;  %v9366_v50 = vld [vmem:[#allocation8 + $0x8ec] ss:$12 sps:$4 sm:$0xff]  }
 0x348   :  { %6765 = vmatprep.mubr.bf16.mxu1 %v10257_v23  ;;  %6206 = vmatprep.subr.bf16.mxu0 %v9350_v55 }
 0x349   :  { %v7644_v40 = vpop.f32.mrb[140].mxu1 }
 0x34a   :  { %v7645_v43 = vpop.f32.mrb[141].mxu1 }
 0x34b   :  { %v7646_v8 = vadd.f32 %v7645_v43, %v7644_v40  ;;  %6207 = vmatpush1.bf16.msra.mxu0 %v9348_v53  ;;  %v7647_v31 = vpop.f32.mrb[142].mxu1 }
 0x34c   :  { %v7648_v27 = vpop.f32.mrb[143].mxu1  ;;  %6208 = vmatprep.subr.bf16.mxu0 %v9353_v18 }
 0x34d   :  { %v10391_v35 = vadd.f32 %v7646_v8, %v6356_v48  ;;  %v7649_v23 = vadd.f32 %v7648_v27, %v7647_v31 }
 0x34e   :  { %6164 = vmatmul.mubr.bf16.gmra.mrb[120].mxu0 %v10252_v28  ;;  %6766 = vmatmul.mubr.bf16.gmra.mrb[248].mxu1 %v10252_v28 }
 0x34f   :  { %v10395_v59 = vadd.f32 %v7649_v23, %v6359_v36  ;;  %6173 = vmatprep.mubr.bf16.mxu0 %v10277_v62  ;;  %6209 = vmatpush1.bf16.msra.mxu0 %v9351_v25  ;;  %v6380_v25 = vadd.f32 %v10329_v12, %v10347_v17  ;;  %v6383_v36 = vadd.f32 %v10331_v46, %v10347_v17 }
 0x350   :  { %6773 = vmatprep.mubr.bf16.mxu1 %v10277_v62  ;;  %6210 = vmatprep.subr.bf16.mxu0 %v9358_v19 }
 0x351   :  { %v7650_v4 = vpop.f32.mrb[144].mxu1 }
 0x352   :  { %v7651_v11 = vpop.f32.mrb[145].mxu1 }
 0x353   :  { %v7652_v2 = vadd.f32 %v7651_v11, %v7650_v4  ;;  %6211 = vmatpush1.bf16.msra.mxu0 %v9356_v14  ;;  %v7653_v26 = vpop.f32.mrb[146].mxu1 }
 0x354   :  { %v7654_v28 = vpop.f32.mrb[147].mxu1  ;;  %6212 = vmatprep.subr.bf16.mxu0 %v9361_v52  ;;  %v6388_v52 = vadd.f32 %v10337_v44, %v10347_v17 }
 0x355   :  { %v10403_v55 = vadd.f32 %v7652_v2, %v6364_v7  ;;  %v7655_v62 = vadd.f32 %v7654_v28, %v7653_v26  ;;  %v6391_v7 = vadd.f32 %v10341_v47, %v10347_v17 }
 0x356   :  { %6174 = vmatmul.mubr.bf16.gmra.mrb[124].mxu0 %v10272_v15  ;;  %6774 = vmatmul.mubr.bf16.gmra.mrb[252].mxu1 %v10272_v15  ;;  %v6375_v15 = vadd.f32 %v10323_v60, %v10347_v17 }
 0x357   :  { %v10407_v57 = vadd.f32 %v7655_v62, %v6367_v16  ;;  %6213 = vmatpush1.bf16.msra.mxu0 %v9359_v0  ;;  %6216 = vmatprep.mubr.bf16.mxu0 %v10139_v51 }
 0x358   :  { %6814 = vmatprep.mubr.bf16.mxu1 %v10139_v51  ;;  %6214 = vmatprep.subr.bf16.mxu0 %v9366_v50 }
 0x359   :  { %v7656_v22 = vpop.f32.mrb[148].mxu1 }
 0x35a   :  { %v7657_v53 = vpop.f32.mrb[149].mxu1 }
 0x35b   :  { %v7658_v18 = vadd.f32 %v7657_v53, %v7656_v22  ;;  %6215 = vmatpush1.bf16.msra.mxu0 %v9364_v45  ;;  %v7659_v40 = vpop.f32.mrb[150].mxu1 }
 0x35c   :  { %v7660_v43 = vpop.f32.mrb[151].mxu1 }
 0x35d   :  { %v10415_v48 = vadd.f32 %v7658_v18, %v6372_v42  ;;  %v7661_v8 = vadd.f32 %v7660_v43, %v7659_v40 }
 0x35e   :  { %6217 = vmatmul.mubr.bf16.vlgmr.msra.gmra.mrb[96].mxu0 %v10134_v56  ;;  %6815 = vmatmul.mubr.bf16.vlgmr.msra.gmra.mrb[0].mxu1 %v10134_v56 }
 0x35f   :  { %v10419_v51 = vadd.f32 %v7661_v8, %v6375_v15  ;;  %6226 = vmatprep.mubr.bf16.mxu0 %v10159_v1  ;;  %6822 = vmatprep.mubr.bf16.mxu1 %v10159_v1 }
 0x361   :  { %v7662_v33 = vpop.f32.mrb[152].mxu1 }
 0x362   :  { %v7663_v31 = vpop.f32.mrb[153].mxu1 }
 0x363   :  { %v7664_v27 = vadd.f32 %v7663_v31, %v7662_v33  ;;  %v7665_v60 = vpop.f32.mrb[154].mxu1 }
 0x364   :  { %v7666_v19 = vpop.f32.mrb[155].mxu1 }
 0x365   :  { %v10427_v23 = vadd.f32 %v7664_v27, %v6380_v25  ;;  %v7667_v56 = vadd.f32 %v7666_v19, %v7665_v60 }
 0x366   :  { %6227 = vmatmul.mubr.bf16.gmra.mrb[100].mxu0 %v10154_v63  ;;  %6823 = vmatmul.mubr.bf16.gmra.mrb[4].mxu1 %v10154_v63 }
 0x367   :  { %v10431_v14 = vadd.f32 %v7667_v56, %v6383_v36  ;;  %6236 = vmatprep.mubr.bf16.mxu0 %v10179_v5  ;;  %6830 = vmatprep.mubr.bf16.mxu1 %v10179_v5 }
 0x369   :  { %v7668_v1 = vpop.f32.mrb[156].mxu1 }
 0x36a   :  { %v7669_v12 = vpop.f32.mrb[157].mxu1 }
 0x36b   :  { %v7670_v4 = vadd.f32 %v7669_v12, %v7668_v1  ;;  %v7671_v46 = vpop.f32.mrb[158].mxu1 }
 0x36c   :  { %v7672_v11 = vpop.f32.mrb[159].mxu1 }
 0x36d   :  { %v10439_v2 = vadd.f32 %v7670_v4, %v6388_v52  ;;  %v7673_v63 = vadd.f32 %v7672_v11, %v7671_v46 }
 0x36e   :  { %6237 = vmatmul.mubr.bf16.gmra.mrb[104].mxu0 %v10174_v30  ;;  %6831 = vmatmul.mubr.bf16.gmra.mrb[8].mxu1 %v10174_v30 }
 0x36f   :  { %v10443_v26 = vadd.f32 %v7673_v63, %v6391_v7  ;;  %6246 = vmatprep.mubr.bf16.mxu0 %v10199_v38  ;;  %6838 = vmatprep.mubr.bf16.mxu1 %v10199_v38 }
 0x371   :  { %v7690_v5 = vpop.f32.mrb[160].mxu1 }
 0x372   :  { %v7691_v44 = vpop.f32.mrb[161].mxu1 }
 0x373   :  { %v7692_v0 = vadd.f32 %v7691_v44, %v7690_v5  ;;  %v7693_v28 = vpop.f32.mrb[162].mxu1 }
 0x374   :  { %v7694_v50 = vpop.f32.mrb[163].mxu1 }
 0x375   :  { %v10448_v47 = vadd.f32 %v7692_v0, %v10355_v32  ;;  %v7695_v17 = vadd.f32 %v7694_v50, %v7693_v28 }
 0x376   :  { %6247 = vmatmul.mubr.bf16.gmra.mrb[108].mxu0 %v10194_v61  ;;  %6839 = vmatmul.mubr.bf16.gmra.mrb[12].mxu1 %v10194_v61 }
 0x377   :  { %v10453_v30 = vadd.f32 %v7695_v17, %v10359_v10  ;;  %6256 = vmatprep.mubr.bf16.mxu0 %v10219_v49  ;;  %6846 = vmatprep.mubr.bf16.mxu1 %v10219_v49 }
 0x379   :  { %v7696_v38 = vpop.f32.mrb[164].mxu1 }
 0x37a   :  { %v7697_v16 = vpop.f32.mrb[165].mxu1 }
 0x37b   :  { %v7698_v62 = vadd.f32 %v7697_v16, %v7696_v38  ;;  %v7699_v45 = vpop.f32.mrb[166].mxu1 }
 0x37c   :  { %v7700_v22 = vpop.f32.mrb[167].mxu1 }
 0x37d   :  { %v10458_v32 = vadd.f32 %v7698_v62, %v10367_v24  ;;  %v7701_v53 = vadd.f32 %v7700_v22, %v7699_v45 }
 0x37e   :  { %6257 = vmatmul.mubr.bf16.gmra.mrb[112].mxu0 %v10214_v29  ;;  %6847 = vmatmul.mubr.bf16.gmra.mrb[16].mxu1 %v10214_v29 }
 0x37f   :  { %v10463_v61 = vadd.f32 %v7701_v53, %v10371_v9  ;;  %6266 = vmatprep.mubr.bf16.mxu0 %v10239_v21  ;;  %6854 = vmatprep.mubr.bf16.mxu1 %v10239_v21 }
 0x381   :  { %v7702_v49 = vpop.f32.mrb[168].mxu1 }
 0x382   :  { %v7703_v10 = vpop.f32.mrb[169].mxu1 }
 0x383   :  { %v7704_v42 = vadd.f32 %v7703_v10, %v7702_v49  ;;  %v7705_v18 = vpop.f32.mrb[170].mxu1 }
 0x384   :  { %v7706_v40 = vpop.f32.mrb[171].mxu1 }
 0x385   :  { %v10468_v24 = vadd.f32 %v7704_v42, %v10379_v20  ;;  %v7707_v43 = vadd.f32 %v7706_v40, %v7705_v18 }
 0x386   :  { %6267 = vmatmul.mubr.bf16.gmra.mrb[116].mxu0 %v10234_v41  ;;  %6855 = vmatmul.mubr.bf16.gmra.mrb[20].mxu1 %v10234_v41 }
 0x387   :  { %v10473_v29 = vadd.f32 %v7707_v43, %v10383_v37  ;;  %6276 = vmatprep.mubr.bf16.mxu0 %v10259_v13  ;;  %6862 = vmatprep.mubr.bf16.mxu1 %v10259_v13 }
 0x389   :  { %v7708_v21 = vpop.f32.mrb[172].mxu1 }
 0x38a   :  { %v7709_v9 = vpop.f32.mrb[173].mxu1 }
 0x38b   :  { %v7710_v15 = vadd.f32 %v7709_v9, %v7708_v21  ;;  %v7711_v8 = vpop.f32.mrb[174].mxu1 }
 0x38c   :  { %v7712_v33 = vpop.f32.mrb[175].mxu1 }
 0x38d   :  { %v10478_v20 = vadd.f32 %v7710_v15, %v10391_v35  ;;  %v7713_v31 = vadd.f32 %v7712_v33, %v7711_v8 }
 0x38e   :  { %6277 = vmatmul.mubr.bf16.gmra.mrb[120].mxu0 %v10254_v58  ;;  %6863 = vmatmul.mubr.bf16.gmra.mrb[24].mxu1 %v10254_v58 }
 0x38f   :  { %v10483_v41 = vadd.f32 %v7713_v31, %v10395_v59  ;;  %6286 = vmatprep.mubr.bf16.mxu0 %v10279_v34  ;;  %6870 = vmatprep.mubr.bf16.mxu1 %v10279_v34 }
 0x391   :  { %v7714_v13 = vpop.f32.mrb[176].mxu1 }
 0x392   :  { %v7715_v37 = vpop.f32.mrb[177].mxu1 }
 0x393   :  { %v7716_v25 = vadd.f32 %v7715_v37, %v7714_v13  ;;  %v7717_v27 = vpop.f32.mrb[178].mxu1 }
 0x394   :  { %v7718_v60 = vpop.f32.mrb[179].mxu1 }
 0x395   :  { %v10488_v35 = vadd.f32 %v7716_v25, %v10403_v55  ;;  %v7719_v19 = vadd.f32 %v7718_v60, %v7717_v27 }
 0x396   :  { %6287 = vmatmul.mubr.bf16.gmra.mrb[124].mxu0 %v10274_v54  ;;  %6871 = vmatmul.mubr.bf16.gmra.mrb[28].mxu1 %v10274_v54 }
 0x397   :  { %v10493_v58 = vadd.f32 %v7719_v19, %v10407_v57 }
 0x399   :  { %v7720_v59 = vpop.f32.mrb[180].mxu1 }
 0x39a   :  { %v7721_v36 = vpop.f32.mrb[181].mxu1 }
 0x39b   :  { %v7722_v56 = vadd.f32 %v7721_v36, %v7720_v59  ;;  %v7723_v34 = vpop.f32.mrb[182].mxu1 }
 0x39c   :  { %v7724_v1 = vpop.f32.mrb[183].mxu1 }
 0x39d   :  { %v10496_v12 = vadd.f32 %v7722_v56, %v10415_v48  ;;  %v7725_v52 = vadd.f32 %v7724_v1, %v7723_v34 }
 0x39f   :  { %v10499_v55 = vadd.f32 %v7725_v52, %v10419_v51 }
 0x3a1   :  { %v7726_v4 = vpop.f32.mrb[184].mxu1 }
 0x3a2   :  { %v7727_v46 = vpop.f32.mrb[185].mxu1 }
 0x3a3   :  { %v7728_v11 = vadd.f32 %v7727_v46, %v7726_v4  ;;  %v7729_v7 = vpop.f32.mrb[186].mxu1 }
 0x3a4   :  { %v7730_v54 = vpop.f32.mrb[187].mxu1 }
 0x3a5   :  { %v10502_v57 = vadd.f32 %v7728_v11, %v10427_v23  ;;  %v7731_v63 = vadd.f32 %v7730_v54, %v7729_v7 }
 0x3a7   :  { %v10505_v5 = vadd.f32 %v7731_v63, %v10431_v14 }
 0x3a9   :  { %v7732_v44 = vpop.f32.mrb[188].mxu1 }
 0x3aa   :  { %v7733_v0 = vpop.f32.mrb[189].mxu1 }
 0x3ab   :  { %v7734_v48 = vadd.f32 %v7733_v0, %v7732_v44  ;;  %v7735_v28 = vpop.f32.mrb[190].mxu1 }
 0x3ac   :  { %v7736_v50 = vpop.f32.mrb[191].mxu1 }
 0x3ad   :  { %v10508_v51 = vadd.f32 %v7734_v48, %v10439_v2  ;;  %v7737_v17 = vadd.f32 %v7736_v50, %v7735_v28 }
 0x3af   :  { %v10511_v38 = vadd.f32 %v7737_v17, %v10443_v26 }
 0x3b1   :  { %v7754_v16 = vpop.f32.mrb[192].mxu1 }
 0x3b2   :  { %v7755_v62 = vpop.f32.mrb[193].mxu1 }
 0x3b3   :  { %v7756_v23 = vadd.f32 %v7755_v62, %v7754_v16  ;;  %v7757_v45 = vpop.f32.mrb[194].mxu1 }
 0x3b4   :  { %v7758_v22 = vpop.f32.mrb[195].mxu1 }
 0x3b5   :  { %v10514_v14 = vadd.f32 %v7756_v23, %v10448_v47  ;;  %v7759_v53 = vadd.f32 %v7758_v22, %v7757_v45 }
 0x3b7   :  { %v10517_v49 = vadd.f32 %v7759_v53, %v10453_v30 }
 0x3b9   :  { %v7760_v10 = vpop.f32.mrb[196].mxu1 }
 0x3ba   :  { %v7761_v42 = vpop.f32.mrb[197].mxu1 }
 0x3bb   :  { %v7762_v2 = vadd.f32 %v7761_v42, %v7760_v10  ;;  %v7763_v18 = vpop.f32.mrb[198].mxu1 }
 0x3bc   :  { %v7764_v40 = vpop.f32.mrb[199].mxu1 }
 0x3bd   :  { %v10520_v26 = vadd.f32 %v7762_v2, %v10458_v32  ;;  %v7765_v43 = vadd.f32 %v7764_v40, %v7763_v18 }
 0x3bf   :  { %v10523_v21 = vadd.f32 %v7765_v43, %v10463_v61 }
 0x3c1   :  { %v7766_v9 = vpop.f32.mrb[200].mxu1 }
 0x3c2   :  { %v7767_v15 = vpop.f32.mrb[201].mxu1 }
 0x3c3   :  { %v7768_v47 = vadd.f32 %v7767_v15, %v7766_v9  ;;  %v7769_v8 = vpop.f32.mrb[202].mxu1 }
 0x3c4   :  { %v7770_v33 = vpop.f32.mrb[203].mxu1 }
 0x3c5   :  { %v10526_v30 = vadd.f32 %v7768_v47, %v10468_v24  ;;  %v7771_v31 = vadd.f32 %v7770_v33, %v7769_v8 }
 0x3c7   :  { %v10529_v13 = vadd.f32 %v7771_v31, %v10473_v29 }
 0x3c9   :  { %v7772_v37 = vpop.f32.mrb[204].mxu1 }
 0x3ca   :  { %v7773_v25 = vpop.f32.mrb[205].mxu1 }
 0x3cb   :  { %v7774_v32 = vadd.f32 %v7773_v25, %v7772_v37  ;;  %v7775_v27 = vpop.f32.mrb[206].mxu1 }
 0x3cc   :  { %v7776_v60 = vpop.f32.mrb[207].mxu1 }
 0x3cd   :  { %v10532_v61 = vadd.f32 %v7774_v32, %v10478_v20  ;;  %v7777_v19 = vadd.f32 %v7776_v60, %v7775_v27 }
 0x3cf   :  { %v10535_v59 = vadd.f32 %v7777_v19, %v10483_v41 }
 0x3d1   :  { %v7778_v36 = vpop.f32.mrb[208].mxu1 }
 0x3d2   :  { %v7779_v56 = vpop.f32.mrb[209].mxu1 }
 0x3d3   :  { %v7780_v24 = vadd.f32 %v7779_v56, %v7778_v36  ;;  %v7781_v34 = vpop.f32.mrb[210].mxu1 }
 0x3d4   :  { %v7782_v1 = vpop.f32.mrb[211].mxu1 }
 0x3d5   :  { %v10538_v29 = vadd.f32 %v7780_v24, %v10488_v35  ;;  %v7783_v52 = vadd.f32 %v7782_v1, %v7781_v34 }
 0x3d7   :  { %v10541_v4 = vadd.f32 %v7783_v52, %v10493_v58 }
 0x3d9   :  { %v7784_v46 = vpop.f32.mrb[212].mxu1 }
 0x3da   :  { %v7785_v11 = vpop.f32.mrb[213].mxu1 }
 0x3db   :  { %v7786_v20 = vadd.f32 %v7785_v11, %v7784_v46  ;;  %v7787_v7 = vpop.f32.mrb[214].mxu1 }
 0x3dc   :  { %v7788_v54 = vpop.f32.mrb[215].mxu1 }
 0x3dd   :  { %v10544_v41 = vadd.f32 %v7786_v20, %v10496_v12  ;;  %v7789_v63 = vadd.f32 %v7788_v54, %v7787_v7 }
 0x3df   :  { %v10547_v44 = vadd.f32 %v7789_v63, %v10499_v55 }
 0x3e1   :  { %v7790_v0 = vpop.f32.mrb[216].mxu1 }
 0x3e2   :  { %v7791_v48 = vpop.f32.mrb[217].mxu1 }
 0x3e3   :  { %v7792_v35 = vadd.f32 %v7791_v48, %v7790_v0  ;;  %v7793_v28 = vpop.f32.mrb[218].mxu1 }
 0x3e4   :  { %v7794_v50 = vpop.f32.mrb[219].mxu1 }
 0x3e5   :  { %v10550_v58 = vadd.f32 %v7792_v35, %v10502_v57  ;;  %v7795_v17 = vadd.f32 %v7794_v50, %v7793_v28 }
 0x3e7   :  { %v10553_v16 = vadd.f32 %v7795_v17, %v10505_v5 }
 0x3e9   :  { %v7796_v62 = vpop.f32.mrb[220].mxu1 }
 0x3ea   :  { %v7797_v23 = vpop.f32.mrb[221].mxu1 }
 0x3eb   :  { %v7798_v12 = vadd.f32 %v7797_v23, %v7796_v62  ;;  %v7799_v45 = vpop.f32.mrb[222].mxu1 }
 0x3ec   :  { %v7800_v22 = vpop.f32.mrb[223].mxu1 }
 0x3ed   :  { %v10556_v55 = vadd.f32 %v7798_v12, %v10508_v51  ;;  %v7801_v53 = vadd.f32 %v7800_v22, %v7799_v45 }
 0x3ef   :  { %v10559_v10 = vadd.f32 %v7801_v53, %v10511_v38 }
 0x3f1   :  { %v7818_v42 = vpop.f32.mrb[224].mxu1 }
 0x3f2   :  { %v7819_v2 = vpop.f32.mrb[225].mxu1 }
 0x3f3   :  { %v7820_v57 = vadd.f32 %v7819_v2, %v7818_v42  ;;  %v7821_v18 = vpop.f32.mrb[226].mxu1 }
 0x3f4   :  { %v7822_v40 = vpop.f32.mrb[227].mxu1 }
 0x3f5   :  { %v10562_v5 = vadd.f32 %v7820_v57, %v10514_v14  ;;  %v7823_v43 = vadd.f32 %v7822_v40, %v7821_v18 }
 0x3f7   :  { %v10565_v9 = vadd.f32 %v7823_v43, %v10517_v49 }
 0x3f9   :  { %v7824_v15 = vpop.f32.mrb[228].mxu1 }
 0x3fa   :  { %v7825_v47 = vpop.f32.mrb[229].mxu1 }
 0x3fb   :  { %v7826_v51 = vadd.f32 %v7825_v47, %v7824_v15  ;;  %v7827_v8 = vpop.f32.mrb[230].mxu1  ;;  %v10608_v15 = vrot.slane %v10339_v39, %v9724_v3 }
 0x3fc   :  { %v7828_v33 = vpop.f32.mrb[231].mxu1 }
 0x3fd   :  { %v10568_v38 = vadd.f32 %v7826_v51, %v10520_v26  ;;  %v7829_v31 = vadd.f32 %v7828_v33, %v7827_v8 }
 0x3ff   :  { %v10571_v37 = vadd.f32 %v7829_v31, %v10523_v21 }
 0x401   :  { %v7830_v25 = vpop.f32.mrb[232].mxu1 }
 0x402   :  { %v7831_v32 = vpop.f32.mrb[233].mxu1 }
 0x403   :  { %v7832_v14 = vadd.f32 %v7831_v32, %v7830_v25  ;;  %v7833_v27 = vpop.f32.mrb[234].mxu1 }
 0x404   :  { %v7834_v60 = vpop.f32.mrb[235].mxu1 }
 0x405   :  { %v10574_v49 = vadd.f32 %v7832_v14, %v10526_v30  ;;  %v7835_v19 = vadd.f32 %v7834_v60, %v7833_v27 }
 0x407   :  { %v10577_v36 = vadd.f32 %v7835_v19, %v10529_v13 }
 0x409   :  { %v7836_v56 = vpop.f32.mrb[236].mxu1 }
 0x40a   :  { %v7837_v24 = vpop.f32.mrb[237].mxu1 }
 0x40b   :  { %v7838_v26 = vadd.f32 %v7837_v24, %v7836_v56  ;;  %v7839_v34 = vpop.f32.mrb[238].mxu1 }
 0x40c   :  { %v7840_v1 = vpop.f32.mrb[239].mxu1 }
 0x40d   :  { %v10580_v21 = vadd.f32 %v7838_v26, %v10532_v61  ;;  %v7841_v52 = vadd.f32 %v7840_v1, %v7839_v34 }
 0x40f   :  { %v10583_v46 = vadd.f32 %v7841_v52, %v10535_v59 }
 0x411   :  { %v7842_v11 = vpop.f32.mrb[240].mxu1 }
 0x412   :  { %v7843_v20 = vpop.f32.mrb[241].mxu1 }
 0x413   :  { %v7844_v30 = vadd.f32 %v7843_v20, %v7842_v11  ;;  %v7845_v7 = vpop.f32.mrb[242].mxu1 }
 0x414   :  { %v7846_v54 = vpop.f32.mrb[243].mxu1 }
 0x415   :  { %v10586_v13 = vadd.f32 %v7844_v30, %v10538_v29  ;;  %v7847_v63 = vadd.f32 %v7846_v54, %v7845_v7 }
 0x417   :  { %v10589_v0 = vadd.f32 %v7847_v63, %v10541_v4 }
 0x419   :  { %v7848_v48 = vpop.f32.mrb[244].mxu1 }
 0x41a   :  { %v7849_v35 = vpop.f32.mrb[245].mxu1 }
 0x41b   :  { %v7850_v61 = vadd.f32 %v7849_v35, %v7848_v48  ;;  %v7851_v28 = vpop.f32.mrb[246].mxu1 }
 0x41c   :  { %v7852_v50 = vpop.f32.mrb[247].mxu1 }
 0x41d   :  { %v10592_v59 = vadd.f32 %v7850_v61, %v10544_v41  ;;  %v7853_v17 = vadd.f32 %v7852_v50, %v7851_v28 }
 0x41f   :  { %v10595_v62 = vadd.f32 %v7853_v17, %v10547_v44 }
 0x421   :  { %v7854_v23 = vpop.f32.mrb[248].mxu1 }
 0x422   :  { %v7855_v12 = vpop.f32.mrb[249].mxu1 }
 0x423   :  { %v7856_v29 = vadd.f32 %v7855_v12, %v7854_v23  ;;  %v7857_v45 = vpop.f32.mrb[250].mxu1 }
 0x424   :  { %v7858_v22 = vpop.f32.mrb[251].mxu1 }
 0x425   :  { %v10598_v4 = vadd.f32 %v7856_v29, %v10550_v58  ;;  %v7859_v53 = vadd.f32 %v7858_v22, %v7857_v45 }
 0x427   :  { %v10601_v42 = vadd.f32 %v7859_v53, %v10553_v16  ;;  %v10615_v16 = vrot.slane %v10339_v39, %v9730_v6 }
 0x429   :  { %v7860_v2 = vpop.f32.mrb[252].mxu1 }
 0x42a   :  { %v7861_v57 = vpop.f32.mrb[253].mxu1 }
 0x42b   :  { %v7862_v41 = vadd.f32 %v7861_v57, %v7860_v2  ;;  %v7863_v18 = vpop.f32.mrb[254].mxu1 }
 0x42c   :  { %v7864_v40 = vpop.f32.mrb[255].mxu1 }
 0x42d   :  { %v10604_v44 = vadd.f32 %v7862_v41, %v10556_v55  ;;  %v7865_v43 = vadd.f32 %v7864_v40, %v7863_v18 }
 0x42f   :  { %v10611_v58 = vadd.f32 %v7865_v43, %v10559_v10 }
 0x431   :  { %v6218_v47 = vpop.f32.mrb[96].mxu0  ;;  %v7882_v51 = vpop.f32.mrb[0].mxu1 }
 0x432   :  { %v8122_v8 = vadd.f32 %v6218_v47, %v10608_v15  ;;  %v6220_v33 = vpop.f32.mrb[97].mxu0  ;;  %v7883_v31 = vpop.f32.mrb[1].mxu1 }
 0x433   :  { %v8123_v55 = vadd.f32 %v6220_v33, %v10615_v16  ;;  %v7884_v25 = vadd.f32 %v7883_v31, %v7882_v51  ;;  %v6222_v32 = vpop.f32.mrb[98].mxu0  ;;  %v7885_v14 = vpop.f32.mrb[2].mxu1 }
 0x434   :  { %6879 = vst [vmem:[#allocation11] sm:$0xff] %v8122_v8  ;;  %v8124_v3 = vadd.f32 %v6222_v32, %v10608_v15  ;;  %v6224_v10 = vpop.f32.mrb[99].mxu0  ;;  %v7886_v27 = vpop.f32.mrb[3].mxu1 }
 0x435   :  { %6880 = vst [vmem:[#allocation11 + $0x8] sm:$0xff] %v8123_v55  ;;  %v6817_v6 = vadd.f32 %v7884_v25, %v10562_v5  ;;  %v8125_v39 = vadd.f32 %v6224_v10, %v10615_v16  ;;  %v7887_v60 = vadd.f32 %v7886_v27, %v7885_v14 }
 0x436   :  { %6882 = vst [vmem:[#allocation11 + $0x18] sm:$0xff] %v8124_v3 }
 0x437   :  { %6881 = vst [vmem:[#allocation11 + $0x10] sm:$0xff] %v6817_v6  ;;  %6883 = vst [vmem:[#allocation11 + $0x20] sm:$0xff] %v8125_v39  ;;  %v6820_v19 = vadd.f32 %v7887_v60, %v10565_v9 }
 0x439   :  { %6884 = vst [vmem:[#allocation11 + $0x28] sm:$0xff] %v6820_v19  ;;  %v6228_v56 = vpop.f32.mrb[100].mxu0  ;;  %v7888_v24 = vpop.f32.mrb[4].mxu1 }
 0x43a   :  { %v8126_v26 = vadd.f32 %v6228_v56, %v10608_v15  ;;  %v6230_v34 = vpop.f32.mrb[101].mxu0  ;;  %v7889_v1 = vpop.f32.mrb[5].mxu1 }
 0x43b   :  { %v8127_v52 = vadd.f32 %v6230_v34, %v10615_v16  ;;  %v7890_v11 = vadd.f32 %v7889_v1, %v7888_v24  ;;  %v6232_v20 = vpop.f32.mrb[102].mxu0  ;;  %v7891_v5 = vpop.f32.mrb[6].mxu1 }
 0x43c   :  { %6885 = vst [vmem:[#allocation11 + $0x30] sm:$0xff] %v8126_v26  ;;  %v8128_v30 = vadd.f32 %v6232_v20, %v10608_v15  ;;  %v6234_v7 = vpop.f32.mrb[103].mxu0  ;;  %v7892_v54 = vpop.f32.mrb[7].mxu1 }
 0x43d   :  { %6886 = vst [vmem:[#allocation11 + $0x38] sm:$0xff] %v8127_v52  ;;  %v6825_v9 = vadd.f32 %v7890_v11, %v10568_v38  ;;  %v8129_v63 = vadd.f32 %v6234_v7, %v10615_v16  ;;  %v7893_v48 = vadd.f32 %v7892_v54, %v7891_v5 }
 0x43e   :  { %6888 = vst [vmem:[#allocation11 + $0x48] sm:$0xff] %v8128_v30 }
 0x43f   :  { %6887 = vst [vmem:[#allocation11 + $0x40] sm:$0xff] %v6825_v9  ;;  %6889 = vst [vmem:[#allocation11 + $0x50] sm:$0xff] %v8129_v63  ;;  %v6828_v35 = vadd.f32 %v7893_v48, %v10571_v37 }
 0x441   :  { %6890 = vst [vmem:[#allocation11 + $0x58] sm:$0xff] %v6828_v35  ;;  %v6238_v61 = vpop.f32.mrb[104].mxu0  ;;  %v7894_v28 = vpop.f32.mrb[8].mxu1 }
 0x442   :  { %v8130_v50 = vadd.f32 %v6238_v61, %v10608_v15  ;;  %v6240_v17 = vpop.f32.mrb[105].mxu0  ;;  %v7895_v23 = vpop.f32.mrb[9].mxu1 }
 0x443   :  { %v8131_v12 = vadd.f32 %v6240_v17, %v10615_v16  ;;  %v7896_v29 = vadd.f32 %v7895_v23, %v7894_v28  ;;  %v6242_v45 = vpop.f32.mrb[106].mxu0  ;;  %v7897_v38 = vpop.f32.mrb[10].mxu1 }
 0x444   :  { %6891 = vst [vmem:[#allocation11 + $0x60] sm:$0xff] %v8130_v50  ;;  %v8132_v22 = vadd.f32 %v6242_v45, %v10608_v15  ;;  %v6244_v53 = vpop.f32.mrb[107].mxu0  ;;  %v7898_v2 = vpop.f32.mrb[11].mxu1 }
 0x445   :  { %6892 = vst [vmem:[#allocation11 + $0x68] sm:$0xff] %v8131_v12  ;;  %v6833_v37 = vadd.f32 %v7896_v29, %v10574_v49  ;;  %v8133_v57 = vadd.f32 %v6244_v53, %v10615_v16  ;;  %v7899_v41 = vadd.f32 %v7898_v2, %v7897_v38 }
 0x446   :  { %6894 = vst [vmem:[#allocation11 + $0x78] sm:$0xff] %v8132_v22 }
 0x447   :  { %6893 = vst [vmem:[#allocation11 + $0x70] sm:$0xff] %v6833_v37  ;;  %6895 = vst [vmem:[#allocation11 + $0x80] sm:$0xff] %v8133_v57  ;;  %v6836_v18 = vadd.f32 %v7899_v41, %v10577_v36 }
 0x449   :  { %6896 = vst [vmem:[#allocation11 + $0x88] sm:$0xff] %v6836_v18  ;;  %v6248_v40 = vpop.f32.mrb[108].mxu0  ;;  %v7900_v43 = vpop.f32.mrb[12].mxu1 }
 0x44a   :  { %v8134_v47 = vadd.f32 %v6248_v40, %v10608_v15  ;;  %v6250_v51 = vpop.f32.mrb[109].mxu0  ;;  %v7901_v8 = vpop.f32.mrb[13].mxu1 }
 0x44b   :  { %v8135_v33 = vadd.f32 %v6250_v51, %v10615_v16  ;;  %v7902_v31 = vadd.f32 %v7901_v8, %v7900_v43  ;;  %v6252_v55 = vpop.f32.mrb[110].mxu0  ;;  %v7903_v49 = vpop.f32.mrb[14].mxu1 }
 0x44c   :  { %6897 = vst [vmem:[#allocation11 + $0x90] sm:$0xff] %v8134_v47  ;;  %v8136_v25 = vadd.f32 %v6252_v55, %v10608_v15  ;;  %v6254_v32 = vpop.f32.mrb[111].mxu0  ;;  %v7904_v14 = vpop.f32.mrb[15].mxu1 }
 0x44d   :  { %6898 = vst [vmem:[#allocation11 + $0x98] sm:$0xff] %v8135_v33  ;;  %v6841_v36 = vadd.f32 %v7902_v31, %v10580_v21  ;;  %v8137_v3 = vadd.f32 %v6254_v32, %v10615_v16  ;;  %v7905_v10 = vadd.f32 %v7904_v14, %v7903_v49 }
 0x44e   :  { %6900 = vst [vmem:[#allocation11 + $0xa8] sm:$0xff] %v8136_v25 }
 0x44f   :  { %6899 = vst [vmem:[#allocation11 + $0xa0] sm:$0xff] %v6841_v36  ;;  %6901 = vst [vmem:[#allocation11 + $0xb0] sm:$0xff] %v8137_v3  ;;  %v6844_v27 = vadd.f32 %v7905_v10, %v10583_v46 }
 0x451   :  { %6902 = vst [vmem:[#allocation11 + $0xb8] sm:$0xff] %v6844_v27  ;;  %v6258_v6 = vpop.f32.mrb[112].mxu0  ;;  %v7906_v39 = vpop.f32.mrb[16].mxu1 }
 0x452   :  { %v8138_v60 = vadd.f32 %v6258_v6, %v10608_v15  ;;  %v6260_v19 = vpop.f32.mrb[113].mxu0  ;;  %v7907_v56 = vpop.f32.mrb[17].mxu1 }
 0x453   :  { %v8139_v24 = vadd.f32 %v6260_v19, %v10615_v16  ;;  %v7908_v26 = vadd.f32 %v7907_v56, %v7906_v39  ;;  %v6262_v34 = vpop.f32.mrb[114].mxu0  ;;  %v7909_v21 = vpop.f32.mrb[18].mxu1 }
 0x454   :  { %6903 = vst [vmem:[#allocation11 + $0xc0] sm:$0xff] %v8138_v60  ;;  %v8140_v1 = vadd.f32 %v6262_v34, %v10608_v15  ;;  %v6264_v52 = vpop.f32.mrb[115].mxu0  ;;  %v7910_v11 = vpop.f32.mrb[19].mxu1 }
 0x455   :  { %6904 = vst [vmem:[#allocation11 + $0xc8] sm:$0xff] %v8139_v24  ;;  %v6849_v46 = vadd.f32 %v7908_v26, %v10586_v13  ;;  %v8141_v20 = vadd.f32 %v6264_v52, %v10615_v16  ;;  %v7911_v5 = vadd.f32 %v7910_v11, %v7909_v21 }
 0x456   :  { %6906 = vst [vmem:[#allocation11 + $0xd8] sm:$0xff] %v8140_v1 }
 0x457   :  { %6905 = vst [vmem:[#allocation11 + $0xd0] sm:$0xff] %v6849_v46  ;;  %6907 = vst [vmem:[#allocation11 + $0xe0] sm:$0xff] %v8141_v20  ;;  %v6852_v30 = vadd.f32 %v7911_v5, %v10589_v0 }
 0x459   :  { %6908 = vst [vmem:[#allocation11 + $0xe8] sm:$0xff] %v6852_v30  ;;  %v6268_v7 = vpop.f32.mrb[116].mxu0  ;;  %v7912_v54 = vpop.f32.mrb[20].mxu1 }
 0x45a   :  { %v8142_v9 = vadd.f32 %v6268_v7, %v10608_v15  ;;  %v6270_v63 = vpop.f32.mrb[117].mxu0  ;;  %v7913_v48 = vpop.f32.mrb[21].mxu1 }
 0x45b   :  { %v8143_v35 = vadd.f32 %v6270_v63, %v10615_v16  ;;  %v7914_v61 = vadd.f32 %v7913_v48, %v7912_v54  ;;  %v6272_v28 = vpop.f32.mrb[118].mxu0  ;;  %v7915_v13 = vpop.f32.mrb[22].mxu1 }
 0x45c   :  { %6909 = vst [vmem:[#allocation11 + $0xf0] sm:$0xff] %v8142_v9  ;;  %v8144_v50 = vadd.f32 %v6272_v28, %v10608_v15  ;;  %v6274_v17 = vpop.f32.mrb[119].mxu0  ;;  %v7916_v23 = vpop.f32.mrb[23].mxu1 }
 0x45d   :  { %6910 = vst [vmem:[#allocation11 + $0xf8] sm:$0xff] %v8143_v35  ;;  %v6857_v0 = vadd.f32 %v7914_v61, %v10592_v59  ;;  %v8145_v12 = vadd.f32 %v6274_v17, %v10615_v16  ;;  %v7917_v29 = vadd.f32 %v7916_v23, %v7915_v13 }
 0x45e   :  { %6912 = vst [vmem:[#allocation11 + $0x108] sm:$0xff] %v8144_v50 }
 0x45f   :  { %6911 = vst [vmem:[#allocation11 + $0x100] sm:$0xff] %v6857_v0  ;;  %6913 = vst [vmem:[#allocation11 + $0x110] sm:$0xff] %v8145_v12  ;;  %v6860_v45 = vadd.f32 %v7917_v29, %v10595_v62 }
 0x461   :  { %6914 = vst [vmem:[#allocation11 + $0x118] sm:$0xff] %v6860_v45  ;;  %v6278_v38 = vpop.f32.mrb[120].mxu0  ;;  %v7918_v22 = vpop.f32.mrb[24].mxu1 }
 0x462   :  { %v8146_v53 = vadd.f32 %v6278_v38, %v10608_v15  ;;  %v6280_v2 = vpop.f32.mrb[121].mxu0  ;;  %v7919_v37 = vpop.f32.mrb[25].mxu1 }
 0x463   :  { %v8147_v57 = vadd.f32 %v6280_v2, %v10615_v16  ;;  %v7920_v41 = vadd.f32 %v7919_v37, %v7918_v22  ;;  %v6282_v18 = vpop.f32.mrb[122].mxu0  ;;  %v7921_v59 = vpop.f32.mrb[26].mxu1 }
 0x464   :  { %6915 = vst [vmem:[#allocation11 + $0x120] sm:$0xff] %v8146_v53  ;;  %v8148_v40 = vadd.f32 %v6282_v18, %v10608_v15  ;;  %v6284_v43 = vpop.f32.mrb[123].mxu0  ;;  %v7922_v47 = vpop.f32.mrb[27].mxu1 }
 0x465   :  { %6916 = vst [vmem:[#allocation11 + $0x128] sm:$0xff] %v8147_v57  ;;  %v6865_v62 = vadd.f32 %v7920_v41, %v10598_v4  ;;  %v8149_v51 = vadd.f32 %v6284_v43, %v10615_v16  ;;  %v7923_v8 = vadd.f32 %v7922_v47, %v7921_v59 }
 0x466   :  { %6918 = vst [vmem:[#allocation11 + $0x138] sm:$0xff] %v8148_v40 }
 0x467   :  { %6917 = vst [vmem:[#allocation11 + $0x130] sm:$0xff] %v6865_v62  ;;  %6919 = vst [vmem:[#allocation11 + $0x140] sm:$0xff] %v8149_v51  ;;  %v6868_v33 = vadd.f32 %v7923_v8, %v10601_v42 }
 0x469   :  { %6920 = vst [vmem:[#allocation11 + $0x148] sm:$0xff] %v6868_v33  ;;  %v6288_v31 = vpop.f32.mrb[124].mxu0  ;;  %v7924_v55 = vpop.f32.mrb[28].mxu1 }
 0x46a   :  { %v8150_v49 = vadd.f32 %v6288_v31, %v10608_v15  ;;  %v6290_v25 = vpop.f32.mrb[125].mxu0  ;;  %v7925_v32 = vpop.f32.mrb[29].mxu1 }
 0x46b   :  { %v8151_v14 = vadd.f32 %v6290_v25, %v10615_v16  ;;  %v7926_v36 = vadd.f32 %v7925_v32, %v7924_v55  ;;  %v6292_v3 = vpop.f32.mrb[126].mxu0  ;;  %v7927_v4 = vpop.f32.mrb[30].mxu1 }
 0x46c   :  { %6921 = vst [vmem:[#allocation11 + $0x150] sm:$0xff] %v8150_v49  ;;  %v8152_v10 = vadd.f32 %v6292_v3, %v10608_v15  ;;  %v6294_v27 = vpop.f32.mrb[127].mxu0  ;;  %v7928_v6 = vpop.f32.mrb[31].mxu1 }
 0x46d   :  { %6922 = vst [vmem:[#allocation11 + $0x158] sm:$0xff] %v8151_v14  ;;  %v6873_v42 = vadd.f32 %v7926_v36, %v10604_v44  ;;  %v8153_v39 = vadd.f32 %v6294_v27, %v10615_v16  ;;  %v7929_v60 = vadd.f32 %v7928_v6, %v7927_v4 }
 0x46e   :  { %6924 = vst [vmem:[#allocation11 + $0x168] sm:$0xff] %v8152_v10 }
 0x46f   :  { %6923 = vst [vmem:[#allocation11 + $0x160] sm:$0xff] %v6873_v42  ;;  %6925 = vst [vmem:[#allocation11 + $0x170] sm:$0xff] %v8153_v39  ;;  %v6876_v19 = vadd.f32 %v7929_v60, %v10611_v58 }
 0x471   :  { %6926 = vst [vmem:[#allocation11 + $0x178] sm:$0xff] %v6876_v19 }
 0x472   :  { %6931 = vsyncadd [#allocation4], 5376  ;;  %s9561_s4 = smov [#allocation11]  }
 0x473   :  { %s6932_s29 = sshll.u32 %s9561_s4, 4  ;;  %s6933_s29 = int_to_ptr.vmem [resolvable:$true] %s6932_s29 }
 0x474   :  { %s9521_s30 = scalar_lea.vmem %s6933_s29, 768  ;;  %s9525_s3 = scalar_lea.vmem %s6933_s29, 6144 }
 0x475   :  { %p9522_p12 = scmp.ne.s32.totalorder %s6933_s29, %s9521_s30  ;;  %p9526_p13 = scmp.lt.s32.totalorder %s6933_s29, %s6933_s29 }
 0x476   :  { %p9527_p0 = scmp.lt.s32.totalorder %s9525_s3, %s9521_s30 }
 0x478   :  { %p9528_p1 = por %p9527_p0, %p9526_p13 }
 0x47a   :  { %p9529_p2 = pnand %p9528_p1, %p9522_p12 }
 0x47c   :  { %9532 = shalt.err (!%p9529_p2)
}
 0x47d   :  { %s9533_s8 = scalar_lea.hbm %s10682_s5, 768 }
 0x47e   :  { %p9534_p3 = scmp.ne.s32.totalorder %s10682_s5, %s9533_s8  ;;  %p9537_p4 = scmp.lt.u32.totalorder %s9533_s8, %s10682_s5 }
 0x480   :  { %p9539_p5 = pnand %p9537_p4, %p9534_p3 }
 0x482   :  { %9542 = shalt.err (!%p9539_p5)
}
 0x483   :  { %s9562_s14 = smov 384   ;;  %s9563_s15 = smov 24  }
 0x484   :  { %6938 = dma.vmem_to_hbm [thread:$0]  %s6933_s29, 768, %s10682_s5, [#allocation4], %s9562_s14, %s9562_s14, %s9563_s15  }
 0x485   :  { %9549 = dma.done.wait [#allocation4], 6144  }
 0x486   :  { %9550 = vsyncadd [#allocation4], 4294961152 }
 0x487   :  { %6942 = vsyncpa [#allocation3], 1 }
 0x488   :  { %6943 = vsyncpa [#allocation6], 1 }
 0x489   :  { %6944 = vsyncpa [#allocation9], 1 }
 0x48a   :  { %6945 = vsyncpa [#allocation4], 1 }

</bundles_post_ra>
